<compile_context>
chip_gen: v7x
topology: tpu7x:2x2x1
jax: 0.10.0
libtpu: 0.0.40
codegen_flags: <defaults>
</compile_context>

<pallas_src>
import numpy as np

import jax
import jax.numpy as jnp
from jax.experimental import pallas as pl
from jax.experimental.pallas import tpu as pltpu

EPS = 1e-5
_MXU_DTYPE = jnp.bfloat16
_VMEM = pl.BlockSpec(memory_space=pltpu.MemorySpace.VMEM)


# ----------------------------------------------------------------------------
# Pallas kernels
# ----------------------------------------------------------------------------
def _deconv_bn_relu_kernel(x_ref, w_ref, g_ref, bt_ref, o_ref, y_ref, s1_ref, s2_ref):
    """Fused ConvTranspose2d(4,2,1,bias=False) + BatchNorm2d(train) + ReLU.

    grid = (2, B); axis 0 is the pass (0: GEMM+stats, 1: BN apply), axis 1 is batch.
    x_ref : (1, H+2, W+2, Cin)   zero-padded NHWC image (bf16)
    w_ref : (9, Cin, 4*Cout)     fused tap weights, columns phase-major (ph, pw, co)
    g_ref, bt_ref : (1, Cout)    BN gamma / beta (f32)
    o_ref : (1, H, W, 4*Cout)    phase-separated output (bf16)
    y_ref : (B, H, W, 4*Cout)    f32 GEMM output, resident in VMEM across both passes
    s1_ref, s2_ref : (1, 4*Cout) running sum / sum-of-squares; reused for scale/shift
    """
    B, H, W, C4 = y_ref.shape
    cout = C4 // 4
    p = pl.program_id(0)
    b = pl.program_id(1)

    @pl.when((p == 0) & (b == 0))
    def _init():
        s1_ref[...] = jnp.zeros_like(s1_ref)
        s2_ref[...] = jnp.zeros_like(s2_ref)

    @pl.when(p == 0)
    def _gemm_stats_pass():
        def row_body(h, carry):
            acc = None
            for t in range(9):                       # unrolled 3x3 taps
                dh, dw = divmod(t, 3)
                tap = x_ref[0, h + dh, pl.ds(dw, W), :]          # (W, Cin) bf16
                part = jnp.dot(tap, w_ref[t], preferred_element_type=jnp.float32)
                acc = part if acc is None else acc + part        # (W, 4*Cout) f32
            y_ref[b, h] = acc
            s1_ref[...] += jnp.sum(acc, axis=0, keepdims=True)
            s2_ref[...] += jnp.sum(acc * acc, axis=0, keepdims=True)
            return carry

        jax.lax.fori_loop(0, H, row_body, 0)

    @pl.when(p == 1)
    def _apply_pass():
        @pl.when(b == 0)
        def _finalize_stats():
            # Fold the 4 phase columns of each channel, build scale/shift, and
            # stash them back into s1/s2 (tiled to the 4*Cout column layout).
            inv_n = 1.0 / float(4 * B * H * W)       # == B * (2H) * (2W)
            s1 = s1_ref[...]
            s2 = s2_ref[...]
            t1 = (s1[:, 0:cout] + s1[:, cout:2 * cout]
                  + s1[:, 2 * cout:3 * cout] + s1[:, 3 * cout:4 * cout])
            t2 = (s2[:, 0:cout] + s2[:, cout:2 * cout]
                  + s2[:, 2 * cout:3 * cout] + s2[:, 3 * cout:4 * cout])
            mean = t1 * inv_n
            var = jnp.maximum(t2 * inv_n - mean * mean, 0.0)     # biased var (torch BN)
            inv_std = jax.lax.rsqrt(var + EPS)
            scale_c = g_ref[...] * inv_std                       # (1, Cout)
            shift_c = bt_ref[...] - mean * scale_c
            for k in range(4):
                sl = slice(k * cout, (k + 1) * cout)
                s1_ref[:, sl] = scale_c
                s2_ref[:, sl] = shift_c

        scale = s1_ref[...].reshape(1, 1, C4)
        shift = s2_ref[...].reshape(1, 1, C4)
        o_ref[0] = jnp.maximum(y_ref[b] * scale + shift, 0.0).astype(o_ref.dtype)


def _deconv_tanh_kernel(x_ref, w_ref, o_ref):
    """ConvTranspose2d(4,2,1,bias=False) + Tanh; single pass, per-image grid step."""
    _, H, W, _ = o_ref.shape
    def row_body(h, carry):
        acc = None
        for t in range(9):
            dh, dw = divmod(t, 3)
            tap = x_ref[0, h + dh, pl.ds(dw, W), :]
            part = jnp.dot(tap, w_ref[t], preferred_element_type=jnp.float32)
            acc = part if acc is None else acc + part
        o_ref[0, h] = jnp.tanh(acc).astype(o_ref.dtype)
        return carry

    jax.lax.fori_loop(0, H, row_body, 0)


def _mlp_kernel(z_ref, w1_ref, g1_ref, b1_ref, w2_ref, g2_ref, b2_ref, o_ref):
    """Fused Linear+BN1d+ReLU -> Linear+BN1d+ReLU (training-mode batch statistics)."""
    def bn_relu(y, g, b):
        inv_n = 1.0 / y.shape[0]
        mean = jnp.sum(y, axis=0, keepdims=True) * inv_n
        var = jnp.maximum(jnp.sum(y * y, axis=0, keepdims=True) * inv_n - mean * mean, 0.0)
        return jnp.maximum((y - mean) * jax.lax.rsqrt(var + EPS) * g + b, 0.0)

    h = jnp.dot(z_ref[...], w1_ref[...], preferred_element_type=jnp.float32)
    h = bn_relu(h, g1_ref[...], b1_ref[...])
    h = jnp.dot(h.astype(w2_ref.dtype), w2_ref[...], preferred_element_type=jnp.float32)
    h = bn_relu(h, g2_ref[...], b2_ref[...])
    o_ref[...] = h.astype(o_ref.dtype)


# ----------------------------------------------------------------------------
# pallas_call wrappers
# ----------------------------------------------------------------------------
def convt_bn_relu(x, wf, gamma, beta):
    """x: (B, H, W, Cin) NHWC; wf: (9, Cin, 4*Cout); gamma/beta: (1, Cout)."""
    B, H, W, C = x.shape
    C4 = wf.shape[2]
    xp = jnp.pad(x, ((0, 0), (1, 1), (1, 1), (0, 0))).astype(_MXU_DTYPE)
    out4 = pl.pallas_call(
        _deconv_bn_relu_kernel,
        grid=(2, B),
        in_specs=[
            # pass 1 does not read x: keep the index pinned to the last image so no
            # redundant re-fetch happens after pass 0.
            pl.BlockSpec((1, H + 2, W + 2, C),
                         lambda p, b: (b * (1 - p) + (B - 1) * p, 0, 0, 0)),
            pl.BlockSpec((9, C, C4), lambda p, b: (0, 0, 0)),
            pl.BlockSpec((1, C4 // 4), lambda p, b: (0, 0)),
            pl.BlockSpec((1, C4 // 4), lambda p, b: (0, 0)),
        ],
        # during pass 0 all steps map to block 0 -> no garbage write-backs.
        out_specs=pl.BlockSpec((1, H, W, C4), lambda p, b: (b * p, 0, 0, 0)),
        out_shape=jax.ShapeDtypeStruct((B, H, W, C4), _MXU_DTYPE),
        scratch_shapes=[
            pltpu.VMEM((B, H, W, C4), jnp.float32),   # resident GEMM output
            pltpu.VMEM((1, C4), jnp.float32),         # sum   -> scale
            pltpu.VMEM((1, C4), jnp.float32),         # sumsq -> shift
        ],
        compiler_params=pltpu.CompilerParams(
            dimension_semantics=("arbitrary", "arbitrary")),
    )(xp, wf, gamma, beta)
    return _interleave_phases(out4, C4 // 4)


def convt_tanh(x, wf):
    B, H, W, C = x.shape
    C4 = wf.shape[2]
    xp = jnp.pad(x, ((0, 0), (1, 1), (1, 1), (0, 0))).astype(_MXU_DTYPE)
    out4 = pl.pallas_call(
        _deconv_tanh_kernel,
        grid=(B,),
        in_specs=[
            pl.BlockSpec((1, H + 2, W + 2, C), lambda b: (b, 0, 0, 0)),
            pl.BlockSpec((9, C, C4), lambda b: (0, 0, 0)),
        ],
        out_specs=pl.BlockSpec((1, H, W, C4), lambda b: (b, 0, 0, 0)),
        out_shape=jax.ShapeDtypeStruct((B, H, W, C4), _MXU_DTYPE),
        compiler_params=pltpu.CompilerParams(dimension_semantics=("parallel",)),
    )(xp, wf)
    return _interleave_phases(out4, C4 // 4)


def mlp_bn_relu(z, w1, g1, b1, w2, g2, b2):
    # Batch is tiny and the weights fit VMEM: both Linear+BN+ReLU stages are fused
    # into one resident (grid-less) call -> single launch, no HBM round trip of the
    # 1024-wide hidden activation.
    B = z.shape[0]
    n2 = w2.shape[1]
    return pl.pallas_call(
        _mlp_kernel,
        out_shape=jax.ShapeDtypeStruct((B, n2), _MXU_DTYPE),
        in_specs=[_VMEM] * 7,
        out_specs=_VMEM,
    )(z.astype(_MXU_DTYPE), w1, g1, b1, w2, g2, b2)


# ----------------------------------------------------------------------------
# XLA glue (cheap): phase interleave -> NHWC; fuses with the next layer's pad.
# ----------------------------------------------------------------------------
def _interleave_phases(y4, cout):
    """(B, H, W, 4*Cout) phase-major -> NHWC (B, 2H, 2W, Cout)."""
    B, H, W, _ = y4.shape
    y = y4.reshape(B, H, W, 2, 2, cout).transpose(0, 1, 3, 2, 4, 5)
    return y.reshape(B, 2 * H, 2 * W, cout)


# ----------------------------------------------------------------------------
# One-time host-side parameter repacking (outside jit)
# ----------------------------------------------------------------------------
def _fuse_convt_weight_np(w):
    """torch ConvTranspose2d weight (Cin, Cout, 4, 4) -> (9, Cin, 4*Cout).

    Tap index t = dh*3 + dw over the 3x3 input neighbourhood; columns are
    phase-major ((oh%2)*2 + ow%2, co).  Output pixel (2p+ph, 2q+pw) only sees
    kernel taps kh = ph - 2*dh + 3, kw = pw - 2*dw + 3; other entries are zero.
    """
    w = np.asarray(w, np.float32)
    cin, cout = w.shape[0], w.shape[1]
    wf = np.zeros((3, 3, cin, 2, 2, cout), np.float32)
    for dh in range(3):
        for ph in range(2):
            kh = ph - 2 * dh + 3
            if not 0 <= kh < 4:
                continue
            for dw in range(3):
                for pw in range(2):
                    kw = pw - 2 * dw + 3
                    if not 0 <= kw < 4:
                        continue
                    wf[dh, dw, :, ph, pw, :] = w[:, :, kh, kw]
    return wf.reshape(9, cin, 4 * cout)


def prepare_params(params):
    def row_f32(v):
        return jnp.asarray(np.asarray(v, np.float32)[None, :])

    prep = {
        "mlp": (jnp.asarray(params["w1"], _MXU_DTYPE),
                row_f32(params["g1"]), row_f32(params["b1"]),
                jnp.asarray(params["w2"], _MXU_DTYPE),
                row_f32(params["g2"]), row_f32(params["b2"])),
        "pyramid": [],
    }
    for (w, g, b) in params["pyramid"]:
        prep["pyramid"].append((jnp.asarray(_fuse_convt_weight_np(w), _MXU_DTYPE),
                                row_f32(g), row_f32(b)))
    prep["w_last"] = jnp.asarray(_fuse_convt_weight_np(params["w_last"]), _MXU_DTYPE)
    return prep


# ----------------------------------------------------------------------------
# Generator forward (matches the torch Generator, n_extra_layer=0)
# ----------------------------------------------------------------------------
def generator_forward(z, prep):
    w1, g1, b1, w2, g2, b2 = prep["mlp"]
    h = mlp_bn_relu(z, w1, g1, b1, w2, g2, b2)                    # (B, ngf*64) bf16
    ngf = w2.shape[1] // 64
    # TODO(synk): the torch Sequential feeds the 2-D Linear output straight into
    # ConvTranspose2d (which would error); we insert the implied reshape to
    # (B, ngf, 8, 8) and keep activations NHWC from here on.
    x = h.reshape(z.shape[0], ngf, 8, 8).transpose(0, 2, 3, 1)    # NHWC
    for (wf, g, b) in prep["pyramid"]:
        x = convt_bn_relu(x, wf, g, b)
    # TODO(synk): n_extra_layer > 0 (3x3 stride-1 ConvTranspose blocks) not implemented; default is 0.
    x = convt_tanh(x, prep["w_last"])                             # NHWC bf16
    return x.transpose(0, 3, 1, 2).astype(jnp.float32)            # NCHW once, at the end


# ----------------------------------------------------------------------------
# Pure-JAX reference (f32 math, operands rounded to bf16 to mirror the MXU inputs)
# ----------------------------------------------------------------------------
def _bf16_round(x):
    return x.astype(jnp.bfloat16).astype(jnp.float32)


def _convt_ref(x, w):
    wk = w[:, :, ::-1, ::-1].transpose(1, 0, 2, 3)  # (Cout, Cin, 4, 4)
    return jax.lax.conv_general_dilated(
        _bf16_round(x), _bf16_round(wk), window_strides=(1, 1),
        padding=[(2, 2), (2, 2)], lhs_dilation=(2, 2),
        dimension_numbers=("NCHW", "OIHW", "NCHW"))


def _bn_ref(y, g, b, axes):
    m = y.mean(axis=axes, keepdims=True)
    v = ((y - m) ** 2).mean(axis=axes, keepdims=True)
    return (y - m) / jnp.sqrt(v + EPS) * g + b


def reference_forward(z, params, ngf):
    h = _bf16_round(z) @ _bf16_round(params["w1"])
    h = jnp.maximum(_bn_ref(h, params["g1"][None, :], params["b1"][None, :], (0,)), 0.0)
    h = _bf16_round(h) @ _bf16_round(params["w2"])
    h = jnp.maximum(_bn_ref(h, params["g2"][None, :], params["b2"][None, :], (0,)), 0.0)
    x = h.reshape(z.shape[0], ngf, 8, 8)
    for (w, g, b) in params["pyramid"]:
        x = _convt_ref(x, w)
        x = jnp.maximum(_bn_ref(x, g[None, :, None, None], b[None, :, None, None], (0, 2, 3)), 0.0)
    x = _convt_ref(x, params["w_last"])
    return jnp.tanh(x)


# ----------------------------------------------------------------------------
# Deterministic parameter init (shapes from Generator.__init__)
# ----------------------------------------------------------------------------
def init_params(key, input_size, z_dim, channel, ngf):
    counter = [0]

    def nk():
        counter[0] += 1
        return jax.random.fold_in(key, counter[0])

    params = {}
    params["w1"] = 0.05 * jax.random.normal(nk(), (z_dim, 1024), jnp.float32)
    params["g1"] = 1.0 + 0.1 * jax.random.normal(nk(), (1024,), jnp.float32)
    params["b1"] = 0.1 * jax.random.normal(nk(), (1024,), jnp.float32)
    params["w2"] = 0.05 * jax.random.normal(nk(), (1024, ngf * 8 * 8), jnp.float32)
    params["g2"] = 1.0 + 0.1 * jax.random.normal(nk(), (ngf * 8 * 8,), jnp.float32)
    params["b2"] = 0.1 * jax.random.normal(nk(), (ngf * 8 * 8,), jnp.float32)

    pyramid = []
    csize, cngf = 8, ngf
    while csize < input_size // 2:
        w = 0.1 * jax.random.normal(nk(), (cngf, cngf // 2, 4, 4), jnp.float32)
        g = 1.0 + 0.1 * jax.random.normal(nk(), (cngf // 2,), jnp.float32)
        b = 0.1 * jax.random.normal(nk(), (cngf // 2,), jnp.float32)
        pyramid.append((w, g, b))
        cngf //= 2
        csize *= 2
    params["pyramid"] = pyramid
    params["w_last"] = 0.1 * jax.random.normal(nk(), (cngf, channel, 4, 4), jnp.float32)
    return params


if __name__ == "__main__":
    INPUT_SIZE, Z_DIM, CHANNEL, NGF, BATCH = 32, 8, 3, 8, 2

    key = jax.random.PRNGKey(0)
    params = init_params(key, INPUT_SIZE, Z_DIM, CHANNEL, NGF)
    prep = prepare_params(params)   # one-time host-side weight fusion (outside jit)
    z = jax.random.normal(jax.random.fold_in(key, 999), (BATCH, Z_DIM), jnp.float32)

    fwd = jax.jit(generator_forward)
    out = jax.block_until_ready(fwd(z, prep))

    assert out.shape == (BATCH, CHANNEL, INPUT_SIZE, INPUT_SIZE), out.shape

    ref = reference_forward(z, params, NGF)
    err = float(jnp.max(jnp.abs(out - ref)))
    assert err < 5e-2, f"mismatch vs reference: {err}"

    print("KERNEL_OK")
</pallas_src>

<mosaic_0001>
module attributes {stable_mosaic.version = 11 : i64} {
  func.func @_mlp_kernel(%arg0: memref<2x8xbf16, #tpu.memory_space<vmem>>, %arg1: memref<8x1024xbf16, #tpu.memory_space<vmem>>, %arg2: memref<1x1024xf32, #tpu.memory_space<vmem>>, %arg3: memref<1x1024xf32, #tpu.memory_space<vmem>>, %arg4: memref<1024x512xbf16, #tpu.memory_space<vmem>>, %arg5: memref<1x512xf32, #tpu.memory_space<vmem>>, %arg6: memref<1x512xf32, #tpu.memory_space<vmem>>, %arg7: memref<2x512xbf16, #tpu.memory_space<vmem>>) attributes {dimension_semantics = [], scalar_prefetch = 0 : i64, scratch_operands = 0 : i64, tpu.core_type = #tpu.core_type<tc>} {
    %c0 = arith.constant 0 : index
    %c0_0 = arith.constant 0 : index
    %0 = vector.load %arg0[%c0, %c0_0] : memref<2x8xbf16, #tpu.memory_space<vmem>>, vector<2x8xbf16>
    %c0_1 = arith.constant 0 : index
    %c0_2 = arith.constant 0 : index
    %1 = vector.load %arg1[%c0_1, %c0_2] : memref<8x1024xbf16, #tpu.memory_space<vmem>>, vector<8x1024xbf16>
    %cst = arith.constant dense<0.000000e+00> : vector<2x1024xf32>
    %2 = tpu.matmul %0, %1, %cst {dimension_numbers = #tpu.dot_dimension_numbers<[1], [0], [0], [1], [0, 0, 1, 1], [], []>} : vector<2x8xbf16>, vector<8x1024xbf16>, vector<2x1024xf32> -> vector<2x1024xf32>
    %c0_3 = arith.constant 0 : index
    %c0_4 = arith.constant 0 : index
    %3 = vector.load %arg2[%c0_3, %c0_4] : memref<1x1024xf32, #tpu.memory_space<vmem>>, vector<1x1024xf32>
    %c0_5 = arith.constant 0 : index
    %c0_6 = arith.constant 0 : index
    %4 = vector.load %arg3[%c0_5, %c0_6] : memref<1x1024xf32, #tpu.memory_space<vmem>>, vector<1x1024xf32>
    %cst_7 = arith.constant dense<0.000000e+00> : vector<1024xf32>
    %5 = vector.multi_reduction <add>, %2, %cst_7 [0] : vector<2x1024xf32> to vector<1024xf32>
    %6 = vector.shape_cast %5 : vector<1024xf32> to vector<1x1024xf32>
    %cst_8 = arith.constant 5.000000e-01 : f32
    %7 = vector.broadcast %cst_8 : f32 to vector<1x1024xf32>
    %8 = arith.mulf %6, %7 : vector<1x1024xf32>
    %9 = arith.mulf %2, %2 : vector<2x1024xf32>
    %cst_9 = arith.constant dense<0.000000e+00> : vector<1024xf32>
    %10 = vector.multi_reduction <add>, %9, %cst_9 [0] : vector<2x1024xf32> to vector<1024xf32>
    %11 = vector.shape_cast %10 : vector<1024xf32> to vector<1x1024xf32>
    %cst_10 = arith.constant 5.000000e-01 : f32
    %12 = vector.broadcast %cst_10 : f32 to vector<1x1024xf32>
    %13 = arith.mulf %11, %12 : vector<1x1024xf32>
    %14 = arith.mulf %8, %8 : vector<1x1024xf32>
    %15 = arith.subf %13, %14 : vector<1x1024xf32>
    %cst_11 = arith.constant 0.000000e+00 : f32
    %16 = vector.broadcast %cst_11 : f32 to vector<1x1024xf32>
    %17 = arith.maximumf %15, %16 : vector<1x1024xf32>
    %18 = vector.broadcast %8 : vector<1x1024xf32> to vector<2x1024xf32>
    %19 = arith.subf %2, %18 : vector<2x1024xf32>
    %cst_12 = arith.constant 9.99999974E-6 : f32
    %20 = vector.broadcast %cst_12 : f32 to vector<1x1024xf32>
    %21 = arith.addf %17, %20 : vector<1x1024xf32>
    %22 = math.rsqrt %21 : vector<1x1024xf32>
    %23 = vector.broadcast %22 : vector<1x1024xf32> to vector<2x1024xf32>
    %24 = arith.mulf %19, %23 : vector<2x1024xf32>
    %25 = vector.broadcast %3 : vector<1x1024xf32> to vector<2x1024xf32>
    %26 = arith.mulf %24, %25 : vector<2x1024xf32>
    %27 = vector.broadcast %4 : vector<1x1024xf32> to vector<2x1024xf32>
    %28 = arith.addf %26, %27 : vector<2x1024xf32>
    %cst_13 = arith.constant 0.000000e+00 : f32
    %29 = vector.broadcast %cst_13 : f32 to vector<2x1024xf32>
    %30 = arith.maximumf %28, %29 : vector<2x1024xf32>
    %31 = arith.truncf %30 : vector<2x1024xf32> to vector<2x1024xbf16>
    %c0_14 = arith.constant 0 : index
    %c0_15 = arith.constant 0 : index
    %32 = vector.load %arg4[%c0_14, %c0_15] : memref<1024x512xbf16, #tpu.memory_space<vmem>>, vector<1024x512xbf16>
    %cst_16 = arith.constant dense<0.000000e+00> : vector<2x512xf32>
    %33 = tpu.matmul %31, %32, %cst_16 {dimension_numbers = #tpu.dot_dimension_numbers<[1], [0], [0], [1], [0, 0, 1, 1], [], []>} : vector<2x1024xbf16>, vector<1024x512xbf16>, vector<2x512xf32> -> vector<2x512xf32>
    %c0_17 = arith.constant 0 : index
    %c0_18 = arith.constant 0 : index
    %34 = vector.load %arg5[%c0_17, %c0_18] : memref<1x512xf32, #tpu.memory_space<vmem>>, vector<1x512xf32>
    %c0_19 = arith.constant 0 : index
    %c0_20 = arith.constant 0 : index
    %35 = vector.load %arg6[%c0_19, %c0_20] : memref<1x512xf32, #tpu.memory_space<vmem>>, vector<1x512xf32>
    %cst_21 = arith.constant dense<0.000000e+00> : vector<512xf32>
    %36 = vector.multi_reduction <add>, %33, %cst_21 [0] : vector<2x512xf32> to vector<512xf32>
    %37 = vector.shape_cast %36 : vector<512xf32> to vector<1x512xf32>
    %cst_22 = arith.constant 5.000000e-01 : f32
    %38 = vector.broadcast %cst_22 : f32 to vector<1x512xf32>
    %39 = arith.mulf %37, %38 : vector<1x512xf32>
    %40 = arith.mulf %33, %33 : vector<2x512xf32>
    %cst_23 = arith.constant dense<0.000000e+00> : vector<512xf32>
    %41 = vector.multi_reduction <add>, %40, %cst_23 [0] : vector<2x512xf32> to vector<512xf32>
    %42 = vector.shape_cast %41 : vector<512xf32> to vector<1x512xf32>
    %cst_24 = arith.constant 5.000000e-01 : f32
    %43 = vector.broadcast %cst_24 : f32 to vector<1x512xf32>
    %44 = arith.mulf %42, %43 : vector<1x512xf32>
    %45 = arith.mulf %39, %39 : vector<1x512xf32>
    %46 = arith.subf %44, %45 : vector<1x512xf32>
    %cst_25 = arith.constant 0.000000e+00 : f32
    %47 = vector.broadcast %cst_25 : f32 to vector<1x512xf32>
    %48 = arith.maximumf %46, %47 : vector<1x512xf32>
    %49 = vector.broadcast %39 : vector<1x512xf32> to vector<2x512xf32>
    %50 = arith.subf %33, %49 : vector<2x512xf32>
    %cst_26 = arith.constant 9.99999974E-6 : f32
    %51 = vector.broadcast %cst_26 : f32 to vector<1x512xf32>
    %52 = arith.addf %48, %51 : vector<1x512xf32>
    %53 = math.rsqrt %52 : vector<1x512xf32>
    %54 = vector.broadcast %53 : vector<1x512xf32> to vector<2x512xf32>
    %55 = arith.mulf %50, %54 : vector<2x512xf32>
    %56 = vector.broadcast %34 : vector<1x512xf32> to vector<2x512xf32>
    %57 = arith.mulf %55, %56 : vector<2x512xf32>
    %58 = vector.broadcast %35 : vector<1x512xf32> to vector<2x512xf32>
    %59 = arith.addf %57, %58 : vector<2x512xf32>
    %cst_27 = arith.constant 0.000000e+00 : f32
    %60 = vector.broadcast %cst_27 : f32 to vector<2x512xf32>
    %61 = arith.maximumf %59, %60 : vector<2x512xf32>
    %62 = arith.truncf %61 : vector<2x512xf32> to vector<2x512xbf16>
    %c0_28 = arith.constant 0 : index
    %c0_29 = arith.constant 0 : index
    %63 = vector.load %arg7[%c0_28, %c0_29] : memref<2x512xbf16, #tpu.memory_space<vmem>>, vector<2x512xbf16>
    tpu.vector_store %arg7[%c0_28, %c0_29], %62 {strides = array<i32>} : memref<2x512xbf16, #tpu.memory_space<vmem>>, vector<2x512xbf16>,
    return
  }
}

module attributes {stable_mosaic.version = 11 : i64} {
  func.func @_deconv_bn_relu_kernel(%arg0: i32, %arg1: i32, %arg2: memref<1x10x10x8xbf16, #tpu.memory_space<vmem>>, %arg3: memref<9x8x16xbf16, #tpu.memory_space<vmem>>, %arg4: memref<1x4xf32, #tpu.memory_space<vmem>>, %arg5: memref<1x4xf32, #tpu.memory_space<vmem>>, %arg6: memref<1x8x8x16xbf16, #tpu.memory_space<vmem>>, %arg7: memref<2x8x8x16xf32, #tpu.memory_space<vmem>>, %arg8: memref<1x16xf32, #tpu.memory_space<vmem>>, %arg9: memref<1x16xf32, #tpu.memory_space<vmem>>) attributes {dimension_semantics = [#tpu.dimension_semantics<arbitrary>, #tpu.dimension_semantics<arbitrary>], iteration_bounds = array<i64: 2, 2>, scalar_prefetch = 0 : i64, scratch_operands = 3 : i64, tpu.core_type = #tpu.core_type<tc>, window_params = [{transform_indices = @transform_0, window_bounds = array<i64: 1, 10, 10, 8>}, {pipeline_mode = #tpu.pipeline_mode<synchronous>, transform_indices = @transform_1, window_bounds = array<i64: 9, 8, 16>}, {pipeline_mode = #tpu.pipeline_mode<synchronous>, transform_indices = @transform_2, window_bounds = array<i64: 1, 4>}, {pipeline_mode = #tpu.pipeline_mode<synchronous>, transform_indices = @transform_3, window_bounds = array<i64: 1, 4>}, {transform_indices = @transform_4, window_bounds = array<i64: 1, 8, 8, 16>}]} {
    %c0_i32 = arith.constant 0 : i32
    %0 = arith.cmpi eq, %arg0, %c0_i32 : i32
    %c0_i32_0 = arith.constant 0 : i32
    %1 = arith.cmpi eq, %arg1, %c0_i32_0 : i32
    %2 = arith.andi %0, %1 : i1
    %3 = arith.extui %2 : i1 to i32
    %c0_i32_1 = arith.constant 0 : i32
    %4 = arith.cmpi ne, %3, %c0_i32_1 : i32
    scf.if %4 {
      %cst = arith.constant 0.000000e+00 : f32
      %11 = vector.broadcast %cst : f32 to vector<1x16xf32>
      %c0 = arith.constant 0 : index
      %c0_5 = arith.constant 0 : index
      %12 = vector.load %arg8[%c0, %c0_5] : memref<1x16xf32, #tpu.memory_space<vmem>>, vector<1x16xf32>
      tpu.vector_store %arg8[%c0, %c0_5], %11 {strides = array<i32>} : memref<1x16xf32, #tpu.memory_space<vmem>>, vector<1x16xf32>,
      %cst_6 = arith.constant 0.000000e+00 : f32
      %13 = vector.broadcast %cst_6 : f32 to vector<1x16xf32>
      %c0_7 = arith.constant 0 : index
      %c0_8 = arith.constant 0 : index
      %14 = vector.load %arg9[%c0_7, %c0_8] : memref<1x16xf32, #tpu.memory_space<vmem>>, vector<1x16xf32>
      tpu.vector_store %arg9[%c0_7, %c0_8], %13 {strides = array<i32>} : memref<1x16xf32, #tpu.memory_space<vmem>>, vector<1x16xf32>,
    } else {
    }
    %c0_i32_2 = arith.constant 0 : i32
    %5 = arith.cmpi eq, %arg0, %c0_i32_2 : i32
    %6 = arith.extui %5 : i1 to i32
    %c0_i32_3 = arith.constant 0 : i32
    %7 = arith.cmpi ne, %6, %c0_i32_3 : i32
    scf.if %7 {
      %c0_i32_5 = arith.constant 0 : i32
      %c8_i32 = arith.constant 8 : i32
      %11 = arith.addi %c0_i32_5, %c8_i32 : i32
      %c1_i32_6 = arith.constant 1 : i32
      scf.for %arg10 = %c0_i32_5 to %11 step %c1_i32_6  : i32 {
        %c0_i32_8 = arith.constant 0 : i32
        %12 = arith.addi %arg10, %c0_i32_8 : i32
        %c0 = arith.constant 0 : index
        %13 = arith.index_cast %12 : i32 to index
        %c0_9 = arith.constant 0 : index
        %c0_10 = arith.constant 0 : index
        %14 = vector.load %arg2[%c0, %13, %c0_9, %c0_10] : memref<1x10x10x8xbf16, #tpu.memory_space<vmem>>, vector<1x1x8x8xbf16>
        %15 = vector.shape_cast %14 : vector<1x1x8x8xbf16> to vector<8x8xbf16>
        %c0_11 = arith.constant 0 : index
        %c0_12 = arith.constant 0 : index
        %c0_13 = arith.constant 0 : index
        %16 = vector.load %arg3[%c0_11, %c0_12, %c0_13] : memref<9x8x16xbf16, #tpu.memory_space<vmem>>, vector<1x8x16xbf16>
        %17 = vector.shape_cast %16 : vector<1x8x16xbf16> to vector<8x16xbf16>
        %cst = arith.constant dense<0.000000e+00> : vector<8x16xf32>
        %18 = tpu.matmul %15, %17, %cst {dimension_numbers = #tpu.dot_dimension_numbers<[1], [0], [0], [1], [0, 0, 1, 1], [], []>} : vector<8x8xbf16>, vector<8x16xbf16>, vector<8x16xf32> -> vector<8x16xf32>
        %c0_i32_14 = arith.constant 0 : i32
        %19 = arith.addi %arg10, %c0_i32_14 : i32
        %c0_15 = arith.constant 0 : index
        %20 = arith.index_cast %19 : i32 to index
        %c1 = arith.constant 1 : index
        %c0_16 = arith.constant 0 : index
        %21 = vector.load %arg2[%c0_15, %20, %c1, %c0_16] : memref<1x10x10x8xbf16, #tpu.memory_space<vmem>>, vector<1x1x8x8xbf16>
        %22 = vector.shape_cast %21 : vector<1x1x8x8xbf16> to vector<8x8xbf16>
        %c1_17 = arith.constant 1 : index
        %c0_18 = arith.constant 0 : index
        %c0_19 = arith.constant 0 : index
        %23 = vector.load %arg3[%c1_17, %c0_18, %c0_19] : memref<9x8x16xbf16, #tpu.memory_space<vmem>>, vector<1x8x16xbf16>
        %24 = vector.shape_cast %23 : vector<1x8x16xbf16> to vector<8x16xbf16>
        %cst_20 = arith.constant dense<0.000000e+00> : vector<8x16xf32>
        %25 = tpu.matmul %22, %24, %cst_20 {dimension_numbers = #tpu.dot_dimension_numbers<[1], [0], [0], [1], [0, 0, 1, 1], [], []>} : vector<8x8xbf16>, vector<8x16xbf16>, vector<8x16xf32> -> vector<8x16xf32>
        %26 = arith.addf %18, %25 : vector<8x16xf32>
        %c0_i32_21 = arith.constant 0 : i32
        %27 = arith.addi %arg10, %c0_i32_21 : i32
        %c0_22 = arith.constant 0 : index
        %28 = arith.index_cast %27 : i32 to index
        %c2 = arith.constant 2 : index
        %c0_23 = arith.constant 0 : index
        %29 = vector.load %arg2[%c0_22, %28, %c2, %c0_23] : memref<1x10x10x8xbf16, #tpu.memory_space<vmem>>, vector<1x1x8x8xbf16>
        %30 = vector.shape_cast %29 : vector<1x1x8x8xbf16> to vector<8x8xbf16>
        %c2_24 = arith.constant 2 : index
        %c0_25 = arith.constant 0 : index
        %c0_26 = arith.constant 0 : index
        %31 = vector.load %arg3[%c2_24, %c0_25, %c0_26] : memref<9x8x16xbf16, #tpu.memory_space<vmem>>, vector<1x8x16xbf16>
        %32 = vector.shape_cast %31 : vector<1x8x16xbf16> to vector<8x16xbf16>
        %cst_27 = arith.constant dense<0.000000e+00> : vector<8x16xf32>
        %33 = tpu.matmul %30, %32, %cst_27 {dimension_numbers = #tpu.dot_dimension_numbers<[1], [0], [0], [1], [0, 0, 1, 1], [], []>} : vector<8x8xbf16>, vector<8x16xbf16>, vector<8x16xf32> -> vector<8x16xf32>
        %34 = arith.addf %26, %33 : vector<8x16xf32>
        %c1_i32_28 = arith.constant 1 : i32
        %35 = arith.addi %arg10, %c1_i32_28 : i32
        %c0_29 = arith.constant 0 : index
        %36 = arith.index_cast %35 : i32 to index
        %c0_30 = arith.constant 0 : index
        %c0_31 = arith.constant 0 : index
        %37 = vector.load %arg2[%c0_29, %36, %c0_30, %c0_31] : memref<1x10x10x8xbf16, #tpu.memory_space<vmem>>, vector<1x1x8x8xbf16>
        %38 = vector.shape_cast %37 : vector<1x1x8x8xbf16> to vector<8x8xbf16>
        %c3 = arith.constant 3 : index
        %c0_32 = arith.constant 0 : index
        %c0_33 = arith.constant 0 : index
        %39 = vector.load %arg3[%c3, %c0_32, %c0_33] : memref<9x8x16xbf16, #tpu.memory_space<vmem>>, vector<1x8x16xbf16>
        %40 = vector.shape_cast %39 : vector<1x8x16xbf16> to vector<8x16xbf16>
        %cst_34 = arith.constant dense<0.000000e+00> : vector<8x16xf32>
        %41 = tpu.matmul %38, %40, %cst_34 {dimension_numbers = #tpu.dot_dimension_numbers<[1], [0], [0], [1], [0, 0, 1, 1], [], []>} : vector<8x8xbf16>, vector<8x16xbf16>, vector<8x16xf32> -> vector<8x16xf32>
        %42 = arith.addf %34, %41 : vector<8x16xf32>
        %c1_i32_35 = arith.constant 1 : i32
        %43 = arith.addi %arg10, %c1_i32_35 : i32
        %c0_36 = arith.constant 0 : index
        %44 = arith.index_cast %43 : i32 to index
        %c1_37 = arith.constant 1 : index
        %c0_38 = arith.constant 0 : index
        %45 = vector.load %arg2[%c0_36, %44, %c1_37, %c0_38] : memref<1x10x10x8xbf16, #tpu.memory_space<vmem>>, vector<1x1x8x8xbf16>
        %46 = vector.shape_cast %45 : vector<1x1x8x8xbf16> to vector<8x8xbf16>
        %c4 = arith.constant 4 : index
        %c0_39 = arith.constant 0 : index
        %c0_40 = arith.constant 0 : index
        %47 = vector.load %arg3[%c4, %c0_39, %c0_40] : memref<9x8x16xbf16, #tpu.memory_space<vmem>>, vector<1x8x16xbf16>
        %48 = vector.shape_cast %47 : vector<1x8x16xbf16> to vector<8x16xbf16>
        %cst_41 = arith.constant dense<0.000000e+00> : vector<8x16xf32>
        %49 = tpu.matmul %46, %48, %cst_41 {dimension_numbers = #tpu.dot_dimension_numbers<[1], [0], [0], [1], [0, 0, 1, 1], [], []>} : vector<8x8xbf16>, vector<8x16xbf16>, vector<8x16xf32> -> vector<8x16xf32>
        %50 = arith.addf %42, %49 : vector<8x16xf32>
        %c1_i32_42 = arith.constant 1 : i32
        %51 = arith.addi %arg10, %c1_i32_42 : i32
        %c0_43 = arith.constant 0 : index
        %52 = arith.index_cast %51 : i32 to index
        %c2_44 = arith.constant 2 : index
        %c0_45 = arith.constant 0 : index
        %53 = vector.load %arg2[%c0_43, %52, %c2_44, %c0_45] : memref<1x10x10x8xbf16, #tpu.memory_space<vmem>>, vector<1x1x8x8xbf16>
        %54 = vector.shape_cast %53 : vector<1x1x8x8xbf16> to vector<8x8xbf16>
        %c5 = arith.constant 5 : index
        %c0_46 = arith.constant 0 : index
        %c0_47 = arith.constant 0 : index
        %55 = vector.load %arg3[%c5, %c0_46, %c0_47] : memref<9x8x16xbf16, #tpu.memory_space<vmem>>, vector<1x8x16xbf16>
        %56 = vector.shape_cast %55 : vector<1x8x16xbf16> to vector<8x16xbf16>
        %cst_48 = arith.constant dense<0.000000e+00> : vector<8x16xf32>
        %57 = tpu.matmul %54, %56, %cst_48 {dimension_numbers = #tpu.dot_dimension_numbers<[1], [0], [0], [1], [0, 0, 1, 1], [], []>} : vector<8x8xbf16>, vector<8x16xbf16>, vector<8x16xf32> -> vector<8x16xf32>
        %58 = arith.addf %50, %57 : vector<8x16xf32>
        %c2_i32 = arith.constant 2 : i32
        %59 = arith.addi %arg10, %c2_i32 : i32
        %c0_49 = arith.constant 0 : index
        %60 = arith.index_cast %59 : i32 to index
        %c0_50 = arith.constant 0 : index
        %c0_51 = arith.constant 0 : index
        %61 = vector.load %arg2[%c0_49, %60, %c0_50, %c0_51] : memref<1x10x10x8xbf16, #tpu.memory_space<vmem>>, vector<1x1x8x8xbf16>
        %62 = vector.shape_cast %61 : vector<1x1x8x8xbf16> to vector<8x8xbf16>
        %c6 = arith.constant 6 : index
        %c0_52 = arith.constant 0 : index
        %c0_53 = arith.constant 0 : index
        %63 = vector.load %arg3[%c6, %c0_52, %c0_53] : memref<9x8x16xbf16, #tpu.memory_space<vmem>>, vector<1x8x16xbf16>
        %64 = vector.shape_cast %63 : vector<1x8x16xbf16> to vector<8x16xbf16>
        %cst_54 = arith.constant dense<0.000000e+00> : vector<8x16xf32>
        %65 = tpu.matmul %62, %64, %cst_54 {dimension_numbers = #tpu.dot_dimension_numbers<[1], [0], [0], [1], [0, 0, 1, 1], [], []>} : vector<8x8xbf16>, vector<8x16xbf16>, vector<8x16xf32> -> vector<8x16xf32>
        %66 = arith.addf %58, %65 : vector<8x16xf32>
        %c2_i32_55 = arith.constant 2 : i32
        %67 = arith.addi %arg10, %c2_i32_55 : i32
        %c0_56 = arith.constant 0 : index
        %68 = arith.index_cast %67 : i32 to index
        %c1_57 = arith.constant 1 : index
        %c0_58 = arith.constant 0 : index
        %69 = vector.load %arg2[%c0_56, %68, %c1_57, %c0_58] : memref<1x10x10x8xbf16, #tpu.memory_space<vmem>>, vector<1x1x8x8xbf16>
        %70 = vector.shape_cast %69 : vector<1x1x8x8xbf16> to vector<8x8xbf16>
        %c7 = arith.constant 7 : index
        %c0_59 = arith.constant 0 : index
        %c0_60 = arith.constant 0 : index
        %71 = vector.load %arg3[%c7, %c0_59, %c0_60] : memref<9x8x16xbf16, #tpu.memory_space<vmem>>, vector<1x8x16xbf16>
        %72 = vector.shape_cast %71 : vector<1x8x16xbf16> to vector<8x16xbf16>
        %cst_61 = arith.constant dense<0.000000e+00> : vector<8x16xf32>
        %73 = tpu.matmul %70, %72, %cst_61 {dimension_numbers = #tpu.dot_dimension_numbers<[1], [0], [0], [1], [0, 0, 1, 1], [], []>} : vector<8x8xbf16>, vector<8x16xbf16>, vector<8x16xf32> -> vector<8x16xf32>
        %74 = arith.addf %66, %73 : vector<8x16xf32>
        %c2_i32_62 = arith.constant 2 : i32
        %75 = arith.addi %arg10, %c2_i32_62 : i32
        %c0_63 = arith.constant 0 : index
        %76 = arith.index_cast %75 : i32 to index
        %c2_64 = arith.constant 2 : index
        %c0_65 = arith.constant 0 : index
        %77 = vector.load %arg2[%c0_63, %76, %c2_64, %c0_65] : memref<1x10x10x8xbf16, #tpu.memory_space<vmem>>, vector<1x1x8x8xbf16>
        %78 = vector.shape_cast %77 : vector<1x1x8x8xbf16> to vector<8x8xbf16>
        %c8 = arith.constant 8 : index
        %c0_66 = arith.constant 0 : index
        %c0_67 = arith.constant 0 : index
        %79 = vector.load %arg3[%c8, %c0_66, %c0_67] : memref<9x8x16xbf16, #tpu.memory_space<vmem>>, vector<1x8x16xbf16>
        %80 = vector.shape_cast %79 : vector<1x8x16xbf16> to vector<8x16xbf16>
        %cst_68 = arith.constant dense<0.000000e+00> : vector<8x16xf32>
        %81 = tpu.matmul %78, %80, %cst_68 {dimension_numbers = #tpu.dot_dimension_numbers<[1], [0], [0], [1], [0, 0, 1, 1], [], []>} : vector<8x8xbf16>, vector<8x16xbf16>, vector<8x16xf32> -> vector<8x16xf32>
        %82 = arith.addf %74, %81 : vector<8x16xf32>
        %83 = arith.index_cast %arg1 : i32 to index
        %84 = arith.index_cast %arg10 : i32 to index
        %c0_69 = arith.constant 0 : index
        %c0_70 = arith.constant 0 : index
        %85 = vector.load %arg7[%83, %84, %c0_69, %c0_70] : memref<2x8x8x16xf32, #tpu.memory_space<vmem>>, vector<1x1x8x16xf32>
        %86 = vector.shape_cast %85 : vector<1x1x8x16xf32> to vector<8x16xf32>
        %87 = vector.shape_cast %82 : vector<8x16xf32> to vector<1x1x8x16xf32>
        tpu.vector_store %arg7[%83, %84, %c0_69, %c0_70], %87 {strides = array<i32>} : memref<2x8x8x16xf32, #tpu.memory_space<vmem>>, vector<1x1x8x16xf32>,
        %c0_71 = arith.constant 0 : index
        %c0_72 = arith.constant 0 : index
        %88 = vector.load %arg8[%c0_71, %c0_72] : memref<1x16xf32, #tpu.memory_space<vmem>>, vector<1x16xf32>
        %cst_73 = arith.constant dense<0.000000e+00> : vector<16xf32>
        %89 = vector.multi_reduction <add>, %82, %cst_73 [0] : vector<8x16xf32> to vector<16xf32>
        %90 = vector.shape_cast %89 : vector<16xf32> to vector<1x16xf32>
        %91 = arith.addf %88, %90 : vector<1x16xf32>
        %c0_74 = arith.constant 0 : index
        %c0_75 = arith.constant 0 : index
        %92 = vector.load %arg8[%c0_74, %c0_75] : memref<1x16xf32, #tpu.memory_space<vmem>>, vector<1x16xf32>
        tpu.vector_store %arg8[%c0_74, %c0_75], %91 {strides = array<i32>} : memref<1x16xf32, #tpu.memory_space<vmem>>, vector<1x16xf32>,
        %c0_76 = arith.constant 0 : index
        %c0_77 = arith.constant 0 : index
        %93 = vector.load %arg9[%c0_76, %c0_77] : memref<1x16xf32, #tpu.memory_space<vmem>>, vector<1x16xf32>
        %94 = arith.mulf %82, %82 : vector<8x16xf32>
        %cst_78 = arith.constant dense<0.000000e+00> : vector<16xf32>
        %95 = vector.multi_reduction <add>, %94, %cst_78 [0] : vector<8x16xf32> to vector<16xf32>
        %96 = vector.shape_cast %95 : vector<16xf32> to vector<1x16xf32>
        %97 = arith.addf %93, %96 : vector<1x16xf32>
        %c0_79 = arith.constant 0 : index
        %c0_80 = arith.constant 0 : index
        %98 = vector.load %arg9[%c0_79, %c0_80] : memref<1x16xf32, #tpu.memory_space<vmem>>, vector<1x16xf32>
        tpu.vector_store %arg9[%c0_79, %c0_80], %97 {strides = array<i32>} : memref<1x16xf32, #tpu.memory_space<vmem>>, vector<1x16xf32>,
      }
      %c8_i32_7 = arith.constant 8 : i32
    } else {
    }
    %c1_i32 = arith.constant 1 : i32
    %8 = arith.cmpi eq, %arg0, %c1_i32 : i32
    %9 = arith.extui %8 : i1 to i32
    %c0_i32_4 = arith.constant 0 : i32
    %10 = arith.cmpi ne, %9, %c0_i32_4 : i32
    scf.if %10 {
      %c0_i32_5 = arith.constant 0 : i32
      %11 = arith.cmpi eq, %arg1, %c0_i32_5 : i32
      %12 = arith.extui %11 : i1 to i32
      %c0_i32_6 = arith.constant 0 : i32
      %13 = arith.cmpi ne, %12, %c0_i32_6 : i32
      scf.if %13 {
        %c0_17 = arith.constant 0 : index
        %c0_18 = arith.constant 0 : index
        %31 = vector.load %arg8[%c0_17, %c0_18] : memref<1x16xf32, #tpu.memory_space<vmem>>, vector<1x16xf32>
        %c0_19 = arith.constant 0 : index
        %c0_20 = arith.constant 0 : index
        %32 = vector.load %arg9[%c0_19, %c0_20] : memref<1x16xf32, #tpu.memory_space<vmem>>, vector<1x16xf32>
        %33 = vector.extract_strided_slice %31 {offsets = [0, 0], sizes = [1, 4], strides = [1, 1]} : vector<1x16xf32> to vector<1x4xf32>
        %34 = vector.extract_strided_slice %31 {offsets = [0, 4], sizes = [1, 4], strides = [1, 1]} : vector<1x16xf32> to vector<1x4xf32>
        %35 = arith.addf %33, %34 : vector<1x4xf32>
        %36 = vector.extract_strided_slice %31 {offsets = [0, 8], sizes = [1, 4], strides = [1, 1]} : vector<1x16xf32> to vector<1x4xf32>
        %37 = arith.addf %35, %36 : vector<1x4xf32>
        %38 = vector.extract_strided_slice %31 {offsets = [0, 12], sizes = [1, 4], strides = [1, 1]} : vector<1x16xf32> to vector<1x4xf32>
        %39 = arith.addf %37, %38 : vector<1x4xf32>
        %40 = vector.extract_strided_slice %32 {offsets = [0, 0], sizes = [1, 4], strides = [1, 1]} : vector<1x16xf32> to vector<1x4xf32>
        %41 = vector.extract_strided_slice %32 {offsets = [0, 4], sizes = [1, 4], strides = [1, 1]} : vector<1x16xf32> to vector<1x4xf32>
        %42 = arith.addf %40, %41 : vector<1x4xf32>
        %43 = vector.extract_strided_slice %32 {offsets = [0, 8], sizes = [1, 4], strides = [1, 1]} : vector<1x16xf32> to vector<1x4xf32>
        %44 = arith.addf %42, %43 : vector<1x4xf32>
        %45 = vector.extract_strided_slice %32 {offsets = [0, 12], sizes = [1, 4], strides = [1, 1]} : vector<1x16xf32> to vector<1x4xf32>
        %46 = arith.addf %44, %45 : vector<1x4xf32>
        %cst_21 = arith.constant 0.001953125 : f32
        %47 = vector.broadcast %cst_21 : f32 to vector<1x4xf32>
        %48 = arith.mulf %39, %47 : vector<1x4xf32>
        %cst_22 = arith.constant 0.001953125 : f32
        %49 = vector.broadcast %cst_22 : f32 to vector<1x4xf32>
        %50 = arith.mulf %46, %49 : vector<1x4xf32>
        %51 = arith.mulf %48, %48 : vector<1x4xf32>
        %52 = arith.subf %50, %51 : vector<1x4xf32>
        %cst_23 = arith.constant 0.000000e+00 : f32
        %53 = vector.broadcast %cst_23 : f32 to vector<1x4xf32>
        %54 = arith.maximumf %52, %53 : vector<1x4xf32>
        %cst_24 = arith.constant 9.99999974E-6 : f32
        %55 = vector.broadcast %cst_24 : f32 to vector<1x4xf32>
        %56 = arith.addf %54, %55 : vector<1x4xf32>
        %57 = math.rsqrt %56 : vector<1x4xf32>
        %c0_25 = arith.constant 0 : index
        %c0_26 = arith.constant 0 : index
        %58 = vector.load %arg4[%c0_25, %c0_26] : memref<1x4xf32, #tpu.memory_space<vmem>>, vector<1x4xf32>
        %59 = arith.mulf %58, %57 : vector<1x4xf32>
        %c0_27 = arith.constant 0 : index
        %c0_28 = arith.constant 0 : index
        %60 = vector.load %arg5[%c0_27, %c0_28] : memref<1x4xf32, #tpu.memory_space<vmem>>, vector<1x4xf32>
        %61 = arith.mulf %48, %59 : vector<1x4xf32>
        %62 = arith.subf %60, %61 : vector<1x4xf32>
        %c0_29 = arith.constant 0 : index
        %c0_30 = arith.constant 0 : index
        %63 = vector.load %arg8[%c0_29, %c0_30] : memref<1x16xf32, #tpu.memory_space<vmem>>, vector<1x4xf32>
        tpu.vector_store %arg8[%c0_29, %c0_30], %59 {strides = array<i32>} : memref<1x16xf32, #tpu.memory_space<vmem>>, vector<1x4xf32>,
        %c0_31 = arith.constant 0 : index
        %c0_32 = arith.constant 0 : index
        %64 = vector.load %arg9[%c0_31, %c0_32] : memref<1x16xf32, #tpu.memory_space<vmem>>, vector<1x4xf32>
        tpu.vector_store %arg9[%c0_31, %c0_32], %62 {strides = array<i32>} : memref<1x16xf32, #tpu.memory_space<vmem>>, vector<1x4xf32>,
        %c0_33 = arith.constant 0 : index
        %c4 = arith.constant 4 : index
        %65 = vector.load %arg8[%c0_33, %c4] : memref<1x16xf32, #tpu.memory_space<vmem>>, vector<1x4xf32>
        tpu.vector_store %arg8[%c0_33, %c4], %59 {strides = array<i32>} : memref<1x16xf32, #tpu.memory_space<vmem>>, vector<1x4xf32>,
        %c0_34 = arith.constant 0 : index
        %c4_35 = arith.constant 4 : index
        %66 = vector.load %arg9[%c0_34, %c4_35] : memref<1x16xf32, #tpu.memory_space<vmem>>, vector<1x4xf32>
        tpu.vector_store %arg9[%c0_34, %c4_35], %62 {strides = array<i32>} : memref<1x16xf32, #tpu.memory_space<vmem>>, vector<1x4xf32>,
        %c0_36 = arith.constant 0 : index
        %c8 = arith.constant 8 : index
        %67 = vector.load %arg8[%c0_36, %c8] : memref<1x16xf32, #tpu.memory_space<vmem>>, vector<1x4xf32>
        tpu.vector_store %arg8[%c0_36, %c8], %59 {strides = array<i32>} : memref<1x16xf32, #tpu.memory_space<vmem>>, vector<1x4xf32>,
        %c0_37 = arith.constant 0 : index
        %c8_38 = arith.constant 8 : index
        %68 = vector.load %arg9[%c0_37, %c8_38] : memref<1x16xf32, #tpu.memory_space<vmem>>, vector<1x4xf32>
        tpu.vector_store %arg9[%c0_37, %c8_38], %62 {strides = array<i32>} : memref<1x16xf32, #tpu.memory_space<vmem>>, vector<1x4xf32>,
        %c0_39 = arith.constant 0 : index
        %c12 = arith.constant 12 : index
        %69 = vector.load %arg8[%c0_39, %c12] : memref<1x16xf32, #tpu.memory_space<vmem>>, vector<1x4xf32>
        tpu.vector_store %arg8[%c0_39, %c12], %59 {strides = array<i32>} : memref<1x16xf32, #tpu.memory_space<vmem>>, vector<1x4xf32>,
        %c0_40 = arith.constant 0 : index
        %c12_41 = arith.constant 12 : index
        %70 = vector.load %arg9[%c0_40, %c12_41] : memref<1x16xf32, #tpu.memory_space<vmem>>, vector<1x4xf32>
        tpu.vector_store %arg9[%c0_40, %c12_41], %62 {strides = array<i32>} : memref<1x16xf32, #tpu.memory_space<vmem>>, vector<1x4xf32>,
      } else {
      }
      %c0 = arith.constant 0 : index
      %c0_7 = arith.constant 0 : index
      %14 = vector.load %arg8[%c0, %c0_7] : memref<1x16xf32, #tpu.memory_space<vmem>>, vector<1x16xf32>
      %15 = vector.shape_cast %14 : vector<1x16xf32> to vector<1x1x16xf32>
      %c0_8 = arith.constant 0 : index
      %c0_9 = arith.constant 0 : index
      %16 = vector.load %arg9[%c0_8, %c0_9] : memref<1x16xf32, #tpu.memory_space<vmem>>, vector<1x16xf32>
      %17 = vector.shape_cast %16 : vector<1x16xf32> to vector<1x1x16xf32>
      %18 = arith.index_cast %arg1 : i32 to index
      %c0_10 = arith.constant 0 : index
      %c0_11 = arith.constant 0 : index
      %c0_12 = arith.constant 0 : index
      %19 = vector.load %arg7[%18, %c0_10, %c0_11, %c0_12] : memref<2x8x8x16xf32, #tpu.memory_space<vmem>>, vector<1x8x8x16xf32>
      %20 = vector.shape_cast %19 : vector<1x8x8x16xf32> to vector<8x8x16xf32>
      %21 = vector.broadcast %15 : vector<1x1x16xf32> to vector<8x8x16xf32>
      %22 = arith.mulf %20, %21 : vector<8x8x16xf32>
      %23 = vector.broadcast %17 : vector<1x1x16xf32> to vector<8x8x16xf32>
      %24 = arith.addf %22, %23 : vector<8x8x16xf32>
      %cst = arith.constant 0.000000e+00 : f32
      %25 = vector.broadcast %cst : f32 to vector<8x8x16xf32>
      %26 = arith.maximumf %24, %25 : vector<8x8x16xf32>
      %27 = arith.truncf %26 : vector<8x8x16xf32> to vector<8x8x16xbf16>
      %c0_13 = arith.constant 0 : index
      %c0_14 = arith.constant 0 : index
      %c0_15 = arith.constant 0 : index
      %c0_16 = arith.constant 0 : index
      %28 = vector.load %arg6[%c0_13, %c0_14, %c0_15, %c0_16] : memref<1x8x8x16xbf16, #tpu.memory_space<vmem>>, vector<1x8x8x16xbf16>
      %29 = vector.shape_cast %28 : vector<1x8x8x16xbf16> to vector<8x8x16xbf16>
      %30 = vector.shape_cast %27 : vector<8x8x16xbf16> to vector<1x8x8x16xbf16>
      tpu.vector_store %arg6[%c0_13, %c0_14, %c0_15, %c0_16], %30 {strides = array<i32>} : memref<1x8x8x16xbf16, #tpu.memory_space<vmem>>, vector<1x8x8x16xbf16>,
    } else {
    }
    return
  }
  func.func @transform_0(%arg0: i32, %arg1: i32) -> (i32, i32, i32, i32) {
    %c1_i32 = arith.constant 1 : i32
    %0 = arith.subi %c1_i32, %arg0 : i32
    %1 = arith.muli %arg1, %0 : i32
    %c1_i32_0 = arith.constant 1 : i32
    %2 = arith.muli %c1_i32_0, %arg0 : i32
    %3 = arith.addi %1, %2 : i32
    %c0_i32 = arith.constant 0 : i32
    %c0_i32_1 = arith.constant 0 : i32
    %c0_i32_2 = arith.constant 0 : i32
    %c0_i32_3 = arith.constant 0 : i32
    return %3, %c0_i32, %c0_i32_1, %c0_i32_2 : i32, i32, i32, i32
  }
  func.func @transform_1(%arg0: i32, %arg1: i32) -> (i32, i32, i32) {
    %c0_i32 = arith.constant 0 : i32
    %c0_i32_0 = arith.constant 0 : i32
    %c0_i32_1 = arith.constant 0 : i32
    %c0_i32_2 = arith.constant 0 : i32
    return %c0_i32, %c0_i32_0, %c0_i32_1 : i32, i32, i32
  }
  func.func @transform_2(%arg0: i32, %arg1: i32) -> (i32, i32) {
    %c0_i32 = arith.constant 0 : i32
    %c0_i32_0 = arith.constant 0 : i32
    %c0_i32_1 = arith.constant 0 : i32
    return %c0_i32, %c0_i32_0 : i32, i32
  }
  func.func @transform_3(%arg0: i32, %arg1: i32) -> (i32, i32) {
    %c0_i32 = arith.constant 0 : i32
    %c0_i32_0 = arith.constant 0 : i32
    %c0_i32_1 = arith.constant 0 : i32
    return %c0_i32, %c0_i32_0 : i32, i32
  }
  func.func @transform_4(%arg0: i32, %arg1: i32) -> (i32, i32, i32, i32) {
    %0 = arith.muli %arg1, %arg0 : i32
    %c0_i32 = arith.constant 0 : i32
    %c0_i32_0 = arith.constant 0 : i32
    %c0_i32_1 = arith.constant 0 : i32
    %c0_i32_2 = arith.constant 0 : i32
    return %0, %c0_i32, %c0_i32_0, %c0_i32_1 : i32, i32, i32, i32
  }
}

module attributes {stable_mosaic.version = 11 : i64} {
  func.func @_deconv_tanh_kernel(%arg0: i32, %arg1: memref<1x18x18x4xbf16, #tpu.memory_space<vmem>>, %arg2: memref<9x4x12xbf16, #tpu.memory_space<vmem>>, %arg3: memref<1x16x16x12xbf16, #tpu.memory_space<vmem>>) attributes {dimension_semantics = [#tpu.dimension_semantics<parallel>], iteration_bounds = array<i64: 2>, scalar_prefetch = 0 : i64, scratch_operands = 0 : i64, tpu.core_type = #tpu.core_type<tc>, window_params = [{transform_indices = @transform_0, window_bounds = array<i64: 1, 18, 18, 4>}, {pipeline_mode = #tpu.pipeline_mode<synchronous>, transform_indices = @transform_1, window_bounds = array<i64: 9, 4, 12>}, {transform_indices = @transform_2, window_bounds = array<i64: 1, 16, 16, 12>}]} {
    %c0_i32 = arith.constant 0 : i32
    %c16_i32 = arith.constant 16 : i32
    %0 = arith.addi %c0_i32, %c16_i32 : i32
    %c1_i32 = arith.constant 1 : i32
    scf.for %arg4 = %c0_i32 to %0 step %c1_i32  : i32 {
      %c0_i32_1 = arith.constant 0 : i32
      %1 = arith.addi %arg4, %c0_i32_1 : i32
      %c0 = arith.constant 0 : index
      %2 = arith.index_cast %1 : i32 to index
      %c0_2 = arith.constant 0 : index
      %c0_3 = arith.constant 0 : index
      %3 = vector.load %arg1[%c0, %2, %c0_2, %c0_3] : memref<1x18x18x4xbf16, #tpu.memory_space<vmem>>, vector<1x1x16x4xbf16>
      %4 = vector.shape_cast %3 : vector<1x1x16x4xbf16> to vector<16x4xbf16>
      %c0_4 = arith.constant 0 : index
      %c0_5 = arith.constant 0 : index
      %c0_6 = arith.constant 0 : index
      %5 = vector.load %arg2[%c0_4, %c0_5, %c0_6] : memref<9x4x12xbf16, #tpu.memory_space<vmem>>, vector<1x4x12xbf16>
      %6 = vector.shape_cast %5 : vector<1x4x12xbf16> to vector<4x12xbf16>
      %cst = arith.constant dense<0.000000e+00> : vector<16x12xf32>
      %7 = tpu.matmul %4, %6, %cst {dimension_numbers = #tpu.dot_dimension_numbers<[1], [0], [0], [1], [0, 0, 1, 1], [], []>} : vector<16x4xbf16>, vector<4x12xbf16>, vector<16x12xf32> -> vector<16x12xf32>
      %c0_i32_7 = arith.constant 0 : i32
      %8 = arith.addi %arg4, %c0_i32_7 : i32
      %c0_8 = arith.constant 0 : index
      %9 = arith.index_cast %8 : i32 to index
      %c1 = arith.constant 1 : index
      %c0_9 = arith.constant 0 : index
      %10 = vector.load %arg1[%c0_8, %9, %c1, %c0_9] : memref<1x18x18x4xbf16, #tpu.memory_space<vmem>>, vector<1x1x16x4xbf16>
      %11 = vector.shape_cast %10 : vector<1x1x16x4xbf16> to vector<16x4xbf16>
      %c1_10 = arith.constant 1 : index
      %c0_11 = arith.constant 0 : index
      %c0_12 = arith.constant 0 : index
      %12 = vector.load %arg2[%c1_10, %c0_11, %c0_12] : memref<9x4x12xbf16, #tpu.memory_space<vmem>>, vector<1x4x12xbf16>
      %13 = vector.shape_cast %12 : vector<1x4x12xbf16> to vector<4x12xbf16>
      %cst_13 = arith.constant dense<0.000000e+00> : vector<16x12xf32>
      %14 = tpu.matmul %11, %13, %cst_13 {dimension_numbers = #tpu.dot_dimension_numbers<[1], [0], [0], [1], [0, 0, 1, 1], [], []>} : vector<16x4xbf16>, vector<4x12xbf16>, vector<16x12xf32> -> vector<16x12xf32>
      %15 = arith.addf %7, %14 : vector<16x12xf32>
      %c0_i32_14 = arith.constant 0 : i32
      %16 = arith.addi %arg4, %c0_i32_14 : i32
      %c0_15 = arith.constant 0 : index
      %17 = arith.index_cast %16 : i32 to index
      %c2 = arith.constant 2 : index
      %c0_16 = arith.constant 0 : index
      %18 = vector.load %arg1[%c0_15, %17, %c2, %c0_16] : memref<1x18x18x4xbf16, #tpu.memory_space<vmem>>, vector<1x1x16x4xbf16>
      %19 = vector.shape_cast %18 : vector<1x1x16x4xbf16> to vector<16x4xbf16>
      %c2_17 = arith.constant 2 : index
      %c0_18 = arith.constant 0 : index
      %c0_19 = arith.constant 0 : index
      %20 = vector.load %arg2[%c2_17, %c0_18, %c0_19] : memref<9x4x12xbf16, #tpu.memory_space<vmem>>, vector<1x4x12xbf16>
      %21 = vector.shape_cast %20 : vector<1x4x12xbf16> to vector<4x12xbf16>
      %cst_20 = arith.constant dense<0.000000e+00> : vector<16x12xf32>
      %22 = tpu.matmul %19, %21, %cst_20 {dimension_numbers = #tpu.dot_dimension_numbers<[1], [0], [0], [1], [0, 0, 1, 1], [], []>} : vector<16x4xbf16>, vector<4x12xbf16>, vector<16x12xf32> -> vector<16x12xf32>
      %23 = arith.addf %15, %22 : vector<16x12xf32>
      %c1_i32_21 = arith.constant 1 : i32
      %24 = arith.addi %arg4, %c1_i32_21 : i32
      %c0_22 = arith.constant 0 : index
      %25 = arith.index_cast %24 : i32 to index
      %c0_23 = arith.constant 0 : index
      %c0_24 = arith.constant 0 : index
      %26 = vector.load %arg1[%c0_22, %25, %c0_23, %c0_24] : memref<1x18x18x4xbf16, #tpu.memory_space<vmem>>, vector<1x1x16x4xbf16>
      %27 = vector.shape_cast %26 : vector<1x1x16x4xbf16> to vector<16x4xbf16>
      %c3 = arith.constant 3 : index
      %c0_25 = arith.constant 0 : index
      %c0_26 = arith.constant 0 : index
      %28 = vector.load %arg2[%c3, %c0_25, %c0_26] : memref<9x4x12xbf16, #tpu.memory_space<vmem>>, vector<1x4x12xbf16>
      %29 = vector.shape_cast %28 : vector<1x4x12xbf16> to vector<4x12xbf16>
      %cst_27 = arith.constant dense<0.000000e+00> : vector<16x12xf32>
      %30 = tpu.matmul %27, %29, %cst_27 {dimension_numbers = #tpu.dot_dimension_numbers<[1], [0], [0], [1], [0, 0, 1, 1], [], []>} : vector<16x4xbf16>, vector<4x12xbf16>, vector<16x12xf32> -> vector<16x12xf32>
      %31 = arith.addf %23, %30 : vector<16x12xf32>
      %c1_i32_28 = arith.constant 1 : i32
      %32 = arith.addi %arg4, %c1_i32_28 : i32
      %c0_29 = arith.constant 0 : index
      %33 = arith.index_cast %32 : i32 to index
      %c1_30 = arith.constant 1 : index
      %c0_31 = arith.constant 0 : index
      %34 = vector.load %arg1[%c0_29, %33, %c1_30, %c0_31] : memref<1x18x18x4xbf16, #tpu.memory_space<vmem>>, vector<1x1x16x4xbf16>
      %35 = vector.shape_cast %34 : vector<1x1x16x4xbf16> to vector<16x4xbf16>
      %c4 = arith.constant 4 : index
      %c0_32 = arith.constant 0 : index
      %c0_33 = arith.constant 0 : index
      %36 = vector.load %arg2[%c4, %c0_32, %c0_33] : memref<9x4x12xbf16, #tpu.memory_space<vmem>>, vector<1x4x12xbf16>
      %37 = vector.shape_cast %36 : vector<1x4x12xbf16> to vector<4x12xbf16>
      %cst_34 = arith.constant dense<0.000000e+00> : vector<16x12xf32>
      %38 = tpu.matmul %35, %37, %cst_34 {dimension_numbers = #tpu.dot_dimension_numbers<[1], [0], [0], [1], [0, 0, 1, 1], [], []>} : vector<16x4xbf16>, vector<4x12xbf16>, vector<16x12xf32> -> vector<16x12xf32>
      %39 = arith.addf %31, %38 : vector<16x12xf32>
      %c1_i32_35 = arith.constant 1 : i32
      %40 = arith.addi %arg4, %c1_i32_35 : i32
      %c0_36 = arith.constant 0 : index
      %41 = arith.index_cast %40 : i32 to index
      %c2_37 = arith.constant 2 : index
      %c0_38 = arith.constant 0 : index
      %42 = vector.load %arg1[%c0_36, %41, %c2_37, %c0_38] : memref<1x18x18x4xbf16, #tpu.memory_space<vmem>>, vector<1x1x16x4xbf16>
      %43 = vector.shape_cast %42 : vector<1x1x16x4xbf16> to vector<16x4xbf16>
      %c5 = arith.constant 5 : index
      %c0_39 = arith.constant 0 : index
      %c0_40 = arith.constant 0 : index
      %44 = vector.load %arg2[%c5, %c0_39, %c0_40] : memref<9x4x12xbf16, #tpu.memory_space<vmem>>, vector<1x4x12xbf16>
      %45 = vector.shape_cast %44 : vector<1x4x12xbf16> to vector<4x12xbf16>
      %cst_41 = arith.constant dense<0.000000e+00> : vector<16x12xf32>
      %46 = tpu.matmul %43, %45, %cst_41 {dimension_numbers = #tpu.dot_dimension_numbers<[1], [0], [0], [1], [0, 0, 1, 1], [], []>} : vector<16x4xbf16>, vector<4x12xbf16>, vector<16x12xf32> -> vector<16x12xf32>
      %47 = arith.addf %39, %46 : vector<16x12xf32>
      %c2_i32 = arith.constant 2 : i32
      %48 = arith.addi %arg4, %c2_i32 : i32
      %c0_42 = arith.constant 0 : index
      %49 = arith.index_cast %48 : i32 to index
      %c0_43 = arith.constant 0 : index
      %c0_44 = arith.constant 0 : index
      %50 = vector.load %arg1[%c0_42, %49, %c0_43, %c0_44] : memref<1x18x18x4xbf16, #tpu.memory_space<vmem>>, vector<1x1x16x4xbf16>
      %51 = vector.shape_cast %50 : vector<1x1x16x4xbf16> to vector<16x4xbf16>
      %c6 = arith.constant 6 : index
      %c0_45 = arith.constant 0 : index
      %c0_46 = arith.constant 0 : index
      %52 = vector.load %arg2[%c6, %c0_45, %c0_46] : memref<9x4x12xbf16, #tpu.memory_space<vmem>>, vector<1x4x12xbf16>
      %53 = vector.shape_cast %52 : vector<1x4x12xbf16> to vector<4x12xbf16>
      %cst_47 = arith.constant dense<0.000000e+00> : vector<16x12xf32>
      %54 = tpu.matmul %51, %53, %cst_47 {dimension_numbers = #tpu.dot_dimension_numbers<[1], [0], [0], [1], [0, 0, 1, 1], [], []>} : vector<16x4xbf16>, vector<4x12xbf16>, vector<16x12xf32> -> vector<16x12xf32>
      %55 = arith.addf %47, %54 : vector<16x12xf32>
      %c2_i32_48 = arith.constant 2 : i32
      %56 = arith.addi %arg4, %c2_i32_48 : i32
      %c0_49 = arith.constant 0 : index
      %57 = arith.index_cast %56 : i32 to index
      %c1_50 = arith.constant 1 : index
      %c0_51 = arith.constant 0 : index
      %58 = vector.load %arg1[%c0_49, %57, %c1_50, %c0_51] : memref<1x18x18x4xbf16, #tpu.memory_space<vmem>>, vector<1x1x16x4xbf16>
      %59 = vector.shape_cast %58 : vector<1x1x16x4xbf16> to vector<16x4xbf16>
      %c7 = arith.constant 7 : index
      %c0_52 = arith.constant 0 : index
      %c0_53 = arith.constant 0 : index
      %60 = vector.load %arg2[%c7, %c0_52, %c0_53] : memref<9x4x12xbf16, #tpu.memory_space<vmem>>, vector<1x4x12xbf16>
      %61 = vector.shape_cast %60 : vector<1x4x12xbf16> to vector<4x12xbf16>
      %cst_54 = arith.constant dense<0.000000e+00> : vector<16x12xf32>
      %62 = tpu.matmul %59, %61, %cst_54 {dimension_numbers = #tpu.dot_dimension_numbers<[1], [0], [0], [1], [0, 0, 1, 1], [], []>} : vector<16x4xbf16>, vector<4x12xbf16>, vector<16x12xf32> -> vector<16x12xf32>
      %63 = arith.addf %55, %62 : vector<16x12xf32>
      %c2_i32_55 = arith.constant 2 : i32
      %64 = arith.addi %arg4, %c2_i32_55 : i32
      %c0_56 = arith.constant 0 : index
      %65 = arith.index_cast %64 : i32 to index
      %c2_57 = arith.constant 2 : index
      %c0_58 = arith.constant 0 : index
      %66 = vector.load %arg1[%c0_56, %65, %c2_57, %c0_58] : memref<1x18x18x4xbf16, #tpu.memory_space<vmem>>, vector<1x1x16x4xbf16>
      %67 = vector.shape_cast %66 : vector<1x1x16x4xbf16> to vector<16x4xbf16>
      %c8 = arith.constant 8 : index
      %c0_59 = arith.constant 0 : index
      %c0_60 = arith.constant 0 : index
      %68 = vector.load %arg2[%c8, %c0_59, %c0_60] : memref<9x4x12xbf16, #tpu.memory_space<vmem>>, vector<1x4x12xbf16>
      %69 = vector.shape_cast %68 : vector<1x4x12xbf16> to vector<4x12xbf16>
      %cst_61 = arith.constant dense<0.000000e+00> : vector<16x12xf32>
      %70 = tpu.matmul %67, %69, %cst_61 {dimension_numbers = #tpu.dot_dimension_numbers<[1], [0], [0], [1], [0, 0, 1, 1], [], []>} : vector<16x4xbf16>, vector<4x12xbf16>, vector<16x12xf32> -> vector<16x12xf32>
      %71 = arith.addf %63, %70 : vector<16x12xf32>
      %72 = math.tanh %71 : vector<16x12xf32>
      %73 = arith.truncf %72 : vector<16x12xf32> to vector<16x12xbf16>
      %c0_62 = arith.constant 0 : index
      %74 = arith.index_cast %arg4 : i32 to index
      %c0_63 = arith.constant 0 : index
      %c0_64 = arith.constant 0 : index
      %75 = vector.load %arg3[%c0_62, %74, %c0_63, %c0_64] : memref<1x16x16x12xbf16, #tpu.memory_space<vmem>>, vector<1x1x16x12xbf16>
      %76 = vector.shape_cast %75 : vector<1x1x16x12xbf16> to vector<16x12xbf16>
      %77 = vector.shape_cast %73 : vector<16x12xbf16> to vector<1x1x16x12xbf16>
      tpu.vector_store %arg3[%c0_62, %74, %c0_63, %c0_64], %77 {strides = array<i32>} : memref<1x16x16x12xbf16, #tpu.memory_space<vmem>>, vector<1x1x16x12xbf16>,
    }
    %c16_i32_0 = arith.constant 16 : i32
    return
  }
  func.func @transform_0(%arg0: i32) -> (i32, i32, i32, i32) {
    %c0_i32 = arith.constant 0 : i32
    %c0_i32_0 = arith.constant 0 : i32
    %c0_i32_1 = arith.constant 0 : i32
    %c0_i32_2 = arith.constant 0 : i32
    return %arg0, %c0_i32, %c0_i32_0, %c0_i32_1 : i32, i32, i32, i32
  }
  func.func @transform_1(%arg0: i32) -> (i32, i32, i32) {
    %c0_i32 = arith.constant 0 : i32
    %c0_i32_0 = arith.constant 0 : i32
    %c0_i32_1 = arith.constant 0 : i32
    %c0_i32_2 = arith.constant 0 : i32
    return %c0_i32, %c0_i32_0, %c0_i32_1 : i32, i32, i32
  }
  func.func @transform_2(%arg0: i32) -> (i32, i32, i32, i32) {
    %c0_i32 = arith.constant 0 : i32
    %c0_i32_0 = arith.constant 0 : i32
    %c0_i32_1 = arith.constant 0 : i32
    %c0_i32_2 = arith.constant 0 : i32
    return %arg0, %c0_i32, %c0_i32_0, %c0_i32_1 : i32, i32, i32, i32
  }
}

</mosaic_0001>

<bundles_post_ra>
// kernel: generator_forward.4
= control target key start
LH: loop header
LB: loop body
LE: loop exit
PB: predicated region body
PF: predicated region fallthrough
CT: control target
= control target key end

     0   :  { %9 = vsyncpa [#allocation6], 0  ;;  %s1791_s0 = inlined_call_operand.vmem [shape: bf16[2,10,10,8], index: 0, kind: input, shape index: {}]   ;;  %s1792_s1 = inlined_call_operand.hbm [shape: bf16[9,8,16], index: 1, kind: input, shape index: {}]   ;;  %s1793_s2 = inlined_call_operand.hbm [shape: f32[1,4], index: 2, kind: input, shape index: {}]   ;;  %s1794_s3 = inlined_call_operand.hbm [shape: f32[1,4], index: 3, kind: input, shape index: {}]   ;;  %s1795_s4 = inlined_call_operand.vmem [shape: bf16[2,8,8,16], index: 4, kind: output, shape index: {}]  }
   0x1   :  { %10 = vsyncpa [#allocation8], 0  ;;  %s1537_s15 = smov 0   ;;  %s1539_s16 = smov 0  }
   0x2   :  { %s1541_s17 = smov 0   ;;  %s1543_s18 = smov 0  }
   0x3   :  { %s1545_s19 = smov 0  }
   0x4 LB: > { %s1498_s20 = smov [#allocation7]   ;;  %s1105_s22 = sadd.s32 4294967295, %s1492_s19   ;;  %s1492_s19 = sphi %s1545_s19, %s16_s19   ;;  %s1488_s18 = sphi %s1543_s18, %s1811_s18   ;;  %s1484_s17 = sphi %s1541_s17, %s1810_s17   ;;  %s1480_s16 = sphi %s1539_s16, %s1809_s16   ;;  %s1476_s15 = sphi %s1537_s15, %s1808_s15  }
   0x5   : > { %s182_s21 = sshll.u32 %s1498_s20, 4  ;;  %p1107_p0 = scmp.ge.s32.totalorder %s1492_s19, 1  ;;  %s183_s21 = int_to_ptr.vmem [resolvable:$true] %s182_s21 }
   0x6   : > { %p156_p1 = scmp.lt.s32.totalorder %s1492_s19, 5  ;;  %p1565_p2 = scmp.eq.s32.totalorder %s1105_s22, 0 }
   0x7   : > { %s25_s26 = sadd.s32 1, %s1484_s17  ;;  %s1358_s30 = scalar_lea.hbm %s1793_s2, 16 }
   0x8   : > { %s1800_s23 = scalar_select %p1565_p2, 1, 0 }
   0x9   : > { %p1569_p3 = pnand %p1107_p0, %p156_p1  ;;  %p1582_p6 = scmp.ge.s32.totalorder %s25_s26, 2 }
   0xa   : > { %p1359_p7 = scmp.ne.s32.totalorder %s1793_s2, %s1358_s30  ;;  %p1365_p11 = scmp.lt.u32.totalorder %s1358_s30, %s1793_s2 }
   0xb   : > { %s1801_s24 = scalar_select %p1569_p3, 1, 0 }
   0xc   : > { %p1272_p4 = pneg %p1569_p3 }
   0xd   : > { %s1803_s27 = scalar_select %p1582_p6, 1, 0 }
   0xe   : > { %p1577_p5 = pnand %p1565_p2, %p1272_p4 }
  0x10   : > { %p1594_p8 = pneg %p1577_p5 }
  0x12   : > { %p1361_p9 = pnand %p1594_p8, %p1359_p7 }
  0x14   : > { %p1362_p10 = pneg %p1361_p9 }
  0x16   : > { %p1367_p12 = pnand %p1365_p11, %p1362_p10 }
  0x18   : > { %1370 = shalt.err (!%p1367_p12)
}
  0x19   : > { %s1371_s10 = scalar_lea.vmem %s183_s21, 16  ;;  %s1378_s11 = scalar_lea.vmem %s183_s21, 32 }
  0x1a   : > { %p1372_p13 = scmp.ne.s32.totalorder %s183_s21, %s1371_s10  ;;  %p1379_p4 = scmp.lt.s32.totalorder %s183_s21, %s183_s21 }
  0x1b   : > { %p1380_p2 = scmp.lt.s32.totalorder %s1378_s11, %s1371_s10 }
  0x1c   : > { %p1374_p0 = pnand %p1372_p13, %p1594_p8 }
  0x1d   : > { %p1381_p3 = por %p1380_p2, %p1379_p4 }
  0x1e   : > { %p1375_p1 = pneg %p1374_p0 }
  0x20   : > { %p1382_p6 = pnand %p1381_p3, %p1375_p1 }
  0x22   : > { %1385 = shalt.err (!%p1382_p6)
}
  0x23   : > { %1278 = dma.hbm_to_vmem [thread:$0]  (!%p1577_p5), %s1793_s2, 16, %s183_s21, [#allocation8]  }
  0x24   : > { %p1805_p7 = scmp.ne.s32.totalorder %s1803_s27, 0  ;;  %s28_s14 = sadd.s32 1, %s1488_s18 }
  0x25   : > { %s1499_s20 = smov [#allocation5]   ;;  %s1386_s30 = scalar_lea.hbm %s1792_s1, 576 }
  0x26   : > { %s1813_s26 = smov (%p1805_p7, %s25_s26), 0  ;;  %s1815_s14 = smov (!%p1805_p7, %s28_s14), %s1488_s18 }
  0x27   : > { %s168_s22 = sshll.u32 %s1499_s20, 4  ;;  %p30_p2 = scmp.ge.s32.totalorder %s1815_s14, 2  ;;  %s169_s22 = int_to_ptr.vmem [resolvable:$true] %s168_s22 }
  0x28   : > { %p1387_p3 = scmp.ne.s32.totalorder %s1792_s1, %s1386_s30  ;;  %p1393_p10 = scmp.lt.u32.totalorder %s1386_s30, %s1792_s1 }
  0x29   : > { %s1817_s14 = smov (%p30_p2, %s1815_s14), 0 }
  0x2a   : > { %p1389_p6 = pnand %p1387_p3, %p1594_p8 }
  0x2c   : > { %p1390_p9 = pneg %p1389_p6 }
  0x2e   : > { %p1395_p11 = pnand %p1393_p10, %p1390_p9 }
  0x30   : > { %1398 = shalt.err (!%p1395_p11)
}
  0x31   : > { %s1399_s8 = scalar_lea.vmem %s169_s22, 576  ;;  %p1407_p1 = scmp.lt.s32.totalorder %s169_s22, %s169_s22 }
  0x32   : > { %p1400_p12 = scmp.ne.s32.totalorder %s169_s22, %s1399_s8  ;;  %p1408_p4 = scmp.lt.s32.totalorder %s1399_s8, %s1399_s8 }
  0x34   : > { %p1402_p13 = pnand %p1400_p12, %p1594_p8  ;;  %p1409_p7 = por %p1408_p4, %p1407_p1 }
  0x36   : > { %p1403_p0 = pneg %p1402_p13 }
  0x38   : > { %p1410_p2 = pnand %p1409_p7, %p1403_p0 }
  0x3a   : > { %1413 = shalt.err (!%p1410_p2)
}
  0x3b   : > { %s1500_s9 = smov 64   ;;  %s1501_s10 = smov 4  }
  0x3c   : > { %1275 = dma.hbm_to_vmem [thread:$0]  (!%p1577_p5), %s1792_s1, 576, %s169_s22, [#allocation6], %s1500_s9, %s1500_s9, %s1501_s10  }
  0x3d   : > { %s1502_s13 = smov [#allocation9]   ;;  %s1414_s30 = scalar_lea.hbm %s1794_s3, 16 }
  0x3e   : > { %s193_s20 = sshll.u32 %s1502_s13, 4  ;;  %p1415_p3 = scmp.ne.s32.totalorder %s1794_s3, %s1414_s30  ;;  %s194_s20 = int_to_ptr.vmem [resolvable:$true] %s193_s20 }
  0x3f   : > { %p1421_p10 = scmp.lt.u32.totalorder %s1414_s30, %s1794_s3 }
  0x40   : > { %p1417_p6 = pnand %p1415_p3, %p1594_p8 }
  0x42   : > { %p1418_p9 = pneg %p1417_p6 }
  0x44   : > { %p1423_p11 = pnand %p1421_p10, %p1418_p9 }
  0x46   : > { %1426 = shalt.err (!%p1423_p11)
}
  0x47   : > { %s1427_s22 = scalar_lea.vmem %s194_s20, 16  ;;  %s1434_s8 = scalar_lea.vmem %s194_s20, 32 }
  0x48   : > { %p1428_p12 = scmp.ne.s32.totalorder %s194_s20, %s1427_s22  ;;  %p1435_p1 = scmp.lt.s32.totalorder %s194_s20, %s194_s20 }
  0x49   : > { %p1436_p4 = scmp.lt.s32.totalorder %s1434_s8, %s1427_s22 }
  0x4a   : > { %p1430_p13 = pnand %p1428_p12, %p1594_p8 }
  0x4b   : > { %p1437_p7 = por %p1436_p4, %p1435_p1 }
  0x4c   : > { %p1431_p0 = pneg %p1430_p13 }
  0x4e   : > { %p1438_p2 = pnand %p1437_p7, %p1431_p0 }
  0x50   : > { %1441 = shalt.err (!%p1438_p2)
}
  0x51   : > { %1281 = dma.hbm_to_vmem [thread:$0]  (!%p1577_p5), %s1794_s3, 16, %s194_s20, [#allocation8]  }
  0x52   : > { %p1806_p3 = scmp.ne.s32.totalorder %s1801_s24, 0 }
  0x53   : > { %p1807_p6 = scmp.ne.s32.totalorder (!%p1806_p3), %s1800_s23, 0 }
  0x54   : > { %220 = sbr.rel (%p1806_p3) target bundleno = 716 (0x2cc), region = 36 }
  0x5b   : > { %1467 = dma.done.wait (%p1807_p6), [#allocation6], 576  }
  0x5c   : > { %1469 = vsyncadd (%p1807_p6), [#allocation6], 4294966720 }
  0x5d   : > { %1471 = dma.done.wait (%p1807_p6), [#allocation8], 32  }
  0x5e   : > { %1473 = vsyncadd (%p1807_p6), [#allocation8], 4294967264  ;;  %s258_s24 = ssub.s32 1, %s1480_s16  ;;  %s269_s25 = smul.u32 %s1476_s15, %s1480_s16 }
  0x5f   : > { %s259_s7 = smul.u32 %s1476_s15, %s258_s24  ;;  %p277_p5 = scmp.eq.s32.totalorder %s1480_s16, 0 }
  0x60   : > { %p270_p8 = scmp.lt.s32.totalorder %s269_s25, 1  ;;  %p278_p9 = scmp.eq.s32.totalorder %s1476_s15, 0 }
  0x61   : > { %s260_s11 = sadd.s32 %s1480_s16, %s259_s7 }
  0x62   : > { %p261_p10 = scmp.lt.s32.totalorder %s260_s11, 1  ;;  %p279_p11 = pnand %p278_p9, %p277_p5 }
  0x63   : > { %s1819_s25 = smov (!%p270_p8, %s269_s25), 1  ;;  %vm283_vm0 = vcmask (!%p279_p11), 122880   ;;  %v1503_v0 = vmov (!%p279_p11), 0.0  }
  0x64   : > { %s1821_s11 = smov (!%p261_p10, %s260_s11), 1  ;;  %s1156_s23 = sshll.u32 %s1819_s25, 5  ;;  %284 = vst.msk [vmem:[#allocation3] sm:$0x1] (!%p279_p11), %vm283_vm0, %v1503_v0  ;;  %285 = vst.msk [vmem:[#allocation4] sm:$0x1] (!%p279_p11), %vm283_vm0, %v1503_v0 }
  0x65   : > { %s1259_s12 = smul.u32 80, %s1821_s11  ;;  %s1676_s28 = scalar_lea.vmem %s1795_s4, %s1156_s23 }
  0x66   : > { %282 = sbr.rel (%p279_p11) target bundleno = 109 (0x6d), region = 52 }
  0x67   : > { %s1681_s5 = scalar_lea.vmem %s1791_s0, %s1259_s12 }
  0x6d PF: > { %p1119_p12 = scmp.ne.s32.totalorder %s1480_s16, 0 }
  0x6e   : > { %s1684_s6 = smov (!%p1119_p12), 0  }
  0x6f   : > { %288 = sbr.rel (%p1119_p12) target bundleno = 411 (0x19b), region = 56 }
  0x76 LB: >> { %vm319_vm1 = vcmask 1043456   ;;  %v520_v1 = vld [vmem:[#allocation5 + $0x10] sm:$0xf]  ;;  %v302_v2 = vld [vmem:[#allocation5 + $0x4] sm:$0xf]  ;;  %v1504_v3 = vmov 0.0   ;;  %s1496_s6 = sphi %s1684_s6, %s294_s6  }
  0x77   : >> { %1200 = vmatprep.subr.bf16.mxu0 %v1504_v3  ;;  %1176 = vmatprep.subr.bf16.mxu1 %v1504_v3  ;;  %v537_v4 = vsel %vm319_vm1, %v520_v1, 0  ;;  %v321_v5 = vsel %vm319_vm1, %v302_v2, 0  ;;  %s1157_s21 = sshll.u32 %s1496_s6, 3  ;;  %vm1505_vm2 = vmmov 0   ;;  %v299_v16 = vld [vmem:[#allocation5] sm:$0xf] }
  0x78   : >> { %1201 = vmatpush3.bf16.msra.mxu0 %v537_v4  ;;  %1177 = vmatpush3.bf16.msra.mxu1 %v321_v5  ;;  %s1701_s27 = scalar_lea.vmem %s1681_s5, %s1157_s21  ;;  %v582_v18 = vld [vmem:[#allocation5 + $0x14] sm:$0xf]  ;;  %vm315_vm3 = vcmask 64512   ;;  %v367_v21 = vsel %vm319_vm1, %v299_v16, 0  ;;  %v411_v26 = vld [vmem:[#allocation5 + $0x8] sm:$0xf] }
  0x79   : >> { %1178 = vmatprep.mubr.msk.bf16.mxu1 %vm1505_vm2, %v1504_v3  ;;  %1202 = vmatprep.mubr.msk.bf16.mxu0 %vm1505_vm2, %v1504_v3  ;;  %v298_v6 = vld [vmem:[%s1701_s27] sm:$0xf]  ;;  %v300_v7 = vld [vmem:[%s1701_s27 + $0x4] sm:$0x1]  ;;  %v1130_v8 = vld [vmem:[%s1701_s27 + $0x8] sm:$0xf] }
  0x7a   : >> { %1206 = vmatprep.subr.bf16.mxu0 %v1504_v3  ;;  %1182 = vmatprep.subr.bf16.mxu1 %v1504_v3  ;;  %v1122_v9 = vcombine.low %v298_v6, %v300_v7  ;;  %v1131_v10 = vld [vmem:[%s1701_s27 + $0xc] sm:$0x1]  ;;  %v591_v23 = vsel %vm319_vm1, %v582_v18, 0  ;;  %v1134_v24 = vld [vmem:[%s1701_s27 + $0x8] sm:$0xe]  ;;  %v420_v29 = vsel %vm319_vm1, %v411_v26, 0 }
  0x7b   : >> { %v1132_v11 = vcombine.low %v1130_v8, %v1131_v10  ;;  %v1135_v25 = vcombine.low %v1134_v24, %v1131_v10  ;;  %v640_v27 = vld [vmem:[#allocation5 + $0x18] sm:$0xf]  ;;  %v409_v31 = vld [vmem:[%s1701_s27] sm:$0xe]  ;;  %v469_v35 = vld [vmem:[#allocation5 + $0xc] sm:$0xf] }
  0x7c   : >> { %v309_v12 = vshrl.u32 %v1122_v9, 16  ;;  %v311_v13 = vshll.u32 %v1122_v9, 16  ;;  %v645_v30 = vsel %vm319_vm1, %v640_v27, 0  ;;  %v1125_v32 = vcombine.low %v409_v31, %v300_v7  ;;  %v1140_v33 = vld [vmem:[%s1701_s27 + $0x10] sm:$0xf]  ;;  %s1148_s22 = sshll.u32 %s1476_s15, 6 }
  0x7d   : >> { %v527_v14 = vshrl.u32 %v1132_v11, 16  ;;  %v529_v15 = vshll.u32 %v1132_v11, 16  ;;  %v586_v28 = vrot.slane %v1135_v25, 1  ;;  %v1141_v34 = vld [vmem:[%s1701_s27 + $0x14] sm:$0x1]  ;;  %v474_v40 = vsel %vm319_vm1, %v469_v35, 0  ;;  %s807_s8 = sadd.s32 %s1157_s21, %s1148_s22 }
  0x7e   : >> { %v313_v17 = vrot.slane %v311_v13, 1  ;;  %v415_v36 = vrot.slane %v1125_v32, 1  ;;  %v691_v37 = vld [vmem:[#allocation5 + $0x1c] sm:$0xf]  ;;  %v1142_v38 = vcombine.low %v1140_v33, %v1141_v34  ;;  %v1138_v39 = vld [vmem:[%s1701_s27 + $0x10] sm:$0xf] }
  0x7f   : >> { %v531_v19 = vrot.slane %v529_v15, 1  ;;  %v708_v41 = vsel %vm319_vm1, %v691_v37, 0  ;;  %v753_v45 = vld [vmem:[#allocation5 + $0x20] sm:$0xf]  ;;  %v1128_v46 = vld [vmem:[%s1701_s27 + $0x8] sm:$0xf] }
  0x80   : >> { %v314_v20 = vor.u32 %v313_v17, %v309_v12  ;;  %v700_v42 = vshll.u32 %v1142_v38, 16  ;;  %v698_v43 = vshrl.u32 %v1142_v38, 16  ;;  %v762_v48 = vsel %vm319_vm1, %v753_v45, 0  ;;  %v1144_v49 = vld [vmem:[%s1701_s27 + $0x10] sm:$0xe]  ;;  %s808_s9 = scalar_lea.vmem [#allocation2], %s807_s8 }
  0x81   : >> { %v532_v22 = vor.u32 %v531_v19, %v527_v14  ;;  %v1145_v50 = vcombine.low %v1144_v49, %v1141_v34  ;;  %vm809_vm4 = vcmask 130048   ;;  %v811_v9 = vld [vmem:[#allocation3] sm:$0x1]  ;;  %vm820_vm5 = vcmask 122880   ;;  %v822_v12 = vld [vmem:[#allocation4] sm:$0x1] }
  0x82   : >> { %1179 = vmatmul.mubr.msk.bf16.vlgmr.msra.gmra.mrb[0].mxu1 %vm315_vm3, %v314_v20  ;;  %v702_v44 = vrot.slane %v700_v42, 1  ;;  %s294_s6 = sadd.s32 1, %s1496_s6  }
  0x83   : >> { %1203 = vmatmul.mubr.msk.bf16.vlgmr.msra.gmra.mrb[0].mxu0 %vm315_vm3, %v532_v22  ;;  %1183 = vmatpush3.bf16.msra.mxu1 %v367_v21  ;;  %v757_v51 = vrot.slane %v1145_v50, 1  ;;  %p291_p13 = scmp.ge.s32.totalorder %s294_s6, 8  }
  0x84   : >> { %1207 = vmatpush3.bf16.msra.mxu0 %v591_v23  ;;  %1184 = vmatprep.mubr.msk.bf16.mxu1 %vm1505_vm2, %v1504_v3  ;;  %v703_v47 = vor.u32 %v702_v44, %v698_v43 }
  0x85   : >> { %1208 = vmatprep.mubr.msk.bf16.mxu0 %vm1505_vm2, %v1504_v3  ;;  %1212 = vmatprep.subr.bf16.mxu0 %v1504_v3 }
  0x86   : >> { %1188 = vmatprep.subr.bf16.mxu1 %v1504_v3 }
  0x8e   : >> { %1185 = vmatmul.mubr.msk.bf16.vlgmr.msra.gmra.mrb[0].mxu1 %vm315_vm3, %v298_v6 }
  0x8f   : >> { %1209 = vmatmul.mubr.msk.bf16.vlgmr.msra.gmra.mrb[0].mxu0 %vm315_vm3, %v586_v28  ;;  %1189 = vmatpush3.bf16.msra.mxu1 %v420_v29 }
  0x90   : >> { %1213 = vmatpush3.bf16.msra.mxu0 %v645_v30  ;;  %1190 = vmatprep.mubr.msk.bf16.mxu1 %vm1505_vm2, %v1504_v3 }
  0x91   : >> { %1214 = vmatprep.mubr.msk.bf16.mxu0 %vm1505_vm2, %v1504_v3  ;;  %1218 = vmatprep.subr.bf16.mxu0 %v1504_v3 }
  0x92   : >> { %1194 = vmatprep.subr.bf16.mxu1 %v1504_v3 }
  0x9a   : >> { %1191 = vmatmul.mubr.msk.bf16.vlgmr.msra.gmra.mrb[0].mxu1 %vm315_vm3, %v415_v36 }
  0x9b   : >> { %1215 = vmatmul.mubr.msk.bf16.vlgmr.msra.gmra.mrb[0].mxu0 %vm315_vm3, %v1138_v39  ;;  %1195 = vmatpush3.bf16.msra.mxu1 %v474_v40 }
  0x9c   : >> { %1219 = vmatpush3.bf16.msra.mxu0 %v708_v41  ;;  %1196 = vmatprep.mubr.msk.bf16.mxu1 %vm1505_vm2, %v1504_v3 }
  0x9d   : >> { %1220 = vmatprep.mubr.msk.bf16.mxu0 %vm1505_vm2, %v1504_v3  ;;  %1224 = vmatprep.subr.bf16.mxu0 %v1504_v3 }
  0xa6   : >> { %1197 = vmatmul.mubr.msk.bf16.vlgmr.msra.gmra.mrb[0].mxu1 %vm315_vm3, %v1128_v46 }
  0xa7   : >> { %1221 = vmatmul.mubr.msk.bf16.vlgmr.msra.gmra.mrb[0].mxu0 %vm315_vm3, %v703_v47 }
  0xa8   : >> { %1225 = vmatpush3.bf16.msra.mxu0 %v762_v48  ;;  %1226 = vmatprep.mubr.msk.bf16.mxu0 %vm1505_vm2, %v1504_v3 }
  0xb3   : >> { %1227 = vmatmul.mubr.msk.bf16.vlgmr.msra.gmra.mrb[0].mxu0 %vm315_vm3, %v757_v51 }
 0x179   : >> { %v510_v52 = vpop.f32.mrb[0].mxu1 }
 0x17a   : >> { %v1198_v53 = vpop.f32.mrb[1].mxu1 }
 0x17b   : >> { %v513_v54 = vpop.f32.mrb[2].mxu1 }
 0x17c   : >> { %v1199_v55 = vpop.f32.mrb[3].mxu1 }
 0x186   : >> { %v798_v56 = vpop.f32.mrb[0].mxu0 }
 0x187   : >> { %v1230_v57 = vadd.f32 %v798_v56, %v510_v52  ;;  %v1228_v58 = vpop.f32.mrb[1].mxu0 }
 0x188   : >> { %v801_v59 = vpop.f32.mrb[2].mxu0 }
 0x189   : >> { %810 = vst.msk [vmem:[%s808_s9] sm:$0xff] %vm809_vm4, %v1230_v57  ;;  %v812_v60 = vsel %vm809_vm4, %v1230_v57, 0.0  ;;  %v823_v61 = vmul.f32 %v1230_v57, %v1230_v57  ;;  %v1229_v62 = vpop.f32.mrb[3].mxu0 }
 0x18a   : >> { %v813_v63 = vrot.slane %v812_v60, 4 }
 0x18b   : >> { %v824_v0 = vsel %vm809_vm4, %v823_v61, 0.0 }
 0x18c   : >> { %v814_v1 = vadd.f32 %v813_v63, %v812_v60  ;;  %v825_v2 = vrot.slane %v824_v0, 4 }
 0x18e   : >> { %v815_v3 = vrot.slane %v814_v1, 2  ;;  %v826_v4 = vadd.f32 %v825_v2, %v824_v0 }
 0x190   : >> { %v816_v5 = vadd.f32 %v815_v3, %v814_v1  ;;  %v827_v6 = vrot.slane %v826_v4, 2 }
 0x192   : >> { %v817_v7 = vrot.slane %v816_v5, 1  ;;  %v828_v8 = vadd.f32 %v827_v6, %v826_v4 }
 0x194   : >> { %v818_v10 = vadd.f32 %v817_v7, %v816_v5  ;;  %v829_v11 = vrot.slane %v828_v8, 1  ;;  %293 = sbr.rel (!%p291_p13) target bundleno = 118 (0x76), region = 115 }
 0x196   : >> { %v819_v13 = vadd.f32 %v818_v10, %v811_v9  ;;  %v830_v14 = vadd.f32 %v829_v11, %v828_v8 }
 0x198   : >> { %821 = vst.msk [vmem:[#allocation3] sm:$0x1] %vm820_vm5, %v819_v13  ;;  %v831_v15 = vadd.f32 %v830_v14, %v822_v12 }
 0x19a   : >> { %832 = vst.msk [vmem:[#allocation4] sm:$0x1] %vm820_vm5, %v831_v15 }
 0x19b PF: > { %p1149_p0 = scmp.ne.s32.totalorder %s1480_s16, 1 }
 0x19c   : > { %p1150_p1 = scmp.ne.s32.totalorder (!%p1149_p0), %s1476_s15, 0 }
 0x19d   : > { %836 = sbr.rel (%p1149_p0) target bundleno = 716 (0x2cc), region = 67 }
 0x1a4   : > { %839 = sbr.rel (%p1150_p1) target bundleno = 699 (0x2bb), region = 71  ;;  %v840_v16 = vld [vmem:[#allocation3] sm:$0x1] (!%p1150_p1)  ;;  %v841_v17 = vld [vmem:[#allocation4] sm:$0x1] (!%p1150_p1)  ;;  %s1506_s10 = smov (!%p1150_p1), 124   ;;  %v884_v36 = vlaneseq (!%p1150_p1) }
 0x1a5   : > { %843 = vrot.lane.b32.xlu0 (!%p1150_p1), %v840_v16, %s1506_s10  ;;  %856 = vrot.lane.b32.xlu1 (!%p1150_p1), %v841_v17, %s1506_s10  ;;  %s1507_s24 = smov (!%p1150_p1), 120   ;;  %s1508_s25 = smov (!%p1150_p1), 116   ;;  %v875_v38 = vld [vmem:[#allocation7] sm:$0x1] (!%p1150_p1)  ;;  %vm880_vm6 = vcmask (!%p1150_p1), 24576   ;;  %vm891_vm7 = vcmask (!%p1150_p1), 57376  }
 0x1a6   : > { %v885_v37 = vshrl.u32 (!%p1150_p1), %v884_v36, 7  ;;  %v877_v42 = vld [vmem:[#allocation9] sm:$0x1] (!%p1150_p1)  ;;  %s1509_s16 = smov (!%p1150_p1), 4   ;;  %s1510_s7 = smov (!%p1150_p1), 8   ;;  %vm905_vm8 = vcmask (!%p1150_p1), 90176  }
 0x1a7   : > { %s1511_s11 = smov (!%p1150_p1), 12   ;;  %vm914_vm9 = vcmask (!%p1150_p1), 122976  }
 0x1a8   : > { %v886_v39 = vsub.s32 (!%p1150_p1), 0, %v885_v37 }
 0x1a9   : > { %847 = vrot.lane.b32.xlu0 (!%p1150_p1), %v840_v16, %s1507_s24  ;;  %851 = vrot.lane.b32.xlu1 (!%p1150_p1), %v840_v16, %s1508_s25 }
 0x1ad   : > { %860 = vrot.lane.b32.xlu0 %v841_v17, %s1507_s24  ;;  %864 = vrot.lane.b32.xlu1 %v841_v17, %s1508_s25 }
 0x217   : > { %v844_v18 = vpop.permute.xlu0 %843  ;;  %v857_v19 = vpop.permute.xlu1 %856 }
 0x218   : > { %v846_v20 = vadd.f32 %v844_v18, %v840_v16  ;;  %v859_v24 = vadd.f32 %v857_v19, %v841_v17 }
 0x21b   : > { %v848_v21 = vpop.permute.xlu0 %847  ;;  %v852_v22 = vpop.permute.xlu1 %851 }
 0x21c   : > { %v850_v23 = vadd.f32 %v848_v21, %v846_v20 }
 0x21e   : > { %v854_v25 = vadd.f32 %v852_v22, %v850_v23 }
 0x21f   : > { %v861_v26 = vpop.permute.xlu0 %860  ;;  %v865_v27 = vpop.permute.xlu1 %864 }
 0x220   : > { %v868_v28 = vmul.f32 0.001953125, %v854_v25  ;;  %v863_v29 = vadd.f32 %v861_v26, %v859_v24 }
 0x222   : > { %v867_v30 = vadd.f32 %v865_v27, %v863_v29  ;;  %v870_v31 = vmul.f32 %v868_v28, %v868_v28 }
 0x224   : > { %v869_v32 = vmul.f32 0.001953125, %v867_v30 }
 0x226   : > { %v871_v33 = vsub.f32 %v869_v32, %v870_v31 }
 0x228   : > { %v872_v34 = vmax.f32 %v871_v33, 0.0 }
 0x22a   : > { %v873_v35 = vadd.f32 1e-05, %v872_v34 }
 0x22c   : > { %1356 = vrsqrt.f32 %v873_v35 }
 0x236   : > { %v1357_v40 = vpop.eup %1356 }
 0x237   : > { %v876_v41 = vmul.f32 %v1357_v40, %v875_v38 }
 0x239   : > { %v887_v43 = vrot.slane %v876_v41, %v886_v39  ;;  %v878_v44 = vmul.f32 %v876_v41, %v868_v28  ;;  %881 = vst.msk [vmem:[#allocation3] sm:$0x1] %vm880_vm6, %v876_v41 }
 0x23b   : > { %888 = vrot.lane.b32.xlu0 %v887_v43, %s1509_s16  ;;  %v879_v45 = vsub.f32 %v877_v42, %v878_v44 }
 0x23d   : > { %v897_v46 = vrot.slane %v879_v45, %v886_v39  ;;  %882 = vst.msk [vmem:[#allocation4] sm:$0x1] %vm880_vm6, %v879_v45 }
 0x23f   : > { %902 = vrot.lane.b32.xlu0 %v887_v43, %s1510_s7  ;;  %898 = vrot.lane.b32.xlu1 %v897_v46, %s1509_s16 }
 0x243   : > { %911 = vrot.lane.b32.xlu0 %v887_v43, %s1511_s11  ;;  %907 = vrot.lane.b32.xlu1 %v897_v46, %s1510_s7 }
 0x247   : > { %916 = vrot.lane.b32.xlu1 %v897_v46, %s1511_s11 }
 0x2ad   : > { %v889_v47 = vpop.permute.xlu0 %888 }
 0x2ae   : > { %892 = vst.msk [vmem:[#allocation3] sm:$0x1] %vm891_vm7, %v889_v47 }
 0x2b1   : > { %v903_v48 = vpop.permute.xlu0 %902  ;;  %v899_v49 = vpop.permute.xlu1 %898 }
 0x2b2   : > { %906 = vst.msk [vmem:[#allocation3] sm:$0x1] %vm905_vm8, %v903_v48 }
 0x2b3   : > { %901 = vst.msk [vmem:[#allocation4] sm:$0x1] %vm891_vm7, %v899_v49 }
 0x2b5   : > { %v912_v50 = vpop.permute.xlu0 %911  ;;  %v908_v51 = vpop.permute.xlu1 %907 }
 0x2b6   : > { %915 = vst.msk [vmem:[#allocation3] sm:$0x1] %vm914_vm9, %v912_v50 }
 0x2b7   : > { %910 = vst.msk [vmem:[#allocation4] sm:$0x1] %vm905_vm8, %v908_v51 }
 0x2b9   : > { %v917_v52 = vpop.permute.xlu1 %916 }
 0x2ba   : > { %919 = vst.msk [vmem:[#allocation4] sm:$0x1] %vm914_vm9, %v917_v52 }
 0x2bb PF: > { %s1151_s23 = sshll.u32 %s1476_s15, 6  ;;  %vm976_vm10 = vcmask 125952  }
 0x2bc   : > { %s923_s12 = scalar_lea.vmem [#allocation2], %s1151_s23 }
 0x2bd   : > { %v1152_v53 = vld [vmem:[#allocation3] ss:$0 sm:$0xff]  ;;  %v924_v55 = vld [vmem:[%s923_s12] sm:$0xff]  ;;  %v925_v56 = vld [vmem:[%s923_s12 + $0x8] sm:$0xff] }
 0x2be   : > { %v926_v57 = vld [vmem:[%s923_s12 + $0x10] sm:$0xff]  ;;  %v938_v58 = vmul.f32 %v1152_v53, %v924_v55  ;;  %v939_v59 = vmul.f32 %v1152_v53, %v925_v56  ;;  %v927_v61 = vld [vmem:[%s923_s12 + $0x18] sm:$0xff]  ;;  %v928_v62 = vld [vmem:[%s923_s12 + $0x20] sm:$0xff] }
 0x2bf   : > { %v940_v60 = vmul.f32 %v1152_v53, %v926_v57  ;;  %v929_v63 = vld [vmem:[%s923_s12 + $0x28] sm:$0xff]  ;;  %v941_v0 = vmul.f32 %v1152_v53, %v927_v61  ;;  %v942_v1 = vmul.f32 %v1152_v53, %v928_v62  ;;  %v930_v3 = vld [vmem:[%s923_s12 + $0x30] sm:$0xff]  ;;  %v931_v4 = vld [vmem:[%s923_s12 + $0x38] sm:$0xff] }
 0x2c0   : > { %v943_v2 = vmul.f32 %v1152_v53, %v929_v63  ;;  %v944_v8 = vmul.f32 %v1152_v53, %v930_v3  ;;  %v945_v12 = vmul.f32 %v1152_v53, %v931_v4 }
 0x2c1   : > { %v1153_v54 = vld [vmem:[#allocation4] ss:$0 sm:$0xff] }
 0x2c2   : > { %v952_v5 = vadd.f32 %v1153_v54, %v938_v58  ;;  %v953_v6 = vadd.f32 %v1153_v54, %v939_v59  ;;  %v954_v7 = vadd.f32 %v1153_v54, %v940_v60  ;;  %v955_v9 = vadd.f32 %v1153_v54, %v941_v0 }
 0x2c3   : > { %v956_v10 = vadd.f32 %v1153_v54, %v942_v1  ;;  %v957_v11 = vadd.f32 %v1153_v54, %v943_v2  ;;  %v958_v16 = vadd.f32 %v1153_v54, %v944_v8  ;;  %v959_v20 = vadd.f32 %v1153_v54, %v945_v12 }
 0x2c4   : > { %v960_v13 = vmax.f32 %v952_v5, 0.0  ;;  %v961_v14 = vmax.f32 %v953_v6, 0.0  ;;  %v962_v15 = vmax.f32 %v954_v7, 0.0  ;;  %v963_v17 = vmax.f32 %v955_v9, 0.0 }
 0x2c5   : > { %v964_v18 = vmax.f32 %v956_v10, 0.0  ;;  %v965_v19 = vmax.f32 %v957_v11, 0.0  ;;  %v966_v24 = vmax.f32 %v958_v16, 0.0  ;;  %v967_v28 = vmax.f32 %v959_v20, 0.0 }
 0x2c6   : > { %v968_v21 = vpack.c.bf16 %v960_v13, %v960_v13  ;;  %v969_v22 = vpack.c.bf16 %v961_v14, %v961_v14  ;;  %v970_v23 = vpack.c.bf16 %v962_v15, %v962_v15  ;;  %v971_v25 = vpack.c.bf16 %v963_v17, %v963_v17 }
 0x2c7   : > { %v972_v26 = vpack.c.bf16 %v964_v18, %v964_v18  ;;  %v973_v27 = vpack.c.bf16 %v965_v19, %v965_v19  ;;  %v974_v29 = vpack.c.bf16 %v966_v24, %v966_v24  ;;  %v975_v30 = vpack.c.bf16 %v967_v28, %v967_v28 }
 0x2c8   : > { %977 = vst.msk [vmem:[%s1676_s28] sm:$0xf] %vm976_vm10, %v968_v21  ;;  %978 = vst.msk [vmem:[%s1676_s28 + $0x4] sm:$0xf] %vm976_vm10, %v969_v22 }
 0x2c9   : > { %979 = vst.msk [vmem:[%s1676_s28 + $0x8] sm:$0xf] %vm976_vm10, %v970_v23  ;;  %980 = vst.msk [vmem:[%s1676_s28 + $0xc] sm:$0xf] %vm976_vm10, %v971_v25 }
 0x2ca   : > { %981 = vst.msk [vmem:[%s1676_s28 + $0x10] sm:$0xf] %vm976_vm10, %v972_v26  ;;  %982 = vst.msk [vmem:[%s1676_s28 + $0x14] sm:$0xf] %vm976_vm10, %v973_v27 }
 0x2cb   : > { %983 = vst.msk [vmem:[%s1676_s28 + $0x18] sm:$0xf] %vm976_vm10, %v974_v29  ;;  %984 = vst.msk [vmem:[%s1676_s28 + $0x1c] sm:$0xf] %vm976_vm10, %v975_v30 }
 0x2cc PF: > { %s16_s19 = sadd.s32 1, %s1492_s19   ;;  %s1808_s15 = smov %s1484_s17 }
 0x2cd   : > { %p13_p4 = scmp.ge.s32.totalorder %s16_s19, 6   ;;  %s1809_s16 = smov %s1488_s18 }
 0x2ce   : > { %s1810_s17 = smov %s1813_s26  ;;  %s1811_s18 = smov %s1817_s14 }
 0x2cf   :  { %15 = sbr.rel (!%p13_p4) target bundleno = 4 (0x4), region = 126 }
 0x2d6   :  { %1009 = vsyncpa [#allocation6], 1 }
 0x2d7   :  { %1011 = vsyncpa [#allocation6 + $0x1], 1 }
 0x2d8   :  { %1012 = vsyncpa [#allocation8], 1 }

// kernel: generator_forward.5
= control target key start
LH: loop header
LB: loop body
LE: loop exit
PB: predicated region body
PF: predicated region fallthrough
CT: control target
= control target key end

     0   :  { %s1038_s9 = smov 0   ;;  %s1165_s0 = inlined_call_operand.vmem [shape: bf16[2,18,18,4], index: 0, kind: input, shape index: {}]   ;;  %s1166_s1 = inlined_call_operand.vmem [shape: bf16[9,4,12], index: 1, kind: input, shape index: {}]   ;;  %s1167_s2 = inlined_call_operand.vmem [shape: bf16[2,16,16,12], index: 2, kind: output, shape index: {}]  }
   0x1 LB: > { %s809_s10 = sadd.s32 4294967295, %s1015_s9   ;;  %p813_p0 = scmp.ge.s32.totalorder %s1015_s9, 1  ;;  %s1015_s9 = sphi %s1038_s9, %s12_s9  }
   0x2   : > { %p112_p1 = scmp.lt.s32.totalorder %s1015_s9, 3 }
   0x4   : > { %p113_p2 = pnand %p813_p0, %p112_p1 }
   0x5   : > { %p134_p3 = scmp.lt.s32.totalorder (!%p113_p2), %s809_s10, 1  ;;  %s1056_s19 = smov (!%p113_p2), 0  }
   0x6   : > { %116 = sbr.rel (%p113_p2) target bundleno = 311 (0x137), region = 28 }
   0xd   : > { %s1169_s10 = smov (!%p134_p3, %s809_s10), 1 }
   0xe   : > { %s971_s11 = smul.u32 216, %s1169_s10  ;;  %s864_s12 = sshll.u32 %s1169_s10, 7 }
   0xf   : > { %s1049_s15 = scalar_lea.vmem %s1167_s2, %s864_s12 }
  0x10   : > { %s1054_s18 = scalar_lea.vmem %s1165_s0, %s971_s11 }
  0x11 LB: >> { %vm185_vm0 = vcmask 1041408   ;;  %v834_v0 = vld [vmem:[%s1166_s1 + $0x8] sm:$0x3]  ;;  %v818_v1 = vld [vmem:[%s1166_s1 + $0x2] sm:$0x3]  ;;  %v1021_v2 = vmov 0.0   ;;  %s1019_s19 = sphi %s1056_s19, %s150_s19  }
  0x12   : >> { %911 = vmatprep.subr.bf16.mxu0 %v1021_v2  ;;  %887 = vmatprep.subr.bf16.mxu1 %v1021_v2  ;;  %v426_v3 = vsel %vm185_vm0, %v834_v0, 0  ;;  %v187_v4 = vsel %vm185_vm0, %v818_v1, 0  ;;  %s865_s24 = smul.u32 12, %s1019_s19  ;;  %vm1022_vm1 = vmmov 0   ;;  %v156_v16 = vld [vmem:[%s1166_s1] sm:$0x3] }
  0x13   : >> { %912 = vmatpush3.bf16.msra.mxu0 %v426_v3  ;;  %888 = vmatpush3.bf16.msra.mxu1 %v187_v4  ;;  %vm168_vm2 = vsmask.f32 7424  ;;  %vm181_vm3 = vcmask 31744   ;;  %v839_v24 = vld [vmem:[%s1166_s1 + $0xa] sm:$0x3]  ;;  %v233_v26 = vsel %vm185_vm0, %v156_v16, 0 }
  0x14   : >> { %889 = vmatprep.mubr.msk.bf16.mxu1 %vm1022_vm1, %v1021_v2  ;;  %913 = vmatprep.mubr.msk.bf16.mxu0 %vm1022_vm1, %v1021_v2  ;;  %s1078_s25 = scalar_lea.vmem %s1054_s18, %s865_s24  ;;  %v484_v29 = vsel %vm185_vm0, %v839_v24, 0  ;;  %v823_v35 = vld [vmem:[%s1166_s1 + $0x4] sm:$0x3]  ;;  %vm282_vm4 = vcmask 1046528   ;;  %v844_v36 = vld [vmem:[%s1166_s1 + $0xc] sm:$0x3] }
  0x15   : >> { %917 = vmatprep.subr.bf16.mxu0 %v1021_v2  ;;  %893 = vmatprep.subr.bf16.mxu1 %v1021_v2  ;;  %v154_v5 = vld [vmem:[%s1078_s25] sm:$0xf]  ;;  %v155_v6 = vld [vmem:[%s1078_s25 + $0x4] sm:$0xf]  ;;  %v831_v9 = vld [vmem:[%s1078_s25 + $0xc] sm:$0xf] }
  0x16   : >> { %v819_v7 = vcombine.low %v154_v5, %v155_v6  ;;  %v991_v8 = vld [vmem:[%s1078_s25 + $0x8] ss:$0 sps:$4 sm:$0x11]   ;;  %v832_v10 = vld [vmem:[%s1078_s25 + $0x10] sm:$0xf]  ;;  %v290_v37 = vsel %vm185_vm0, %v823_v35, 0 }
  0x17   : >> { %v177_v13 = vshll.u32 %v991_v8, 16  ;;  %v835_v14 = vcombine.low %v831_v9, %v832_v10  ;;  %v993_v15 = vld [vmem:[%s1078_s25 + $0x14] ss:$0 sps:$4 sm:$0x11]   ;;  %v838_v30 = vld [vmem:[%s1078_s25 + $0xc] sm:$0xe] }
  0x18   : >> { %v170_v11 = vshrl.u32 %v819_v7, 16  ;;  %v172_v12 = vshll.u32 %v819_v7, 16  ;;  %v418_v21 = vshll.u32 %v993_v15, 16  ;;  %v840_v32 = vcombine.low %v838_v30, %v832_v10  ;;  %v276_v38 = vld [vmem:[%s1078_s25] sm:$0xe]  ;;  %v996_v50 = vld [vmem:[%s1078_s25 + $0x18] sm:$0xff]  }
  0x19   : >> { %v179_v18 = vrot.slane %v177_v13, 1  ;;  %v411_v19 = vshrl.u32 %v835_v14, 16  ;;  %v413_v20 = vshll.u32 %v835_v14, 16  ;;  %v478_v34 = vrot.slane %v993_v15, 1  ;;  %v847_v42 = vld [vmem:[%s1078_s25 + $0x18] sm:$0xf] }
  0x1a   : >> { %v174_v17 = vrot.slane %v172_v12, 1  ;;  %v420_v25 = vrot.slane %v418_v21, 1  ;;  %v477_v33 = vrot.slane %v840_v32, 1  ;;  %v546_v40 = vsel %vm185_vm0, %v844_v36, 0  ;;  %v848_v43 = vld [vmem:[%s1078_s25 + $0x1c] sm:$0xf] }
  0x1b   : >> { %v415_v23 = vrot.slane %v413_v20, 1  ;;  %v824_v41 = vcombine.low %v276_v38, %v155_v6  ;;  %v284_v45 = vrot.slane %v991_v8, 1  ;;  %v828_v46 = vld [vmem:[%s1166_s1 + $0x6] sm:$0x3]  ;;  %v851_v47 = vcombine.low %v847_v42, %v848_v43  ;;  %v850_v49 = vld [vmem:[%s1166_s1 + $0xe] sm:$0x3] }
  0x1c   : >> { %v175_v22 = vor.u32 %v174_v17, %v170_v11  ;;  %v479_v39 = vsel %vm282_vm4, %v477_v33, %v478_v34  ;;  %v352_v51 = vsel %vm185_vm0, %v828_v46, 0  ;;  %v999_v52 = vld [vmem:[%s1078_s25 + $0x20] ss:$0 sps:$4 sm:$0x11]   ;;  %v620_v54 = vsel %vm185_vm0, %v850_v49, 0  ;;  %v997_v60 = vld [vmem:[%s1078_s25 + $0xc] sm:$0xff]  }
  0x1d   : >> { %v416_v28 = vor.u32 %v415_v23, %v411_v19  ;;  %v283_v44 = vrot.slane %v824_v41, 1  ;;  %v607_v53 = vshll.u32 %v851_v47, 16  ;;  %v605_v55 = vshrl.u32 %v851_v47, 16  ;;  %v855_v61 = vld [vmem:[%s1166_s1 + $0x10] sm:$0x3]  ;;  %s868_s13 = sshll.u32 %s1019_s19, 3 }
  0x1e   : >> { %v180_v27 = vsel %vm168_vm2, %v175_v22, %v179_v18  ;;  %v612_v57 = vshll.u32 %v999_v52, 16  ;;  %v678_v63 = vsel %vm185_vm0, %v855_v61, 0  ;;  %v854_v0 = vld [vmem:[%s1078_s25 + $0x18] sm:$0xe]  ;;  %v672_v4 = vrot.slane %v999_v52, 1  ;;  %s735_s14 = scalar_lea.vmem %s1049_s15, %s868_s13  ;;  %s150_s19 = sadd.s32 1, %s1019_s19  }
  0x1f   : >> { %890 = vmatmul.mubr.msk.bf16.vlgmr.msra.gmra.mrb[0].mxu1 %vm181_vm3, %v180_v27  ;;  %v421_v31 = vsel %vm168_vm2, %v416_v28, %v420_v25  ;;  %v285_v48 = vsel %vm282_vm4, %v283_v44, %v284_v45  ;;  %v609_v56 = vrot.slane %v607_v53, 1  ;;  %v856_v1 = vcombine.low %v854_v0, %v848_v43  ;;  %p147_p4 = scmp.ge.s32.totalorder %s150_s19, 16  }
  0x20   : >> { %894 = vmatpush3.bf16.msra.mxu1 %v233_v26  ;;  %895 = vmatprep.mubr.msk.bf16.mxu1 %vm1022_vm1, %v1021_v2  ;;  %v614_v59 = vrot.slane %v612_v57, 1  ;;  %vm736_vm5 = vcmask 93184  }
  0x21   : >> { %914 = vmatmul.mubr.msk.bf16.vlgmr.msra.gmra.mrb[0].mxu0 %vm181_vm3, %v421_v31  ;;  %899 = vmatprep.subr.bf16.mxu1 %v1021_v2  ;;  %v610_v58 = vor.u32 %v609_v56, %v605_v55  ;;  %v671_v3 = vrot.slane %v856_v1, 1 }
  0x22   : >> { %918 = vmatpush3.bf16.msra.mxu0 %v484_v29  ;;  %919 = vmatprep.mubr.msk.bf16.mxu0 %vm1022_vm1, %v1021_v2 }
  0x23   : >> { %923 = vmatprep.subr.bf16.mxu0 %v1021_v2  ;;  %v615_v62 = vsel %vm168_vm2, %v610_v58, %v614_v59  ;;  %v673_v5 = vsel %vm282_vm4, %v671_v3, %v672_v4 }
  0x2b   : >> { %896 = vmatmul.mubr.msk.bf16.vlgmr.msra.gmra.mrb[0].mxu1 %vm181_vm3, %v819_v7 }
  0x2c   : >> { %900 = vmatpush3.bf16.msra.mxu1 %v290_v37  ;;  %901 = vmatprep.mubr.msk.bf16.mxu1 %vm1022_vm1, %v1021_v2 }
  0x2d   : >> { %920 = vmatmul.mubr.msk.bf16.vlgmr.msra.gmra.mrb[0].mxu0 %vm181_vm3, %v479_v39  ;;  %905 = vmatprep.subr.bf16.mxu1 %v1021_v2 }
  0x2e   : >> { %924 = vmatpush3.bf16.msra.mxu0 %v546_v40  ;;  %925 = vmatprep.mubr.msk.bf16.mxu0 %vm1022_vm1, %v1021_v2 }
  0x2f   : >> { %929 = vmatprep.subr.bf16.mxu0 %v1021_v2 }
  0x37   : >> { %902 = vmatmul.mubr.msk.bf16.vlgmr.msra.gmra.mrb[0].mxu1 %vm181_vm3, %v285_v48 }
  0x38   : >> { %906 = vmatpush3.bf16.msra.mxu1 %v352_v51  ;;  %907 = vmatprep.mubr.msk.bf16.mxu1 %vm1022_vm1, %v1021_v2 }
  0x39   : >> { %926 = vmatmul.mubr.msk.bf16.vlgmr.msra.gmra.mrb[0].mxu0 %vm181_vm3, %v996_v50 }
  0x3a   : >> { %930 = vmatpush3.bf16.msra.mxu0 %v620_v54  ;;  %931 = vmatprep.mubr.msk.bf16.mxu0 %vm1022_vm1, %v1021_v2 }
  0x3b   : >> { %935 = vmatprep.subr.bf16.mxu0 %v1021_v2 }
  0x43   : >> { %908 = vmatmul.mubr.msk.bf16.vlgmr.msra.gmra.mrb[0].mxu1 %vm181_vm3, %v997_v60 }
  0x45   : >> { %932 = vmatmul.mubr.msk.bf16.vlgmr.msra.gmra.mrb[0].mxu0 %vm181_vm3, %v615_v62 }
  0x46   : >> { %936 = vmatpush3.bf16.msra.mxu0 %v678_v63  ;;  %937 = vmatprep.mubr.msk.bf16.mxu0 %vm1022_vm1, %v1021_v2 }
  0x51   : >> { %938 = vmatmul.mubr.msk.bf16.vlgmr.msra.gmra.mrb[0].mxu0 %vm181_vm3, %v673_v5 }
 0x116   : >> { %v388_v6 = vpop.f32.mrb[0].mxu1 }
 0x117   : >> { %v909_v7 = vpop.f32.mrb[1].mxu1 }
 0x118   : >> { %v391_v8 = vpop.f32.mrb[2].mxu1 }
 0x119   : >> { %v910_v9 = vpop.f32.mrb[3].mxu1 }
 0x124   : >> { %v714_v10 = vpop.f32.mrb[0].mxu0 }
 0x125   : >> { %v941_v11 = vadd.f32 %v714_v10, %v388_v6  ;;  %v939_v12 = vpop.f32.mrb[1].mxu0 }
 0x126   : >> { %v717_v13 = vpop.f32.mrb[2].mxu0 }
 0x127   : >> { %1001 = vtanh.f32 %v941_v11  ;;  %v942_v14 = vadd.f32 %v717_v13, %v391_v8  ;;  %v940_v2 = vpop.f32.mrb[3].mxu0 }
 0x129   : >> { %1003 = vtanh.f32 %v942_v14 }
 0x130   : > { %149 = sbr.rel (!%p147_p4) target bundleno = 17 (0x11), region = 77 }
 0x131   : >> { %v1002_v15 = vpop.eup %1001 }
 0x132   : >> { %v866_v16 = vpack.c.bf16 %v1002_v15, %v1002_v15 }
 0x133   : >> { %v1004_v17 = vpop.eup %1003 }
 0x134   : >> { %737 = vst.msk [vmem:[%s735_s14] sm:$0xf] %vm736_vm5, %v866_v16  ;;  %v867_v18 = vpack.c.bf16 %v1004_v17, %v1004_v17 }
 0x136   : >> { %738 = vst.msk [vmem:[%s735_s14 + $0x4] sm:$0xf] %vm736_vm5, %v867_v18 }
 0x137 PF: > { %s12_s9 = sadd.s32 1, %s1015_s9  }
 0x138   : > { %p9_p5 = scmp.ge.s32.totalorder %s12_s9, 4  }
 0x13a   :  { %11 = sbr.rel (!%p9_p5) target bundleno = 1 (0x1), region = 88 }

// kernel: generator_forward.3
= control target key start
LH: loop header
LB: loop body
LE: loop exit
PB: predicated region body
PF: predicated region fallthrough
CT: control target
= control target key end

     0   :  { %12 = vsyncpa [#allocation3], 0  ;;  %s3872_s0 = inlined_call_operand.vmem [shape: bf16[2,8], index: 0, kind: input, shape index: {}]   ;;  %s3873_s1 = inlined_call_operand.hbm [shape: bf16[8,1024], index: 1, kind: input, shape index: {}]   ;;  %s3874_s2 = inlined_call_operand.hbm [shape: f32[1,1024], index: 2, kind: input, shape index: {}]   ;;  %s3875_s3 = inlined_call_operand.hbm [shape: f32[1,1024], index: 3, kind: input, shape index: {}]   ;;  %s3876_s4 = inlined_call_operand.hbm [shape: bf16[1024,512], index: 4, kind: input, shape index: {}]   ;;  %s3877_s5 = inlined_call_operand.hbm [shape: f32[1,512], index: 5, kind: input, shape index: {}]   ;;  %s3878_s6 = inlined_call_operand.hbm [shape: f32[1,512], index: 6, kind: input, shape index: {}]   ;;  %s3879_s7 = inlined_call_operand.vmem [shape: bf16[2,512], index: 7, kind: output, shape index: {}]  }
   0x1   :  { %13 = vsyncpa [#allocation5], 0 }
   0x2   :  { %14 = vsyncpa [#allocation8], 0 }
   0x3   :  { %15 = vsyncpa [#allocation11], 0  ;;  %s3551_s24 = smov [#allocation4]   ;;  %s3552_s26 = smov [#allocation7]  }
   0x4   :  { %s34_s25 = sshll.u32 %s3551_s24, 4  ;;  %s53_s27 = sshll.u32 %s3552_s26, 4  ;;  %s35_s25 = int_to_ptr.vmem [resolvable:$true] %s34_s25  ;;  %s3601_s27 = int_to_ptr.vmem [resolvable:$true] %s53_s27 }
   0x5   :  { %s3411_s30 = scalar_lea.hbm %s3874_s2, 128 }
   0x6   :  { %p3412_p0 = scmp.ne.s32.totalorder %s3874_s2, %s3411_s30  ;;  %p3415_p1 = scmp.lt.u32.totalorder %s3411_s30, %s3874_s2 }
   0x8   :  { %p3417_p2 = pnand %p3415_p1, %p3412_p0 }
   0xa   :  { %3420 = shalt.err (!%p3417_p2)
}
   0xb   :  { %s3421_s12 = scalar_lea.vmem %s35_s25, 128  ;;  %p3426_p4 = scmp.lt.s32.totalorder %s35_s25, %s35_s25 }
   0xc   :  { %p3422_p3 = scmp.ne.s32.totalorder %s35_s25, %s3421_s12  ;;  %p3427_p5 = scmp.lt.s32.totalorder %s3421_s12, %s3421_s12 }
   0xe   :  { %p3428_p6 = por %p3427_p5, %p3426_p4 }
  0x10   :  { %p3429_p7 = pnand %p3428_p6, %p3422_p3 }
  0x12   :  { %3432 = shalt.err (!%p3429_p7)
}
  0x13   :  { %37 = dma.hbm_to_vmem [thread:$0]  %s3874_s2, 128, %s35_s25, [#allocation5]  }
  0x14   :  { %s3433_s17 = scalar_lea.hbm %s3876_s4, 32768 }
  0x15   :  { %p3434_p8 = scmp.ne.s32.totalorder %s3876_s4, %s3433_s17  ;;  %p3437_p9 = scmp.lt.u32.totalorder %s3433_s17, %s3876_s4 }
  0x17   :  { %p3439_p10 = pnand %p3437_p9, %p3434_p8 }
  0x19   :  { %3442 = shalt.err (!%p3439_p10)
}
  0x1a   :  { %s3443_s22 = scalar_lea.vmem %s3601_s27, 32768  ;;  %p3448_p12 = scmp.lt.s32.totalorder %s3601_s27, %s3601_s27 }
  0x1b   :  { %p3444_p11 = scmp.ne.s32.totalorder %s3601_s27, %s3443_s22  ;;  %p3449_p13 = scmp.lt.s32.totalorder %s3443_s22, %s3443_s22 }
  0x1d   :  { %p3450_p0 = por %p3449_p13, %p3448_p12 }
  0x1f   :  { %p3451_p1 = pnand %p3450_p0, %p3444_p11 }
  0x21   :  { %3454 = shalt.err (!%p3451_p1)
}
  0x22   :  { %s3553_s2 = smov 256   ;;  %s3554_s23 = smov 16  }
  0x23   :  { %59 = dma.hbm_to_vmem [thread:$0]  %s3876_s4, 32768, %s3601_s27, [#allocation8], %s3553_s2, %s3553_s2, %s3554_s23  }
  0x24   :  { %s3555_s26 = smov [#allocation2]   ;;  %s3556_s29 = smov [#allocation6]  }
  0x25   :  { %s24_s28 = sshll.u32 %s3555_s26, 4  ;;  %s44_s30 = sshll.u32 %s3556_s29, 4  ;;  %s25_s28 = int_to_ptr.vmem [resolvable:$true] %s24_s28  ;;  %s45_s30 = int_to_ptr.vmem [resolvable:$true] %s44_s30 }
  0x26   :  { %s3455_s10 = scalar_lea.hbm %s3873_s1, 512 }
  0x27   :  { %p3456_p2 = scmp.ne.s32.totalorder %s3873_s1, %s3455_s10  ;;  %p3459_p3 = scmp.lt.u32.totalorder %s3455_s10, %s3873_s1 }
  0x29   :  { %p3461_p4 = pnand %p3459_p3, %p3456_p2 }
  0x2b   :  { %3464 = shalt.err (!%p3461_p4)
}
  0x2c   :  { %s3465_s4 = scalar_lea.vmem %s25_s28, 512  ;;  %p3470_p6 = scmp.lt.s32.totalorder %s25_s28, %s25_s28 }
  0x2d   :  { %p3466_p5 = scmp.ne.s32.totalorder %s25_s28, %s3465_s4  ;;  %p3471_p7 = scmp.lt.s32.totalorder %s3465_s4, %s3465_s4 }
  0x2f   :  { %p3472_p8 = por %p3471_p7, %p3470_p6 }
  0x31   :  { %p3473_p9 = pnand %p3472_p8, %p3466_p5 }
  0x33   :  { %3476 = shalt.err (!%p3473_p9)
}
  0x34   :  { %27 = dma.hbm_to_vmem [thread:$0]  %s3873_s1, 512, %s25_s28, [#allocation3]  }
  0x35   :  { %s3477_s18 = scalar_lea.hbm %s3875_s3, 128 }
  0x36   :  { %p3478_p10 = scmp.ne.s32.totalorder %s3875_s3, %s3477_s18  ;;  %p3481_p11 = scmp.lt.u32.totalorder %s3477_s18, %s3875_s3 }
  0x38   :  { %p3483_p12 = pnand %p3481_p11, %p3478_p10 }
  0x3a   :  { %3486 = shalt.err (!%p3483_p12)
}
  0x3b   :  { %s3487_s2 = scalar_lea.vmem %s45_s30, 128  ;;  %p3492_p0 = scmp.lt.s32.totalorder %s45_s30, %s45_s30 }
  0x3c   :  { %p3488_p13 = scmp.ne.s32.totalorder %s45_s30, %s3487_s2  ;;  %p3493_p1 = scmp.lt.s32.totalorder %s3487_s2, %s3487_s2 }
  0x3e   :  { %p3494_p2 = por %p3493_p1, %p3492_p0 }
  0x40   :  { %p3495_p3 = pnand %p3494_p2, %p3488_p13 }
  0x42   :  { %3498 = shalt.err (!%p3495_p3)
}
  0x43   :  { %47 = dma.hbm_to_vmem [thread:$0]  %s3875_s3, 128, %s45_s30, [#allocation5]  }
  0x44   :  { %s3557_s24 = smov [#allocation9]   ;;  %s3558_s26 = smov [#allocation10]  }
  0x45   :  { %s66_s25 = sshll.u32 %s3557_s24, 4  ;;  %s76_s28 = sshll.u32 %s3558_s26, 4  ;;  %s67_s25 = int_to_ptr.vmem [resolvable:$true] %s66_s25  ;;  %s77_s28 = int_to_ptr.vmem [resolvable:$true] %s76_s28 }
  0x46   :  { %s3499_s9 = scalar_lea.hbm %s3877_s5, 64 }
  0x47   :  { %p3500_p4 = scmp.ne.s32.totalorder %s3877_s5, %s3499_s9  ;;  %p3503_p5 = scmp.lt.u32.totalorder %s3499_s9, %s3877_s5 }
  0x49   :  { %p3505_p6 = pnand %p3503_p5, %p3500_p4 }
  0x4b   :  { %3508 = shalt.err (!%p3505_p6)
}
  0x4c   :  { %s3509_s3 = scalar_lea.vmem %s67_s25, 64  ;;  %p3514_p8 = scmp.lt.s32.totalorder %s67_s25, %s67_s25 }
  0x4d   :  { %p3510_p7 = scmp.ne.s32.totalorder %s67_s25, %s3509_s3  ;;  %p3515_p9 = scmp.lt.s32.totalorder %s3509_s3, %s3509_s3 }
  0x4f   :  { %p3516_p10 = por %p3515_p9, %p3514_p8 }
  0x51   :  { %p3517_p11 = pnand %p3516_p10, %p3510_p7 }
  0x53   :  { %3520 = shalt.err (!%p3517_p11)
}
  0x54   :  { %69 = dma.hbm_to_vmem [thread:$0]  %s3877_s5, 64, %s67_s25, [#allocation8]  }
  0x55   :  { %s3521_s15 = scalar_lea.hbm %s3878_s6, 64 }
  0x56   :  { %p3522_p12 = scmp.ne.s32.totalorder %s3878_s6, %s3521_s15  ;;  %p3525_p13 = scmp.lt.u32.totalorder %s3521_s15, %s3878_s6 }
  0x58   :  { %p3527_p0 = pnand %p3525_p13, %p3522_p12 }
  0x5a   :  { %3530 = shalt.err (!%p3527_p0)
}
  0x5b   :  { %s3531_s20 = scalar_lea.vmem %s77_s28, 64  ;;  %p3536_p2 = scmp.lt.s32.totalorder %s77_s28, %s77_s28 }
  0x5c   :  { %p3532_p1 = scmp.ne.s32.totalorder %s77_s28, %s3531_s20  ;;  %p3537_p3 = scmp.lt.s32.totalorder %s3531_s20, %s3531_s20 }
  0x5e   :  { %p3538_p4 = por %p3537_p3, %p3536_p2 }
  0x60   :  { %p3539_p5 = pnand %p3538_p4, %p3532_p1 }
  0x62   :  { %3542 = shalt.err (!%p3539_p5)
}
  0x63   :  { %79 = dma.hbm_to_vmem [thread:$0]  %s3878_s6, 64, %s77_s28, [#allocation11]  }
  0x64   :  { %3543 = dma.done.wait [#allocation3], 512  }
  0x65   :  { %3544 = vsyncadd [#allocation3], 4294966784 }
  0x66   :  { %3545 = dma.done.wait [#allocation5], 256  }
  0x67   :  { %3546 = vsyncadd [#allocation5], 4294967040 }
  0x68   :  { %3547 = dma.done.wait [#allocation8], 32832  }
  0x69   :  { %3548 = vsyncadd [#allocation8], 4294934464 }
  0x6a   :  { %3549 = dma.done.wait [#allocation11], 64  }
  0x6b   :  { %3550 = vsyncadd [#allocation11], 4294967232  ;;  %v3559_v0 = vmov 0   ;;  %v100_v1 = vld [vmem:[#allocation2] sm:$0xff]  ;;  %vm128_vm0 = vcmask 1043456   ;;  %v101_v2 = vld [vmem:[#allocation2 + $0x8] sm:$0xff] }
  0x6c   :  { %185 = vmatprep.mubr.bf16.mxu0 %v3559_v0  ;;  %226 = vmatprep.mubr.bf16.mxu1 %v3559_v0  ;;  %v2685_v3 = vcombine.high %v100_v1, %v100_v1  ;;  %v2684_v4 = vcombine.low %v100_v1, %v100_v1  ;;  %v2687_v5 = vcombine.high %v101_v2, %v101_v2  ;;  %v102_v7 = vld [vmem:[#allocation2 + $0x10] sm:$0xff]  ;;  %v103_v8 = vld [vmem:[#allocation2 + $0x18] sm:$0xff]  ;;  %v99_v15 = vld [vmem:[%s3872_s0] sm:$0x1]  ;;  %vm124_vm1 = vcmask 64512  }
  0x6d   :  { %v2686_v6 = vcombine.low %v101_v2, %v101_v2  ;;  %v2689_v9 = vcombine.high %v102_v7, %v102_v7  ;;  %v2688_v10 = vcombine.low %v102_v7, %v102_v7  ;;  %v2691_v11 = vcombine.high %v103_v8, %v103_v8  ;;  %v3003_v18 = vld [vmem:[#allocation7 + $0x4] ss:$16 sps:$4 sm:$0xff]   ;;  %v3006_v19 = vld [vmem:[#allocation7 + $0xc] ss:$16 sps:$4 sm:$0xff]   ;;  %v3001_v20 = vld [vmem:[#allocation7] ss:$16 sps:$4 sm:$0xff]  }
  0x6e   :  { %v2690_v12 = vcombine.low %v103_v8, %v103_v8  ;;  %2692 = vmatprep.subr.msk.bf16.mxu0 %vm128_vm0, %v2685_v3  ;;  %v130_v13 = vsel %vm128_vm0, %v2684_v4, 0  ;;  %2694 = vmatprep.subr.msk.bf16.mxu1 %vm128_vm0, %v2687_v5  ;;  %v3004_v21 = vld [vmem:[#allocation7 + $0x8] ss:$16 sps:$4 sm:$0xff]   ;;  %v3009_v22 = vld [vmem:[#allocation7 + $0x24] ss:$16 sps:$4 sm:$0xff]   ;;  %vm319_vm2 = vcmask 1041408  }
  0x6f   :  { %v136_v14 = vsel %vm128_vm0, %v2686_v6, 0  ;;  %154 = vmatpush1.bf16.msra.mxu0 %v130_v13  ;;  %v142_v16 = vsel %vm128_vm0, %v2688_v10, 0  ;;  %v3012_v23 = vld [vmem:[#allocation7 + $0x2c] ss:$16 sps:$4 sm:$0xff]   ;;  %v3007_v24 = vld [vmem:[#allocation7 + $0x20] ss:$16 sps:$4 sm:$0xff]  }
  0x70   :  { %195 = vmatpush1.bf16.msra.mxu1 %v136_v14  ;;  %2696 = vmatprep.subr.msk.bf16.mxu0 %vm128_vm0, %v2689_v9  ;;  %v148_v17 = vsel %vm128_vm0, %v2690_v12, 0  ;;  %v3010_v25 = vld [vmem:[#allocation7 + $0x28] ss:$16 sps:$4 sm:$0xff]   ;;  %v3015_v26 = vld [vmem:[#allocation7 + $0x44] ss:$16 sps:$4 sm:$0xff]  }
  0x71   :  { %2698 = vmatprep.subr.msk.bf16.mxu1 %vm128_vm0, %v2691_v11  ;;  %v3018_v27 = vld [vmem:[#allocation7 + $0x4c] ss:$16 sps:$4 sm:$0xff]   ;;  %v3013_v28 = vld [vmem:[#allocation7 + $0x40] ss:$16 sps:$4 sm:$0xff]   ;;  %v3016_v29 = vld [vmem:[#allocation7 + $0x48] ss:$16 sps:$4 sm:$0xff]  }
  0x72   :  { %2693 = vmatmul.mubr.msk.bf16.vlgmr.msra.gmra.mrb[0].mxu0 %vm124_vm1, %v99_v15  ;;  %v3021_v30 = vld [vmem:[#allocation7 + $0x64] ss:$16 sps:$4 sm:$0xff]   ;;  %v3024_v31 = vld [vmem:[#allocation7 + $0x6c] ss:$16 sps:$4 sm:$0xff]   ;;  %v3019_v32 = vld [vmem:[#allocation7 + $0x60] ss:$16 sps:$4 sm:$0xff]  }
  0x73   :  { %2695 = vmatmul.mubr.msk.bf16.vlgmr.msra.gmra.mrb[0].mxu1 %vm124_vm1, %v99_v15  ;;  %236 = vmatpush1.bf16.msra.mxu0 %v142_v16  ;;  %v3022_v33 = vld [vmem:[#allocation7 + $0x68] ss:$16 sps:$4 sm:$0xff]   ;;  %v3027_v34 = vld [vmem:[#allocation7 + $0x84] ss:$16 sps:$4 sm:$0xff]   ;;  %v3030_v35 = vld [vmem:[#allocation7 + $0x8c] ss:$16 sps:$4 sm:$0xff]  }
  0x74   :  { %267 = vmatprep.mubr.bf16.mxu0 %v3559_v0  ;;  %277 = vmatpush1.bf16.msra.mxu1 %v148_v17  ;;  %v3025_v36 = vld [vmem:[#allocation7 + $0x80] ss:$16 sps:$4 sm:$0xff]   ;;  %v3028_v37 = vld [vmem:[#allocation7 + $0x88] ss:$16 sps:$4 sm:$0xff]   ;;  %v3033_v38 = vld [vmem:[#allocation7 + $0xa4] ss:$16 sps:$4 sm:$0xff]  }
  0x75   :  { %308 = vmatprep.mubr.bf16.mxu1 %v3559_v0  ;;  %2162 = vmatprep.subr.bf16.mxu0 %v3003_v18  ;;  %v3036_v39 = vld [vmem:[#allocation7 + $0xac] ss:$16 sps:$4 sm:$0xff]   ;;  %v3031_v40 = vld [vmem:[#allocation7 + $0xa0] ss:$16 sps:$4 sm:$0xff]   ;;  %v3034_v41 = vld [vmem:[#allocation7 + $0xa8] ss:$16 sps:$4 sm:$0xff]  }
  0x76   :  { %2326 = vmatprep.subr.bf16.mxu1 %v3006_v19  ;;  %v3039_v42 = vld [vmem:[#allocation7 + $0xc4] ss:$16 sps:$4 sm:$0xff]   ;;  %v3042_v43 = vld [vmem:[#allocation7 + $0xcc] ss:$16 sps:$4 sm:$0xff]   ;;  %v3037_v44 = vld [vmem:[#allocation7 + $0xc0] ss:$16 sps:$4 sm:$0xff]  }
  0x77   :  { %v3040_v45 = vld [vmem:[#allocation7 + $0xc8] ss:$16 sps:$4 sm:$0xff]   ;;  %v3045_v46 = vld [vmem:[#allocation7 + $0xe4] ss:$16 sps:$4 sm:$0xff]   ;;  %v3048_v47 = vld [vmem:[#allocation7 + $0xec] ss:$16 sps:$4 sm:$0xff]  }
  0x78   :  { %v3043_v48 = vld [vmem:[#allocation7 + $0xe0] ss:$16 sps:$4 sm:$0xff]   ;;  %v3046_v49 = vld [vmem:[#allocation7 + $0xe8] ss:$16 sps:$4 sm:$0xff]   ;;  %v3051_v50 = vld [vmem:[#allocation7 + $0x104] ss:$16 sps:$4 sm:$0xff]  }
  0x79   :  { %v3054_v51 = vld [vmem:[#allocation7 + $0x10c] ss:$16 sps:$4 sm:$0xff]   ;;  %v3049_v52 = vld [vmem:[#allocation7 + $0x100] ss:$16 sps:$4 sm:$0xff]   ;;  %v3052_v53 = vld [vmem:[#allocation7 + $0x108] ss:$16 sps:$4 sm:$0xff]  }
  0x7a   :  { %2697 = vmatmul.mubr.msk.bf16.vlgmr.msra.gmra.mrb[4].mxu0 %vm124_vm1, %v99_v15  ;;  %v3057_v54 = vld [vmem:[#allocation7 + $0x124] ss:$16 sps:$4 sm:$0xff]   ;;  %v3060_v55 = vld [vmem:[#allocation7 + $0x12c] ss:$16 sps:$4 sm:$0xff]   ;;  %v3055_v56 = vld [vmem:[#allocation7 + $0x120] ss:$16 sps:$4 sm:$0xff]  }
  0x7b   :  { %2699 = vmatmul.mubr.msk.bf16.vlgmr.msra.gmra.mrb[4].mxu1 %vm124_vm1, %v99_v15  ;;  %2163 = vmatpush1.bf16.msra.mxu0 %v3001_v20  ;;  %v3058_v57 = vld [vmem:[#allocation7 + $0x128] ss:$16 sps:$4 sm:$0xff]   ;;  %v3063_v58 = vld [vmem:[#allocation7 + $0x144] ss:$16 sps:$4 sm:$0xff]   ;;  %v3066_v59 = vld [vmem:[#allocation7 + $0x14c] ss:$16 sps:$4 sm:$0xff]  }
  0x7c   :  { %2327 = vmatpush1.bf16.msra.mxu1 %v3004_v21  ;;  %2164 = vmatprep.subr.bf16.mxu0 %v3009_v22  ;;  %v3061_v60 = vld [vmem:[#allocation7 + $0x140] ss:$16 sps:$4 sm:$0xff]   ;;  %v3064_v61 = vld [vmem:[#allocation7 + $0x148] ss:$16 sps:$4 sm:$0xff]   ;;  %v3069_v62 = vld [vmem:[#allocation7 + $0x164] ss:$16 sps:$4 sm:$0xff]  }
  0x7d   :  { %2328 = vmatprep.subr.bf16.mxu1 %v3012_v23  ;;  %v3072_v63 = vld [vmem:[#allocation7 + $0x16c] ss:$16 sps:$4 sm:$0xff]   ;;  %v3067_v0 = vld [vmem:[#allocation7 + $0x160] ss:$16 sps:$4 sm:$0xff]   ;;  %v3070_v1 = vld [vmem:[#allocation7 + $0x168] ss:$16 sps:$4 sm:$0xff]  }
  0x7e   :  { %v3075_v2 = vld [vmem:[#allocation7 + $0x184] ss:$16 sps:$4 sm:$0xff]   ;;  %v3078_v3 = vld [vmem:[#allocation7 + $0x18c] ss:$16 sps:$4 sm:$0xff]   ;;  %v3073_v4 = vld [vmem:[#allocation7 + $0x180] ss:$16 sps:$4 sm:$0xff]  }
  0x7f   :  { %2165 = vmatpush1.bf16.msra.mxu0 %v3007_v24  ;;  %v3076_v5 = vld [vmem:[#allocation7 + $0x188] ss:$16 sps:$4 sm:$0xff]   ;;  %v3081_v6 = vld [vmem:[#allocation7 + $0x1a4] ss:$16 sps:$4 sm:$0xff]   ;;  %v3084_v7 = vld [vmem:[#allocation7 + $0x1ac] ss:$16 sps:$4 sm:$0xff]  }
  0x80   :  { %2329 = vmatpush1.bf16.msra.mxu1 %v3010_v25  ;;  %2166 = vmatprep.subr.bf16.mxu0 %v3015_v26  ;;  %v3079_v8 = vld [vmem:[#allocation7 + $0x1a0] ss:$16 sps:$4 sm:$0xff]   ;;  %v3082_v9 = vld [vmem:[#allocation7 + $0x1a8] ss:$16 sps:$4 sm:$0xff]   ;;  %v3087_v10 = vld [vmem:[#allocation7 + $0x1c4] ss:$16 sps:$4 sm:$0xff]  }
  0x81   :  { %2330 = vmatprep.subr.bf16.mxu1 %v3018_v27  ;;  %v3090_v11 = vld [vmem:[#allocation7 + $0x1cc] ss:$16 sps:$4 sm:$0xff]   ;;  %v3085_v12 = vld [vmem:[#allocation7 + $0x1c0] ss:$16 sps:$4 sm:$0xff]   ;;  %v3088_v13 = vld [vmem:[#allocation7 + $0x1c8] ss:$16 sps:$4 sm:$0xff]  }
  0x82   :  { %v3093_v14 = vld [vmem:[#allocation7 + $0x1e4] ss:$16 sps:$4 sm:$0xff]   ;;  %v3096_v15 = vld [vmem:[#allocation7 + $0x1ec] ss:$16 sps:$4 sm:$0xff]   ;;  %v3091_v16 = vld [vmem:[#allocation7 + $0x1e0] ss:$16 sps:$4 sm:$0xff]  }
  0x83   :  { %2167 = vmatpush1.bf16.msra.mxu0 %v3013_v28  ;;  %v3094_v17 = vld [vmem:[#allocation7 + $0x1e8] ss:$16 sps:$4 sm:$0xff]   ;;  %v3099_v18 = vld [vmem:[#allocation7 + $0x204] ss:$16 sps:$4 sm:$0xff]   ;;  %v3102_v19 = vld [vmem:[#allocation7 + $0x20c] ss:$16 sps:$4 sm:$0xff]  }
  0x84   :  { %2331 = vmatpush1.bf16.msra.mxu1 %v3016_v29  ;;  %2168 = vmatprep.subr.bf16.mxu0 %v3021_v30 }
  0x85   :  { %2332 = vmatprep.subr.bf16.mxu1 %v3024_v31 }
  0x87   :  { %2169 = vmatpush1.bf16.msra.mxu0 %v3019_v32 }
  0x88   :  { %2333 = vmatpush1.bf16.msra.mxu1 %v3022_v33  ;;  %2170 = vmatprep.subr.bf16.mxu0 %v3027_v34 }
  0x89   :  { %2334 = vmatprep.subr.bf16.mxu1 %v3030_v35 }
  0x8b   :  { %2171 = vmatpush1.bf16.msra.mxu0 %v3025_v36 }
  0x8c   :  { %2335 = vmatpush1.bf16.msra.mxu1 %v3028_v37  ;;  %2172 = vmatprep.subr.bf16.mxu0 %v3033_v38 }
  0x8d   :  { %2336 = vmatprep.subr.bf16.mxu1 %v3036_v39 }
  0x8f   :  { %2173 = vmatpush1.bf16.msra.mxu0 %v3031_v40 }
  0x90   :  { %2337 = vmatpush1.bf16.msra.mxu1 %v3034_v41  ;;  %2174 = vmatprep.subr.bf16.mxu0 %v3039_v42 }
  0x91   :  { %2338 = vmatprep.subr.bf16.mxu1 %v3042_v43 }
  0x93   :  { %2175 = vmatpush1.bf16.msra.mxu0 %v3037_v44 }
  0x94   :  { %2339 = vmatpush1.bf16.msra.mxu1 %v3040_v45  ;;  %2176 = vmatprep.subr.bf16.mxu0 %v3045_v46 }
  0x95   :  { %2340 = vmatprep.subr.bf16.mxu1 %v3048_v47 }
  0x97   :  { %2177 = vmatpush1.bf16.msra.mxu0 %v3043_v48 }
  0x98   :  { %2341 = vmatpush1.bf16.msra.mxu1 %v3046_v49  ;;  %2178 = vmatprep.subr.bf16.mxu0 %v3051_v50 }
  0x99   :  { %2342 = vmatprep.subr.bf16.mxu1 %v3054_v51 }
  0x9b   :  { %2179 = vmatpush1.bf16.msra.mxu0 %v3049_v52 }
  0x9c   :  { %2343 = vmatpush1.bf16.msra.mxu1 %v3052_v53  ;;  %2180 = vmatprep.subr.bf16.mxu0 %v3057_v54 }
  0x9d   :  { %2344 = vmatprep.subr.bf16.mxu1 %v3060_v55 }
  0x9f   :  { %2181 = vmatpush1.bf16.msra.mxu0 %v3055_v56 }
  0xa0   :  { %2345 = vmatpush1.bf16.msra.mxu1 %v3058_v57  ;;  %2182 = vmatprep.subr.bf16.mxu0 %v3063_v58 }
  0xa1   :  { %2346 = vmatprep.subr.bf16.mxu1 %v3066_v59 }
  0xa3   :  { %2183 = vmatpush1.bf16.msra.mxu0 %v3061_v60 }
  0xa4   :  { %2347 = vmatpush1.bf16.msra.mxu1 %v3064_v61  ;;  %2184 = vmatprep.subr.bf16.mxu0 %v3069_v62 }
  0xa5   :  { %2348 = vmatprep.subr.bf16.mxu1 %v3072_v63 }
  0xa7   :  { %2185 = vmatpush1.bf16.msra.mxu0 %v3067_v0 }
  0xa8   :  { %2349 = vmatpush1.bf16.msra.mxu1 %v3070_v1  ;;  %2186 = vmatprep.subr.bf16.mxu0 %v3075_v2 }
  0xa9   :  { %2350 = vmatprep.subr.bf16.mxu1 %v3078_v3 }
  0xab   :  { %2187 = vmatpush1.bf16.msra.mxu0 %v3073_v4 }
  0xac   :  { %2351 = vmatpush1.bf16.msra.mxu1 %v3076_v5  ;;  %2188 = vmatprep.subr.bf16.mxu0 %v3081_v6 }
  0xad   :  { %2352 = vmatprep.subr.bf16.mxu1 %v3084_v7 }
  0xaf   :  { %2189 = vmatpush1.bf16.msra.mxu0 %v3079_v8 }
  0xb0   :  { %2353 = vmatpush1.bf16.msra.mxu1 %v3082_v9  ;;  %2190 = vmatprep.subr.bf16.mxu0 %v3087_v10 }
  0xb1   :  { %2354 = vmatprep.subr.bf16.mxu1 %v3090_v11 }
  0xb3   :  { %2191 = vmatpush1.bf16.msra.mxu0 %v3085_v12 }
  0xb4   :  { %2355 = vmatpush1.bf16.msra.mxu1 %v3088_v13  ;;  %2192 = vmatprep.subr.bf16.mxu0 %v3093_v14 }
  0xb5   :  { %2356 = vmatprep.subr.bf16.mxu1 %v3096_v15 }
  0xb7   :  { %2193 = vmatpush1.bf16.msra.mxu0 %v3091_v16 }
  0xb8   :  { %2357 = vmatpush1.bf16.msra.mxu1 %v3094_v17  ;;  %2203 = vmatprep.subr.bf16.mxu0 %v3099_v18 }
  0xb9   :  { %2367 = vmatprep.subr.bf16.mxu1 %v3102_v19 }
 0x145   :  { %v3695_v20 = vpop.f32.mrb[0].mxu0 }
 0x146   :  { %v3697_v21 = vpop.f32.mrb[0].mxu1  ;;  %v320_v22 = vsel %vm319_vm2, %v3695_v20, 0.0  ;;  %v384_v23 = vmul.f32 %v3695_v20, %v3695_v20  ;;  %v3703_v24 = vpop.f32.mrb[1].mxu0 }
 0x147   :  { %v3705_v25 = vpop.f32.mrb[1].mxu1  ;;  %v321_v26 = vrot.slane %v320_v22, 4  ;;  %v327_v27 = vsel %vm319_vm2, %v3703_v24, 0.0  ;;  %v385_v28 = vmul.f32 %v3703_v24, %v3703_v24  ;;  %v191_v29 = vpop.f32.mrb[2].mxu0 }
 0x148   :  { %v232_v30 = vpop.f32.mrb[2].mxu1  ;;  %v392_v31 = vsel %vm319_vm2, %v384_v23, 0.0  ;;  %v328_v32 = vrot.slane %v327_v27, 4  ;;  %v192_v33 = vpop.f32.mrb[3].mxu0  ;;  %v341_v34 = vsel %vm319_vm2, %v3705_v25, 0.0  ;;  %v387_v44 = vmul.f32 %v3705_v25, %v3705_v25 }
 0x149   :  { %v233_v35 = vpop.f32.mrb[3].mxu1  ;;  %v322_v36 = vadd.f32 %v321_v26, %v320_v22  ;;  %v393_v37 = vrot.slane %v392_v31, 4  ;;  %v399_v38 = vsel %vm319_vm2, %v385_v28, 0.0  ;;  %v342_v41 = vrot.slane %v341_v34, 4 }
 0x14a   :  { %v329_v39 = vadd.f32 %v328_v32, %v327_v27  ;;  %v400_v40 = vrot.slane %v399_v38, 4  ;;  %v413_v50 = vsel %vm319_vm2, %v387_v44, 0.0  ;;  %v513_v26 = vlaneseq }
 0x14b   :  { %v323_v42 = vrot.slane %v322_v36, 2  ;;  %v394_v43 = vadd.f32 %v393_v37, %v392_v31  ;;  %v343_v47 = vadd.f32 %v342_v41, %v341_v34  ;;  %v414_v58 = vrot.slane %v413_v50, 4 }
 0x14c   :  { %v330_v45 = vrot.slane %v329_v39, 2  ;;  %v401_v46 = vadd.f32 %v400_v40, %v399_v38  ;;  %v3722_v33 = vshrl.u32 %v513_v26, 7  ;;  %v3729_v38 = vld [vmem:[#allocation4] sm:$0xff] }
 0x14d   :  { %v324_v48 = vadd.f32 %v323_v42, %v322_v36  ;;  %v395_v49 = vrot.slane %v394_v43, 2  ;;  %v3718_v51 = vpop.f32.mrb[4].mxu0  ;;  %v344_v54 = vrot.slane %v343_v47, 2  ;;  %v415_v2 = vadd.f32 %v414_v58, %v413_v50  ;;  %v3736_v42 = vld [vmem:[#allocation6] sm:$0xff] }
 0x14e   :  { %v331_v52 = vadd.f32 %v330_v45, %v329_v39  ;;  %v402_v53 = vrot.slane %v401_v46, 2  ;;  %v3720_v55 = vpop.f32.mrb[5].mxu0  ;;  %v3724_v36 = vpop.f32.mrb[4].mxu1  ;;  %v3727_v37 = vsub.s32 0, %v3722_v33  ;;  %v3732_v40 = vsub.s32 1, %v3722_v33 }
 0x14f   :  { %v325_v56 = vrot.slane %v324_v48, 1  ;;  %v396_v57 = vadd.f32 %v395_v49, %v394_v43  ;;  %v273_v59 = vpop.f32.mrb[6].mxu0  ;;  %v345_v62 = vadd.f32 %v344_v54, %v343_v47  ;;  %v416_v8 = vrot.slane %v415_v2, 2  ;;  %v3734_v41 = vpop.f32.mrb[5].mxu1 }
 0x150   :  { %v332_v60 = vrot.slane %v331_v52, 1  ;;  %v403_v61 = vadd.f32 %v402_v53, %v401_v46  ;;  %v274_v63 = vpop.f32.mrb[7].mxu0  ;;  %v314_v43 = vpop.f32.mrb[6].mxu1  ;;  %v516_v45 = vrot.slane %v3729_v38, %v3727_v37  ;;  %v334_v46 = vsel %vm319_vm2, %v3697_v21, 0.0 }
 0x151   :  { %v326_v0 = vadd.f32 %v325_v56, %v324_v48  ;;  %v397_v1 = vrot.slane %v396_v57, 1  ;;  %v346_v5 = vrot.slane %v345_v62, 1  ;;  %v417_v18 = vadd.f32 %v416_v8, %v415_v2  ;;  %v315_v53 = vpop.f32.mrb[7].mxu1 }
 0x152   :  { %v333_v3 = vadd.f32 %v332_v60, %v331_v52  ;;  %v404_v4 = vrot.slane %v403_v61, 1  ;;  %v386_v47 = vmul.f32 %v3697_v21, %v3697_v21  ;;  %v520_v50 = vrot.slane %v3729_v38, %v3732_v40 }
 0x153   :  { %v376_v6 = vmul.f32 0.5, %v326_v0  ;;  %v398_v7 = vadd.f32 %v397_v1, %v396_v57  ;;  %v347_v11 = vadd.f32 %v346_v5, %v345_v62  ;;  %v418_v23 = vrot.slane %v417_v18, 1 }
 0x154   :  { %v377_v9 = vmul.f32 0.5, %v333_v3  ;;  %v405_v10 = vadd.f32 %v404_v4, %v403_v61  ;;  %v355_v52 = vsel %vm319_vm2, %v3720_v55, 0.0  ;;  %v565_v57 = vrot.slane %v3736_v42, %v3727_v37 }
 0x155   :  { %v448_v12 = vmul.f32 0.5, %v398_v7  ;;  %v456_v13 = vmul.f32 %v376_v6, %v376_v6  ;;  %v379_v17 = vmul.f32 0.5, %v347_v11  ;;  %v419_v29 = vadd.f32 %v418_v23, %v417_v18  ;;  %v3108_v23 = vld [vmem:[#allocation7 + $0x22c] ss:$16 sps:$4 sm:$0xff]  }
 0x156   :  { %v449_v14 = vmul.f32 0.5, %v405_v10  ;;  %v457_v15 = vmul.f32 %v377_v9, %v377_v9  ;;  %v480_v44 = vsub.f32 %v3695_v20, %v376_v6  ;;  %v481_v49 = vsub.f32 %v3703_v24, %v377_v9 }
 0x157   :  { %v464_v16 = vsub.f32 %v448_v12, %v456_v13  ;;  %v459_v30 = vmul.f32 %v379_v17, %v379_v17  ;;  %v451_v32 = vmul.f32 0.5, %v419_v29  ;;  %v389_v20 = vmul.f32 %v3720_v55, %v3720_v55 }
 0x158   :  { %v465_v19 = vsub.f32 %v449_v14, %v457_v15  ;;  %v335_v59 = vrot.slane %v334_v46, 4  ;;  %v569_v24 = vrot.slane %v3736_v42, %v3732_v40  ;;  %v406_v61 = vsel %vm319_vm2, %v386_v47, 0.0 }
 0x159   :  { %v472_v22 = vmax.f32 %v464_v16, 0.0  ;;  %v467_v34 = vsub.f32 %v451_v32, %v459_v30  ;;  %v3758_v62 = vsub.s32 3, %v3722_v33  ;;  %v356_v63 = vrot.slane %v355_v52, 4  ;;  %v3103_v32 = vld [vmem:[#allocation7 + $0x220] ss:$16 sps:$4 sm:$0xff]  }
 0x15a   :  { %v473_v27 = vmax.f32 %v465_v19, 0.0  ;;  %v427_v1 = vsel %vm319_vm2, %v389_v20, 0.0  ;;  %v483_v2 = vsub.f32 %v3705_v25, %v379_v17  ;;  %v336_v4 = vadd.f32 %v335_v59, %v334_v46  ;;  %v3097_v25 = vld [vmem:[#allocation7 + $0x200] ss:$16 sps:$4 sm:$0xff]   ;;  %v3100_v17 = vld [vmem:[#allocation7 + $0x208] ss:$16 sps:$4 sm:$0xff]  }
 0x15b   :  { %v488_v28 = vadd.f32 1e-05, %v472_v22  ;;  %v475_v35 = vmax.f32 %v467_v34, 0.0  ;;  %v407_v5 = vrot.slane %v406_v61, 4  ;;  %v528_v8 = vrot.slane %v3729_v38, %v3758_v62  ;;  %v3105_v22 = vld [vmem:[#allocation7 + $0x224] ss:$16 sps:$4 sm:$0xff]  }
 0x15c   :  { %v489_v31 = vadd.f32 1e-05, %v473_v27  ;;  %v357_v9 = vadd.f32 %v356_v63, %v355_v52  ;;  %v428_v10 = vrot.slane %v427_v1, 4  ;;  %v577_v14 = vrot.slane %v3736_v42, %v3758_v62  ;;  %v3106_v34 = vld [vmem:[#allocation7 + $0x228] ss:$16 sps:$4 sm:$0xff]  }
 0x15d   :  { %3385 = vrsqrt.f32 %v488_v28  ;;  %v491_v39 = vadd.f32 1e-05, %v475_v35  ;;  %v337_v15 = vrot.slane %v336_v4, 2  ;;  %v408_v16 = vadd.f32 %v407_v5, %v406_v61  ;;  %v3111_v35 = vld [vmem:[#allocation7 + $0x244] ss:$16 sps:$4 sm:$0xff]  }
 0x15e   :  { %3387 = vrsqrt.f32 %v489_v31  ;;  %v358_v27 = vrot.slane %v357_v9, 2  ;;  %v429_v28 = vadd.f32 %v428_v10, %v427_v1  ;;  %v3117_v52 = vld [vmem:[#allocation7 + $0x264] ss:$16 sps:$4 sm:$0xff]   ;;  %v3120_v20 = vld [vmem:[#allocation7 + $0x26c] ss:$16 sps:$4 sm:$0xff]  }
 0x15f   :  { %3389 = vrsqrt.f32 %v491_v39  ;;  %v338_v30 = vadd.f32 %v337_v15, %v336_v4  ;;  %v409_v31 = vrot.slane %v408_v16, 2  ;;  %v3114_v39 = vld [vmem:[#allocation7 + $0x24c] ss:$16 sps:$4 sm:$0xff]   ;;  %v3118_v59 = vld [vmem:[#allocation7 + $0x268] ss:$16 sps:$4 sm:$0xff]  }
 0x160   :  { %v3129_v4 = vld [vmem:[#allocation7 + $0x2a4] ss:$16 sps:$4 sm:$0xff]   ;;  %v3132_v5 = vld [vmem:[#allocation7 + $0x2ac] ss:$16 sps:$4 sm:$0xff]   ;;  %v3127_v10 = vld [vmem:[#allocation7 + $0x2a0] ss:$16 sps:$4 sm:$0xff]  }
 0x161   :  { %v339_v47 = vrot.slane %v338_v30, 1 }
 0x167   :  { %v3386_v48 = vpop.eup %3385 }
 0x168   :  { %v3388_v54 = vpop.eup %3387  ;;  %v504_v56 = vmul.f32 %v3386_v48, %v480_v44  ;;  %v359_v44 = vadd.f32 %v358_v27, %v357_v9  ;;  %v410_v48 = vadd.f32 %v409_v31, %v408_v16  ;;  %v3142_v27 = vld [vmem:[#allocation7 + $0x2e8] ss:$16 sps:$4 sm:$0xff]  }
 0x169   :  { %v505_v58 = vmul.f32 %v3388_v54, %v481_v49  ;;  %v3390_v11 = vpop.eup %3389  ;;  %v3109_v49 = vld [vmem:[#allocation7 + $0x240] ss:$16 sps:$4 sm:$0xff]  }
 0x16a   :  { %v553_v60 = vmul.f32 %v516_v45, %v504_v56  ;;  %v507_v13 = vmul.f32 %v3390_v11, %v483_v2  ;;  %v430_v45 = vrot.slane %v429_v28, 2  ;;  %v360_v53 = vrot.slane %v359_v44, 1  ;;  %v3121_v2 = vld [vmem:[#allocation7 + $0x280] ss:$16 sps:$4 sm:$0xff]   ;;  %v3130_v11 = vld [vmem:[#allocation7 + $0x2a8] ss:$16 sps:$4 sm:$0xff]  }
 0x16b   :  { %v554_v0 = vmul.f32 %v520_v50, %v505_v58  ;;  %v3112_v50 = vld [vmem:[#allocation7 + $0x248] ss:$16 sps:$4 sm:$0xff]   ;;  %v340_v56 = vadd.f32 %v339_v47, %v338_v30  ;;  %v3115_v58 = vld [vmem:[#allocation7 + $0x260] ss:$16 sps:$4 sm:$0xff]   ;;  %v3162_v47 = vld [vmem:[#allocation7 + $0x34c] ss:$16 sps:$4 sm:$0xff]  }
 0x16c   :  { %v602_v3 = vadd.f32 %v565_v57, %v553_v60  ;;  %v556_v26 = vmul.f32 %v528_v8, %v507_v13  ;;  %v431_v54 = vadd.f32 %v430_v45, %v429_v28  ;;  %v411_v57 = vrot.slane %v410_v48, 1  ;;  %v3126_v60 = vld [vmem:[#allocation7 + $0x28c] ss:$16 sps:$4 sm:$0xff]   ;;  %v3147_v28 = vld [vmem:[#allocation7 + $0x304] ss:$16 sps:$4 sm:$0xff]  }
 0x16d   :  { %v603_v6 = vadd.f32 %v569_v24, %v554_v0  ;;  %v3123_v24 = vld [vmem:[#allocation7 + $0x284] ss:$16 sps:$4 sm:$0xff]   ;;  %v361_v61 = vadd.f32 %v360_v53, %v359_v44  ;;  %v3766_v0 = vmul.f32 0.5, %v340_v56  ;;  %v3138_v13 = vld [vmem:[#allocation7 + $0x2cc] ss:$16 sps:$4 sm:$0xff]   ;;  %v3777_v56 = vsub.s32 2, %v3722_v33 }
 0x16e   :  { %v610_v7 = vmax.f32 %v602_v3, 0.0  ;;  %v605_v29 = vadd.f32 %v577_v14, %v556_v26  ;;  %v432_v63 = vrot.slane %v431_v54, 1  ;;  %v412_v1 = vadd.f32 %v411_v57, %v410_v48  ;;  %v3124_v3 = vld [vmem:[#allocation7 + $0x288] ss:$16 sps:$4 sm:$0xff]   ;;  %v3139_v26 = vld [vmem:[#allocation7 + $0x2e0] ss:$16 sps:$4 sm:$0xff]  }
 0x16f   :  { %v611_v12 = vmax.f32 %v603_v6, 0.0  ;;  %v3768_v6 = vmul.f32 0.5, %v361_v61  ;;  %v458_v9 = vmul.f32 %v3766_v0, %v3766_v0  ;;  %v3151_v44 = vld [vmem:[#allocation7 + $0x320] ss:$16 sps:$4 sm:$0xff]   ;;  %v3154_v45 = vld [vmem:[#allocation7 + $0x328] ss:$16 sps:$4 sm:$0xff]  }
 0x170   :  { %v618_v19 = vpack.c.bf16 %v610_v7, %v610_v7  ;;  %v613_v43 = vmax.f32 %v605_v29, 0.0  ;;  %v433_v7 = vadd.f32 %v432_v63, %v431_v54  ;;  %v450_v8 = vmul.f32 0.5, %v412_v1  ;;  %v3150_v29 = vld [vmem:[#allocation7 + $0x30c] ss:$16 sps:$4 sm:$0xff]   ;;  %v3157_v48 = vld [vmem:[#allocation7 + $0x340] ss:$16 sps:$4 sm:$0xff]  }
 0x171   :  { %v619_v18 = vpack.c.bf16 %v611_v12, %v611_v12  ;;  %v3135_v12 = vld [vmem:[#allocation7 + $0x2c4] ss:$16 sps:$4 sm:$0xff]   ;;  %v461_v15 = vmul.f32 %v3768_v6, %v3768_v6  ;;  %v3166_v53 = vld [vmem:[#allocation7 + $0x368] ss:$16 sps:$4 sm:$0xff]   ;;  %v482_v54 = vsub.f32 %v3697_v21, %v3766_v0  ;;  %v3169_v63 = vld [vmem:[#allocation7 + $0x380] ss:$16 sps:$4 sm:$0xff]   ;;  %v524_v21 = vrot.slane %v3729_v38, %v3777_v56 }
 0x172   :  { %v621_v46 = vpack.c.bf16 %v613_v43, %v613_v43  ;;  %v453_v14 = vmul.f32 0.5, %v433_v7  ;;  %v466_v16 = vsub.f32 %v450_v8, %v458_v9  ;;  %v3171_v57 = vld [vmem:[#allocation7 + $0x384] ss:$16 sps:$4 sm:$0xff]   ;;  %v3172_v1 = vld [vmem:[#allocation7 + $0x388] ss:$16 sps:$4 sm:$0xff]   ;;  %v348_v8 = vsel %vm319_vm2, %v3718_v51, 0.0 }
 0x173   :  { %2194 = vmatprep.mubr.bf16.mxu0 %v619_v18  ;;  %2358 = vmatprep.mubr.bf16.mxu1 %v619_v18  ;;  %v3133_v18 = vld [vmem:[#allocation7 + $0x2c0] ss:$16 sps:$4 sm:$0xff]   ;;  %v3177_v0 = vld [vmem:[#allocation7 + $0x3a4] ss:$16 sps:$4 sm:$0xff]   ;;  %v388_v9 = vmul.f32 %v3718_v51, %v3718_v51 }
 0x174   :  { %2195 = vmatmul.mubr.bf16.vlgmr.msra.gmra.mrb[8].mxu0 %v618_v19  ;;  %2359 = vmatmul.mubr.bf16.vlgmr.msra.gmra.mrb[8].mxu1 %v618_v19  ;;  %v3144_v19 = vld [vmem:[#allocation7 + $0x2ec] ss:$16 sps:$4 sm:$0xff]  }
 0x175   :  { %2204 = vmatpush1.bf16.msra.mxu0 %v3097_v25  ;;  %2368 = vmatpush1.bf16.msra.mxu1 %v3100_v17  ;;  %v3136_v25 = vld [vmem:[#allocation7 + $0x2c8] ss:$16 sps:$4 sm:$0xff]   ;;  %v3141_v17 = vld [vmem:[#allocation7 + $0x2e4] ss:$16 sps:$4 sm:$0xff]  }
 0x176   :  { %2205 = vmatprep.subr.bf16.mxu0 %v3105_v22  ;;  %2369 = vmatprep.subr.bf16.mxu1 %v3108_v23  ;;  %v469_v22 = vsub.f32 %v453_v14, %v461_v15  ;;  %v474_v23 = vmax.f32 %v466_v16, 0.0  ;;  %v369_v15 = vsel %vm319_vm2, %v3734_v41, 0.0  ;;  %v391_v16 = vmul.f32 %v3734_v41, %v3734_v41 }
 0x177   :  { %2235 = vmatprep.mubr.bf16.mxu0 %v621_v46  ;;  %2399 = vmatprep.mubr.bf16.mxu1 %v621_v46  ;;  %v3159_v46 = vld [vmem:[#allocation7 + $0x344] ss:$16 sps:$4 sm:$0xff]  }
 0x178   :  { %v477_v30 = vmax.f32 %v469_v22, 0.0  ;;  %v490_v31 = vadd.f32 1e-05, %v474_v23  ;;  %v3189_v22 = vld [vmem:[#allocation7 + $0x3e4] ss:$16 sps:$4 sm:$0xff]  }
 0x179   :  { %2206 = vmatpush1.bf16.msra.mxu0 %v3103_v32  ;;  %2370 = vmatpush1.bf16.msra.mxu1 %v3106_v34  ;;  %v3145_v32 = vld [vmem:[#allocation7 + $0x300] ss:$16 sps:$4 sm:$0xff]   ;;  %v3148_v34 = vld [vmem:[#allocation7 + $0x308] ss:$16 sps:$4 sm:$0xff]   ;;  %v3192_v23 = vld [vmem:[#allocation7 + $0x3ec] ss:$16 sps:$4 sm:$0xff]  }
 0x17a   :  { %2207 = vmatprep.subr.bf16.mxu0 %v3111_v35  ;;  %2371 = vmatprep.subr.bf16.mxu1 %v3114_v39  ;;  %v3153_v35 = vld [vmem:[#allocation7 + $0x324] ss:$16 sps:$4 sm:$0xff]   ;;  %v3156_v39 = vld [vmem:[#allocation7 + $0x32c] ss:$16 sps:$4 sm:$0xff]   ;;  %v493_v43 = vadd.f32 1e-05, %v477_v30  ;;  %3391 = vrsqrt.f32 %v490_v31 }
 0x17c   :  { %3393 = vrsqrt.f32 %v493_v43  ;;  %v3198_v43 = vld [vmem:[#allocation7 + $0x40c] ss:$16 sps:$4 sm:$0xff]  }
 0x17d   :  { %2208 = vmatpush1.bf16.msra.mxu0 %v3109_v49  ;;  %2372 = vmatpush1.bf16.msra.mxu1 %v3112_v50  ;;  %v3160_v49 = vld [vmem:[#allocation7 + $0x348] ss:$16 sps:$4 sm:$0xff]   ;;  %v3165_v50 = vld [vmem:[#allocation7 + $0x364] ss:$16 sps:$4 sm:$0xff]  }
 0x17e   :  { %2209 = vmatprep.subr.bf16.mxu0 %v3117_v52  ;;  %2373 = vmatprep.subr.bf16.mxu1 %v3120_v20  ;;  %v3168_v52 = vld [vmem:[#allocation7 + $0x36c] ss:$16 sps:$4 sm:$0xff]   ;;  %v3163_v20 = vld [vmem:[#allocation7 + $0x360] ss:$16 sps:$4 sm:$0xff]  }
 0x181   :  { %2210 = vmatpush1.bf16.msra.mxu0 %v3115_v58  ;;  %2374 = vmatpush1.bf16.msra.mxu1 %v3118_v59  ;;  %v3174_v58 = vld [vmem:[#allocation7 + $0x38c] ss:$16 sps:$4 sm:$0xff]  }
 0x182   :  { %2211 = vmatprep.subr.bf16.mxu0 %v3123_v24  ;;  %2375 = vmatprep.subr.bf16.mxu1 %v3126_v60  ;;  %v485_v24 = vsub.f32 %v3720_v55, %v3768_v6  ;;  %v535_v60 = vsub.s32 5, %v3722_v33  ;;  %v3175_v55 = vld [vmem:[#allocation7 + $0x3a0] ss:$16 sps:$4 sm:$0xff]   ;;  %v3178_v6 = vld [vmem:[#allocation7 + $0x3a8] ss:$16 sps:$4 sm:$0xff]  }
 0x184   :  { %v3392_v59 = vpop.eup %3391  ;;  %v585_v14 = vrot.slane %v3736_v42, %v535_v60 }
 0x185   :  { %2212 = vmatpush1.bf16.msra.mxu0 %v3121_v2  ;;  %2376 = vmatpush1.bf16.msra.mxu1 %v3124_v3  ;;  %v506_v2 = vmul.f32 %v3392_v59, %v482_v54  ;;  %v3180_v3 = vld [vmem:[#allocation7 + $0x3ac] ss:$16 sps:$4 sm:$0xff]  }
 0x186   :  { %2213 = vmatprep.subr.bf16.mxu0 %v3129_v4  ;;  %2377 = vmatprep.subr.bf16.mxu1 %v3132_v5  ;;  %v3394_v61 = vpop.eup %3393  ;;  %v536_v5 = vrot.slane %v3729_v38, %v535_v60  ;;  %v3199_v60 = vld [vmem:[#allocation7 + $0x420] ss:$16 sps:$4 sm:$0xff]  }
 0x187   :  { %v509_v4 = vmul.f32 %v3394_v61, %v485_v24  ;;  %v555_v7 = vmul.f32 %v524_v21, %v506_v2  ;;  %v3202_v61 = vld [vmem:[#allocation7 + $0x428] ss:$16 sps:$4 sm:$0xff]  }
 0x189   :  { %2214 = vmatpush1.bf16.msra.mxu0 %v3127_v10  ;;  %2378 = vmatpush1.bf16.msra.mxu1 %v3130_v11  ;;  %v3183_v10 = vld [vmem:[#allocation7 + $0x3c4] ss:$16 sps:$4 sm:$0xff]   ;;  %v3186_v11 = vld [vmem:[#allocation7 + $0x3cc] ss:$16 sps:$4 sm:$0xff]  }
 0x18a   :  { %2215 = vmatprep.subr.bf16.mxu0 %v3135_v12  ;;  %2379 = vmatprep.subr.bf16.mxu1 %v3138_v13  ;;  %v573_v12 = vrot.slane %v3736_v42, %v3777_v56  ;;  %v558_v13 = vmul.f32 %v536_v5, %v509_v4  ;;  %v3205_v4 = vld [vmem:[#allocation7 + $0x440] ss:$16 sps:$4 sm:$0xff]   ;;  %v3208_v5 = vld [vmem:[#allocation7 + $0x448] ss:$16 sps:$4 sm:$0xff]  }
 0x18d   :  { %2216 = vmatpush1.bf16.msra.mxu0 %v3133_v18  ;;  %2380 = vmatpush1.bf16.msra.mxu1 %v3136_v25  ;;  %v349_v18 = vrot.slane %v348_v8, 4  ;;  %v3181_v25 = vld [vmem:[#allocation7 + $0x3c0] ss:$16 sps:$4 sm:$0xff]  }
 0x18e   :  { %2217 = vmatprep.subr.bf16.mxu0 %v3141_v17  ;;  %2381 = vmatprep.subr.bf16.mxu1 %v3144_v19  ;;  %v3184_v17 = vld [vmem:[#allocation7 + $0x3c8] ss:$16 sps:$4 sm:$0xff]   ;;  %v420_v19 = vsel %vm319_vm2, %v388_v9, 0.0 }
 0x18f   :  { %v350_v30 = vadd.f32 %v349_v18, %v348_v8  ;;  %v421_v31 = vrot.slane %v420_v19, 4 }
 0x191   :  { %2218 = vmatpush1.bf16.msra.mxu0 %v3139_v26  ;;  %2382 = vmatpush1.bf16.msra.mxu1 %v3142_v27  ;;  %v604_v26 = vadd.f32 %v573_v12, %v555_v7  ;;  %v370_v27 = vrot.slane %v369_v15, 4  ;;  %v3214_v12 = vld [vmem:[#allocation7 + $0x468] ss:$16 sps:$4 sm:$0xff]  }
 0x192   :  { %2219 = vmatprep.subr.bf16.mxu0 %v3147_v28  ;;  %2383 = vmatprep.subr.bf16.mxu1 %v3150_v29  ;;  %v607_v28 = vadd.f32 %v585_v14, %v558_v13  ;;  %v441_v29 = vsel %vm319_vm2, %v391_v16, 0.0  ;;  %v3219_v13 = vld [vmem:[#allocation7 + $0x484] ss:$16 sps:$4 sm:$0xff]   ;;  %v3222_v14 = vld [vmem:[#allocation7 + $0x48c] ss:$16 sps:$4 sm:$0xff]  }
 0x195   :  { %2220 = vmatpush1.bf16.msra.mxu0 %v3145_v32  ;;  %2384 = vmatpush1.bf16.msra.mxu1 %v3148_v34  ;;  %v3187_v32 = vld [vmem:[#allocation7 + $0x3e0] ss:$16 sps:$4 sm:$0xff]   ;;  %v3190_v34 = vld [vmem:[#allocation7 + $0x3e8] ss:$16 sps:$4 sm:$0xff]  }
 0x196   :  { %2221 = vmatprep.subr.bf16.mxu0 %v3153_v35  ;;  %2385 = vmatprep.subr.bf16.mxu1 %v3156_v39  ;;  %v612_v35 = vmax.f32 %v604_v26, 0.0  ;;  %v3195_v39 = vld [vmem:[#allocation7 + $0x404] ss:$16 sps:$4 sm:$0xff]  }
 0x199   :  { %2222 = vmatpush1.bf16.msra.mxu0 %v3151_v44  ;;  %2386 = vmatpush1.bf16.msra.mxu1 %v3154_v45  ;;  %v371_v44 = vadd.f32 %v370_v27, %v369_v15  ;;  %v442_v45 = vrot.slane %v441_v29, 4 }
 0x19a   :  { %2223 = vmatprep.subr.bf16.mxu0 %v3159_v46  ;;  %2387 = vmatprep.subr.bf16.mxu1 %v3162_v47  ;;  %v615_v46 = vmax.f32 %v607_v28, 0.0  ;;  %v351_v47 = vrot.slane %v350_v30, 2 }
 0x19b   :  { %v372_v54 = vrot.slane %v371_v44, 2 }
 0x19c   :  { %v352_v59 = vadd.f32 %v351_v47, %v350_v30  ;;  %v3223_v30 = vld [vmem:[#allocation7 + $0x4a0] ss:$16 sps:$4 sm:$0xff]   ;;  %v3240_v47 = vld [vmem:[#allocation7 + $0x4ec] ss:$16 sps:$4 sm:$0xff]  }
 0x19d   :  { %2224 = vmatpush1.bf16.msra.mxu0 %v3157_v48  ;;  %2388 = vmatpush1.bf16.msra.mxu1 %v3160_v49  ;;  %v422_v48 = vadd.f32 %v421_v31, %v420_v19  ;;  %v3193_v49 = vld [vmem:[#allocation7 + $0x400] ss:$16 sps:$4 sm:$0xff]   ;;  %v373_v2 = vadd.f32 %v372_v54, %v371_v44  ;;  %v3220_v19 = vld [vmem:[#allocation7 + $0x488] ss:$16 sps:$4 sm:$0xff]  }
 0x19e   :  { %2225 = vmatprep.subr.bf16.mxu0 %v3165_v50  ;;  %2389 = vmatprep.subr.bf16.mxu1 %v3168_v52  ;;  %v3196_v50 = vld [vmem:[#allocation7 + $0x408] ss:$16 sps:$4 sm:$0xff]   ;;  %v620_v52 = vpack.c.bf16 %v612_v35, %v612_v35  ;;  %v3229_v44 = vld [vmem:[#allocation7 + $0x4c0] ss:$16 sps:$4 sm:$0xff]  }
 0x19f   :  { %v423_v24 = vrot.slane %v422_v48, 2  ;;  %v374_v7 = vrot.slane %v373_v2, 1  ;;  %v3226_v31 = vld [vmem:[#allocation7 + $0x4a8] ss:$16 sps:$4 sm:$0xff]  }
 0x1a1   :  { %2226 = vmatpush1.bf16.msra.mxu0 %v3163_v20  ;;  %2390 = vmatpush1.bf16.msra.mxu1 %v3166_v53  ;;  %v3201_v20 = vld [vmem:[#allocation7 + $0x424] ss:$16 sps:$4 sm:$0xff]   ;;  %v3204_v53 = vld [vmem:[#allocation7 + $0x42c] ss:$16 sps:$4 sm:$0xff]   ;;  %v375_v15 = vadd.f32 %v374_v7, %v373_v2 }
 0x1a2   :  { %2227 = vmatprep.subr.bf16.mxu0 %v3171_v57  ;;  %2391 = vmatprep.subr.bf16.mxu1 %v3174_v58  ;;  %v443_v57 = vadd.f32 %v442_v45, %v441_v29  ;;  %v623_v58 = vpack.c.bf16 %v615_v46, %v615_v46  ;;  %v3232_v45 = vld [vmem:[#allocation7 + $0x4c8] ss:$16 sps:$4 sm:$0xff]   ;;  %v3237_v46 = vld [vmem:[#allocation7 + $0x4e4] ss:$16 sps:$4 sm:$0xff]  }
 0x1a3   :  { %v3800_v26 = vmul.f32 0.5, %v375_v15  ;;  %v3255_v2 = vld [vmem:[#allocation7 + $0x544] ss:$16 sps:$4 sm:$0xff]   ;;  %v3265_v15 = vld [vmem:[#allocation7 + $0x580] ss:$16 sps:$4 sm:$0xff]  }
 0x1a4   :  { %v444_v21 = vrot.slane %v443_v57, 2 }
 0x1a5   :  { %2228 = vmatpush1.bf16.msra.mxu0 %v3169_v63  ;;  %2392 = vmatpush1.bf16.msra.mxu1 %v3172_v1  ;;  %v3207_v63 = vld [vmem:[#allocation7 + $0x444] ss:$16 sps:$4 sm:$0xff]   ;;  %v3210_v1 = vld [vmem:[#allocation7 + $0x44c] ss:$16 sps:$4 sm:$0xff]  }
 0x1a6   :  { %2229 = vmatprep.subr.bf16.mxu0 %v3177_v0  ;;  %2393 = vmatprep.subr.bf16.mxu1 %v3180_v3  ;;  %v353_v0 = vrot.slane %v352_v59, 1  ;;  %v424_v3 = vadd.f32 %v423_v24, %v422_v48  ;;  %v445_v8 = vadd.f32 %v444_v21, %v443_v57  ;;  %v3249_v24 = vld [vmem:[#allocation7 + $0x524] ss:$16 sps:$4 sm:$0xff]   ;;  %v3258_v21 = vld [vmem:[#allocation7 + $0x54c] ss:$16 sps:$4 sm:$0xff]  }
 0x1a8   :  { %v354_v9 = vadd.f32 %v353_v0, %v352_v59  ;;  %v446_v16 = vrot.slane %v445_v8, 1  ;;  %v3244_v59 = vld [vmem:[#allocation7 + $0x508] ss:$16 sps:$4 sm:$0xff]   ;;  %v3253_v0 = vld [vmem:[#allocation7 + $0x540] ss:$16 sps:$4 sm:$0xff]  }
 0x1a9   :  { %2230 = vmatpush1.bf16.msra.mxu0 %v3175_v55  ;;  %2394 = vmatpush1.bf16.msra.mxu1 %v3178_v6  ;;  %v3213_v55 = vld [vmem:[#allocation7 + $0x464] ss:$16 sps:$4 sm:$0xff]   ;;  %v3216_v6 = vld [vmem:[#allocation7 + $0x46c] ss:$16 sps:$4 sm:$0xff]  }
 0x1aa   :  { %2231 = vmatprep.subr.bf16.mxu0 %v3183_v10  ;;  %2395 = vmatprep.subr.bf16.mxu1 %v3186_v11  ;;  %v425_v10 = vrot.slane %v424_v3, 1  ;;  %v3211_v11 = vld [vmem:[#allocation7 + $0x460] ss:$16 sps:$4 sm:$0xff]   ;;  %v3798_v18 = vmul.f32 0.5, %v354_v9  ;;  %v447_v27 = vadd.f32 %v446_v16, %v445_v8  ;;  %v531_v8 = vsub.s32 4, %v3722_v33 }
 0x1ab   :  { %v3267_v9 = vld [vmem:[#allocation7 + $0x584] ss:$16 sps:$4 sm:$0xff]   ;;  %v3268_v16 = vld [vmem:[#allocation7 + $0x588] ss:$16 sps:$4 sm:$0xff]  }
 0x1ac   :  { %v460_v29 = vmul.f32 %v3798_v18, %v3798_v18  ;;  %v455_v35 = vmul.f32 0.5, %v447_v27  ;;  %v484_v7 = vsub.f32 %v3718_v51, %v3798_v18  ;;  %v532_v51 = vrot.slane %v3729_v38, %v531_v8  ;;  %v3273_v18 = vld [vmem:[#allocation7 + $0x5a4] ss:$16 sps:$4 sm:$0xff]  }
 0x1ad   :  { %2232 = vmatpush1.bf16.msra.mxu0 %v3181_v25  ;;  %2396 = vmatpush1.bf16.msra.mxu1 %v3184_v17  ;;  %v426_v25 = vadd.f32 %v425_v10, %v424_v3  ;;  %v3217_v17 = vld [vmem:[#allocation7 + $0x480] ss:$16 sps:$4 sm:$0xff]   ;;  %v3256_v3 = vld [vmem:[#allocation7 + $0x548] ss:$16 sps:$4 sm:$0xff]   ;;  %v3270_v10 = vld [vmem:[#allocation7 + $0x58c] ss:$16 sps:$4 sm:$0xff]  }
 0x1ae   :  { %2233 = vmatprep.subr.bf16.mxu0 %v3189_v22  ;;  %2397 = vmatprep.subr.bf16.mxu1 %v3192_v23  ;;  %v3225_v22 = vld [vmem:[#allocation7 + $0x4a4] ss:$16 sps:$4 sm:$0xff]   ;;  %v3228_v23 = vld [vmem:[#allocation7 + $0x4ac] ss:$16 sps:$4 sm:$0xff]   ;;  %v362_v27 = vsel %vm319_vm2, %v3724_v36, 0.0 }
 0x1af   :  { %v452_v28 = vmul.f32 0.5, %v426_v25 }
 0x1b1   :  { %2234 = vmatpush1.bf16.msra.mxu0 %v3187_v32  ;;  %2398 = vmatpush1.bf16.msra.mxu1 %v3190_v34  ;;  %v3231_v32 = vld [vmem:[#allocation7 + $0x4c4] ss:$16 sps:$4 sm:$0xff]   ;;  %v3234_v34 = vld [vmem:[#allocation7 + $0x4cc] ss:$16 sps:$4 sm:$0xff]  }
 0x1b2   :  { %2244 = vmatprep.subr.bf16.mxu0 %v3195_v39  ;;  %2408 = vmatprep.subr.bf16.mxu1 %v3198_v43  ;;  %v463_v39 = vmul.f32 %v3800_v26, %v3800_v26  ;;  %v468_v43 = vsub.f32 %v452_v28, %v460_v29  ;;  %v390_v28 = vmul.f32 %v3724_v36, %v3724_v36  ;;  %v3279_v29 = vld [vmem:[#allocation7 + $0x5c4] ss:$16 sps:$4 sm:$0xff]  }
 0x1b4   :  { %2236 = vmatmul.mubr.bf16.vlgmr.msra.gmra.mrb[8].mxu0 %v620_v52  ;;  %2400 = vmatmul.mubr.bf16.vlgmr.msra.gmra.mrb[8].mxu1 %v620_v52  ;;  %v471_v48 = vsub.f32 %v455_v35, %v463_v39  ;;  %v3238_v52 = vld [vmem:[#allocation7 + $0x4e8] ss:$16 sps:$4 sm:$0xff]   ;;  %v3277_v35 = vld [vmem:[#allocation7 + $0x5c0] ss:$16 sps:$4 sm:$0xff]  }
 0x1b5   :  { %2245 = vmatpush1.bf16.msra.mxu0 %v3193_v49  ;;  %2409 = vmatpush1.bf16.msra.mxu1 %v3196_v50  ;;  %v476_v49 = vmax.f32 %v468_v43, 0.0  ;;  %v3235_v50 = vld [vmem:[#allocation7 + $0x4e0] ss:$16 sps:$4 sm:$0xff]   ;;  %v3280_v39 = vld [vmem:[#allocation7 + $0x5c8] ss:$16 sps:$4 sm:$0xff]   ;;  %v434_v43 = vsel %vm319_vm2, %v390_v28, 0.0 }
 0x1b6   :  { %2246 = vmatprep.subr.bf16.mxu0 %v3201_v20  ;;  %2410 = vmatprep.subr.bf16.mxu1 %v3204_v53  ;;  %v3243_v20 = vld [vmem:[#allocation7 + $0x504] ss:$16 sps:$4 sm:$0xff]   ;;  %v3246_v53 = vld [vmem:[#allocation7 + $0x50c] ss:$16 sps:$4 sm:$0xff]   ;;  %v479_v54 = vmax.f32 %v471_v48, 0.0 }
 0x1b7   :  { %2276 = vmatprep.mubr.bf16.mxu0 %v623_v58  ;;  %2440 = vmatprep.mubr.bf16.mxu1 %v623_v58  ;;  %v492_v57 = vadd.f32 1e-05, %v476_v49  ;;  %v3241_v58 = vld [vmem:[#allocation7 + $0x500] ss:$16 sps:$4 sm:$0xff]   ;;  %v435_v49 = vrot.slane %v434_v43, 4 }
 0x1b8   :  { %v3327_v28 = vld [vmem:[#allocation7 + $0x6c4] ss:$16 sps:$4 sm:$0xff]  }
 0x1b9   :  { %2247 = vmatpush1.bf16.msra.mxu0 %v3199_v60  ;;  %2411 = vmatpush1.bf16.msra.mxu1 %v3202_v61  ;;  %v3252_v60 = vld [vmem:[#allocation7 + $0x52c] ss:$16 sps:$4 sm:$0xff]   ;;  %v495_v61 = vadd.f32 1e-05, %v479_v54  ;;  %3395 = vrsqrt.f32 %v492_v57 }
 0x1ba   :  { %2248 = vmatprep.subr.bf16.mxu0 %v3207_v63  ;;  %2412 = vmatprep.subr.bf16.mxu1 %v3210_v1  ;;  %v3247_v63 = vld [vmem:[#allocation7 + $0x520] ss:$16 sps:$4 sm:$0xff]   ;;  %v3250_v1 = vld [vmem:[#allocation7 + $0x528] ss:$16 sps:$4 sm:$0xff]  }
 0x1bb   :  { %3397 = vrsqrt.f32 %v495_v61  ;;  %v3297_v61 = vld [vmem:[#allocation7 + $0x624] ss:$16 sps:$4 sm:$0xff]  }
 0x1bd   :  { %2249 = vmatpush1.bf16.msra.mxu0 %v3205_v4  ;;  %2413 = vmatpush1.bf16.msra.mxu1 %v3208_v5  ;;  %v3261_v4 = vld [vmem:[#allocation7 + $0x564] ss:$16 sps:$4 sm:$0xff]   ;;  %v3264_v5 = vld [vmem:[#allocation7 + $0x56c] ss:$16 sps:$4 sm:$0xff]  }
 0x1be   :  { %2250 = vmatprep.subr.bf16.mxu0 %v3213_v55  ;;  %2414 = vmatprep.subr.bf16.mxu1 %v3216_v6  ;;  %v3259_v55 = vld [vmem:[#allocation7 + $0x560] ss:$16 sps:$4 sm:$0xff]   ;;  %v3262_v6 = vld [vmem:[#allocation7 + $0x568] ss:$16 sps:$4 sm:$0xff]  }
 0x1c1   :  { %2251 = vmatpush1.bf16.msra.mxu0 %v3211_v11  ;;  %2415 = vmatpush1.bf16.msra.mxu1 %v3214_v12  ;;  %v487_v12 = vsub.f32 %v3734_v41, %v3800_v26  ;;  %v3271_v41 = vld [vmem:[#allocation7 + $0x5a0] ss:$16 sps:$4 sm:$0xff]  }
 0x1c2   :  { %2252 = vmatprep.subr.bf16.mxu0 %v3219_v13  ;;  %2416 = vmatprep.subr.bf16.mxu1 %v3222_v14  ;;  %v543_v13 = vsub.s32 7, %v3722_v33 }
 0x1c3   :  { %v3396_v11 = vpop.eup %3395 }
 0x1c4   :  { %v508_v25 = vmul.f32 %v3396_v11, %v484_v7  ;;  %v3301_v7 = vld [vmem:[#allocation7 + $0x640] ss:$16 sps:$4 sm:$0xff]  }
 0x1c5   :  { %2253 = vmatpush1.bf16.msra.mxu0 %v3217_v17  ;;  %2417 = vmatpush1.bf16.msra.mxu1 %v3220_v19  ;;  %v3398_v14 = vpop.eup %3397  ;;  %v3276_v17 = vld [vmem:[#allocation7 + $0x5ac] ss:$16 sps:$4 sm:$0xff]  }
 0x1c6   :  { %2254 = vmatprep.subr.bf16.mxu0 %v3225_v22  ;;  %2418 = vmatprep.subr.bf16.mxu1 %v3228_v23  ;;  %v511_v19 = vmul.f32 %v3398_v14, %v487_v12  ;;  %v544_v22 = vrot.slane %v3729_v38, %v543_v13  ;;  %v3274_v23 = vld [vmem:[#allocation7 + $0x5a8] ss:$16 sps:$4 sm:$0xff]   ;;  %v557_v26 = vmul.f32 %v532_v51, %v508_v25 }
 0x1c7   :  { %v593_v38 = vrot.slane %v3736_v42, %v543_v13  ;;  %v3307_v13 = vld [vmem:[#allocation7 + $0x660] ss:$16 sps:$4 sm:$0xff]   ;;  %v3310_v14 = vld [vmem:[#allocation7 + $0x668] ss:$16 sps:$4 sm:$0xff]  }
 0x1c9   :  { %2255 = vmatpush1.bf16.msra.mxu0 %v3223_v30  ;;  %2419 = vmatpush1.bf16.msra.mxu1 %v3226_v31  ;;  %v3282_v30 = vld [vmem:[#allocation7 + $0x5cc] ss:$16 sps:$4 sm:$0xff]   ;;  %v581_v31 = vrot.slane %v3736_v42, %v531_v8  ;;  %v3304_v8 = vld [vmem:[#allocation7 + $0x648] ss:$16 sps:$4 sm:$0xff]  }
 0x1ca   :  { %2256 = vmatprep.subr.bf16.mxu0 %v3231_v32  ;;  %2420 = vmatprep.subr.bf16.mxu1 %v3234_v34  ;;  %v560_v32 = vmul.f32 %v544_v22, %v511_v19  ;;  %v363_v34 = vrot.slane %v362_v27, 4  ;;  %v3321_v19 = vld [vmem:[#allocation7 + $0x6a4] ss:$16 sps:$4 sm:$0xff]   ;;  %v3324_v22 = vld [vmem:[#allocation7 + $0x6ac] ss:$16 sps:$4 sm:$0xff]  }
 0x1cc   :  { %v364_v48 = vadd.f32 %v363_v34, %v362_v27  ;;  %v3322_v27 = vld [vmem:[#allocation7 + $0x6a8] ss:$16 sps:$4 sm:$0xff]   ;;  %v3336_v34 = vld [vmem:[#allocation7 + $0x6ec] ss:$16 sps:$4 sm:$0xff]  }
 0x1cd   :  { %2257 = vmatpush1.bf16.msra.mxu0 %v3229_v44  ;;  %2421 = vmatpush1.bf16.msra.mxu1 %v3232_v45  ;;  %v3285_v44 = vld [vmem:[#allocation7 + $0x5e4] ss:$16 sps:$4 sm:$0xff]   ;;  %v3288_v45 = vld [vmem:[#allocation7 + $0x5ec] ss:$16 sps:$4 sm:$0xff]  }
 0x1ce   :  { %2258 = vmatprep.subr.bf16.mxu0 %v3237_v46  ;;  %2422 = vmatprep.subr.bf16.mxu1 %v3240_v47  ;;  %v606_v46 = vadd.f32 %v581_v31, %v557_v26  ;;  %v609_v47 = vadd.f32 %v593_v38, %v560_v32  ;;  %v365_v57 = vrot.slane %v364_v48, 2  ;;  %v3319_v26 = vld [vmem:[#allocation7 + $0x6a0] ss:$16 sps:$4 sm:$0xff]   ;;  %v3328_v32 = vld [vmem:[#allocation7 + $0x6c8] ss:$16 sps:$4 sm:$0xff]  }
 0x1cf   :  { %v3325_v31 = vld [vmem:[#allocation7 + $0x6c0] ss:$16 sps:$4 sm:$0xff]   ;;  %v3333_v38 = vld [vmem:[#allocation7 + $0x6e4] ss:$16 sps:$4 sm:$0xff]  }
 0x1d0   :  { %v614_v42 = vmax.f32 %v606_v46, 0.0  ;;  %v617_v54 = vmax.f32 %v609_v47, 0.0  ;;  %v3337_v47 = vld [vmem:[#allocation7 + $0x700] ss:$16 sps:$4 sm:$0xff]  }
 0x1d1   :  { %2259 = vmatpush1.bf16.msra.mxu0 %v3235_v50  ;;  %2423 = vmatpush1.bf16.msra.mxu1 %v3238_v52  ;;  %v3283_v50 = vld [vmem:[#allocation7 + $0x5e0] ss:$16 sps:$4 sm:$0xff]   ;;  %v3286_v52 = vld [vmem:[#allocation7 + $0x5e8] ss:$16 sps:$4 sm:$0xff]  }
 0x1d2   :  { %2260 = vmatprep.subr.bf16.mxu0 %v3243_v20  ;;  %2424 = vmatprep.subr.bf16.mxu1 %v3246_v53  ;;  %v3291_v20 = vld [vmem:[#allocation7 + $0x604] ss:$16 sps:$4 sm:$0xff]   ;;  %v3294_v53 = vld [vmem:[#allocation7 + $0x60c] ss:$16 sps:$4 sm:$0xff]  }
 0x1d5   :  { %2261 = vmatpush1.bf16.msra.mxu0 %v3241_v58  ;;  %2425 = vmatpush1.bf16.msra.mxu1 %v3244_v59  ;;  %v436_v58 = vadd.f32 %v435_v49, %v434_v43  ;;  %v3289_v59 = vld [vmem:[#allocation7 + $0x600] ss:$16 sps:$4 sm:$0xff]   ;;  %v3334_v43 = vld [vmem:[#allocation7 + $0x6e8] ss:$16 sps:$4 sm:$0xff]   ;;  %v3345_v49 = vld [vmem:[#allocation7 + $0x724] ss:$16 sps:$4 sm:$0xff]  }
 0x1d6   :  { %2262 = vmatprep.subr.bf16.mxu0 %v3249_v24  ;;  %2426 = vmatprep.subr.bf16.mxu1 %v3252_v60  ;;  %v3292_v24 = vld [vmem:[#allocation7 + $0x608] ss:$16 sps:$4 sm:$0xff]   ;;  %v622_v60 = vpack.c.bf16 %v614_v42, %v614_v42 }
 0x1d7   :  { %v3346_v42 = vld [vmem:[#allocation7 + $0x728] ss:$16 sps:$4 sm:$0xff]  }
 0x1d9   :  { %2263 = vmatpush1.bf16.msra.mxu0 %v3247_v63  ;;  %2427 = vmatpush1.bf16.msra.mxu1 %v3250_v1  ;;  %v3300_v63 = vld [vmem:[#allocation7 + $0x62c] ss:$16 sps:$4 sm:$0xff]   ;;  %v625_v1 = vpack.c.bf16 %v617_v54, %v617_v54  ;;  %v3349_v54 = vld [vmem:[#allocation7 + $0x740] ss:$16 sps:$4 sm:$0xff]  }
 0x1da   :  { %2264 = vmatprep.subr.bf16.mxu0 %v3255_v2  ;;  %2428 = vmatprep.subr.bf16.mxu1 %v3258_v21  ;;  %v366_v2 = vadd.f32 %v365_v57, %v364_v48  ;;  %v437_v21 = vrot.slane %v436_v58, 2  ;;  %v3340_v48 = vld [vmem:[#allocation7 + $0x708] ss:$16 sps:$4 sm:$0xff]  }
 0x1db   :  { %v3352_v57 = vld [vmem:[#allocation7 + $0x748] ss:$16 sps:$4 sm:$0xff]  }
 0x1dd   :  { %2265 = vmatpush1.bf16.msra.mxu0 %v3253_v0  ;;  %2429 = vmatpush1.bf16.msra.mxu1 %v3256_v3  ;;  %v3295_v0 = vld [vmem:[#allocation7 + $0x620] ss:$16 sps:$4 sm:$0xff]   ;;  %v3298_v3 = vld [vmem:[#allocation7 + $0x628] ss:$16 sps:$4 sm:$0xff]  }
 0x1de   :  { %2266 = vmatprep.subr.bf16.mxu0 %v3261_v4  ;;  %2430 = vmatprep.subr.bf16.mxu1 %v3264_v5  ;;  %v3303_v4 = vld [vmem:[#allocation7 + $0x644] ss:$16 sps:$4 sm:$0xff]   ;;  %v3306_v5 = vld [vmem:[#allocation7 + $0x64c] ss:$16 sps:$4 sm:$0xff]  }
 0x1e1   :  { %2267 = vmatpush1.bf16.msra.mxu0 %v3259_v55  ;;  %2431 = vmatpush1.bf16.msra.mxu1 %v3262_v6  ;;  %v367_v55 = vrot.slane %v366_v2, 1  ;;  %v438_v6 = vadd.f32 %v437_v21, %v436_v58  ;;  %v3357_v58 = vld [vmem:[#allocation7 + $0x764] ss:$16 sps:$4 sm:$0xff]  }
 0x1e2   :  { %2268 = vmatprep.subr.bf16.mxu0 %v3267_v9  ;;  %2432 = vmatprep.subr.bf16.mxu1 %v3270_v10  ;;  %v3309_v9 = vld [vmem:[#allocation7 + $0x664] ss:$16 sps:$4 sm:$0xff]   ;;  %v3312_v10 = vld [vmem:[#allocation7 + $0x66c] ss:$16 sps:$4 sm:$0xff]  }
 0x1e3   :  { %v368_v11 = vadd.f32 %v367_v55, %v366_v2  ;;  %v439_v12 = vrot.slane %v438_v6, 1  ;;  %v3366_v2 = vld [vmem:[#allocation7 + $0x78c] ss:$16 sps:$4 sm:$0xff]  }
 0x1e5   :  { %2269 = vmatpush1.bf16.msra.mxu0 %v3265_v15  ;;  %2433 = vmatpush1.bf16.msra.mxu1 %v3268_v16  ;;  %v3315_v15 = vld [vmem:[#allocation7 + $0x684] ss:$16 sps:$4 sm:$0xff]   ;;  %v3318_v16 = vld [vmem:[#allocation7 + $0x68c] ss:$16 sps:$4 sm:$0xff]   ;;  %v3821_v25 = vmul.f32 0.5, %v368_v11  ;;  %v440_v51 = vadd.f32 %v439_v12, %v438_v6 }
 0x1e6   :  { %2270 = vmatprep.subr.bf16.mxu0 %v3273_v18  ;;  %2434 = vmatprep.subr.bf16.mxu1 %v3276_v17  ;;  %v3313_v18 = vld [vmem:[#allocation7 + $0x680] ss:$16 sps:$4 sm:$0xff]   ;;  %v3316_v17 = vld [vmem:[#allocation7 + $0x688] ss:$16 sps:$4 sm:$0xff]   ;;  %v3369_v6 = vld [vmem:[#allocation7 + $0x7a4] ss:$16 sps:$4 sm:$0xff]  }
 0x1e7   :  { %v3378_v11 = vld [vmem:[#allocation7 + $0x7cc] ss:$16 sps:$4 sm:$0xff]  }
 0x1e8   :  { %v3410_v12 = vld [vmem:[#allocation6] sm:$0xff] }
 0x1e9   :  { %2271 = vmatpush1.bf16.msra.mxu0 %v3271_v41  ;;  %2435 = vmatpush1.bf16.msra.mxu1 %v3274_v23  ;;  %v454_v41 = vmul.f32 0.5, %v440_v51  ;;  %v462_v23 = vmul.f32 %v3821_v25, %v3821_v25 }
 0x1ea   :  { %2272 = vmatprep.subr.bf16.mxu0 %v3279_v29  ;;  %2436 = vmatprep.subr.bf16.mxu1 %v3282_v30  ;;  %v3330_v29 = vld [vmem:[#allocation7 + $0x6cc] ss:$16 sps:$4 sm:$0xff]  }
 0x1eb   :  { %v470_v30 = vsub.f32 %v454_v41, %v462_v23 }
 0x1ed   :  { %2273 = vmatpush1.bf16.msra.mxu0 %v3277_v35  ;;  %2437 = vmatpush1.bf16.msra.mxu1 %v3280_v39  ;;  %v478_v35 = vmax.f32 %v470_v30, 0.0  ;;  %v3331_v39 = vld [vmem:[#allocation7 + $0x6e0] ss:$16 sps:$4 sm:$0xff]  }
 0x1ee   :  { %2274 = vmatprep.subr.bf16.mxu0 %v3285_v44  ;;  %2438 = vmatprep.subr.bf16.mxu1 %v3288_v45  ;;  %v3339_v44 = vld [vmem:[#allocation7 + $0x704] ss:$16 sps:$4 sm:$0xff]   ;;  %v3342_v45 = vld [vmem:[#allocation7 + $0x70c] ss:$16 sps:$4 sm:$0xff]  }
 0x1ef   :  { %v494_v46 = vadd.f32 1e-05, %v478_v35 }
 0x1f1   :  { %2275 = vmatpush1.bf16.msra.mxu0 %v3283_v50  ;;  %2439 = vmatpush1.bf16.msra.mxu1 %v3286_v52  ;;  %v3348_v50 = vld [vmem:[#allocation7 + $0x72c] ss:$16 sps:$4 sm:$0xff]   ;;  %3399 = vrsqrt.f32 %v494_v46  ;;  %v3343_v52 = vld [vmem:[#allocation7 + $0x720] ss:$16 sps:$4 sm:$0xff]  }
 0x1f2   :  { %2285 = vmatprep.subr.bf16.mxu0 %v3291_v20  ;;  %2449 = vmatprep.subr.bf16.mxu1 %v3294_v53  ;;  %v3351_v20 = vld [vmem:[#allocation7 + $0x744] ss:$16 sps:$4 sm:$0xff]   ;;  %v3354_v53 = vld [vmem:[#allocation7 + $0x74c] ss:$16 sps:$4 sm:$0xff]  }
 0x1f4   :  { %2277 = vmatmul.mubr.bf16.vlgmr.msra.gmra.mrb[8].mxu0 %v622_v60  ;;  %2441 = vmatmul.mubr.bf16.vlgmr.msra.gmra.mrb[8].mxu1 %v622_v60  ;;  %v3358_v60 = vld [vmem:[#allocation7 + $0x768] ss:$16 sps:$4 sm:$0xff]  }
 0x1f5   :  { %2286 = vmatpush1.bf16.msra.mxu0 %v3289_v59  ;;  %2450 = vmatpush1.bf16.msra.mxu1 %v3292_v24  ;;  %v3360_v59 = vld [vmem:[#allocation7 + $0x76c] ss:$16 sps:$4 sm:$0xff]   ;;  %v3355_v24 = vld [vmem:[#allocation7 + $0x760] ss:$16 sps:$4 sm:$0xff]  }
 0x1f6   :  { %2287 = vmatprep.subr.bf16.mxu0 %v3297_v61  ;;  %2451 = vmatprep.subr.bf16.mxu1 %v3300_v63  ;;  %v486_v61 = vsub.f32 %v3724_v36, %v3821_v25  ;;  %v539_v63 = vsub.s32 6, %v3722_v33  ;;  %v3367_v36 = vld [vmem:[#allocation7 + $0x7a0] ss:$16 sps:$4 sm:$0xff]   ;;  %v3384_v25 = vld [vmem:[#allocation7 + $0x7ec] ss:$16 sps:$4 sm:$0xff]  }
 0x1f7   :  { %2317 = vmatprep.mubr.bf16.mxu0 %v625_v1  ;;  %2481 = vmatprep.mubr.bf16.mxu1 %v625_v1  ;;  %v3363_v1 = vld [vmem:[#allocation7 + $0x784] ss:$16 sps:$4 sm:$0xff]  }
 0x1f9   :  { %2288 = vmatpush1.bf16.msra.mxu0 %v3295_v0  ;;  %2452 = vmatpush1.bf16.msra.mxu1 %v3298_v3  ;;  %v3361_v0 = vld [vmem:[#allocation7 + $0x780] ss:$16 sps:$4 sm:$0xff]   ;;  %v3364_v3 = vld [vmem:[#allocation7 + $0x788] ss:$16 sps:$4 sm:$0xff]  }
 0x1fa   :  { %2289 = vmatprep.subr.bf16.mxu0 %v3303_v4  ;;  %2453 = vmatprep.subr.bf16.mxu1 %v3306_v5  ;;  %v3409_v5 = vld [vmem:[#allocation4] sm:$0xff] }
 0x1fb   :  { %v3400_v21 = vpop.eup %3399  ;;  %v540_v55 = vrot.slane %v3409_v5, %v539_v63 }
 0x1fc   :  { %v510_v4 = vmul.f32 %v3400_v21, %v486_v61 }
 0x1fd   :  { %2290 = vmatpush1.bf16.msra.mxu0 %v3301_v7  ;;  %2454 = vmatpush1.bf16.msra.mxu1 %v3304_v8  ;;  %v3372_v7 = vld [vmem:[#allocation7 + $0x7ac] ss:$16 sps:$4 sm:$0xff]   ;;  %v3370_v8 = vld [vmem:[#allocation7 + $0x7a8] ss:$16 sps:$4 sm:$0xff]  }
 0x1fe   :  { %2291 = vmatprep.subr.bf16.mxu0 %v3309_v9  ;;  %2455 = vmatprep.subr.bf16.mxu1 %v3312_v10  ;;  %v559_v9 = vmul.f32 %v540_v55, %v510_v4  ;;  %v3375_v10 = vld [vmem:[#allocation7 + $0x7c4] ss:$16 sps:$4 sm:$0xff]  }
 0x201   :  { %2292 = vmatpush1.bf16.msra.mxu0 %v3307_v13  ;;  %2456 = vmatpush1.bf16.msra.mxu1 %v3310_v14  ;;  %v589_v13 = vrot.slane %v3410_v12, %v539_v63  ;;  %v3373_v14 = vld [vmem:[#allocation7 + $0x7c0] ss:$16 sps:$4 sm:$0xff]  }
 0x202   :  { %2293 = vmatprep.subr.bf16.mxu0 %v3315_v15  ;;  %2457 = vmatprep.subr.bf16.mxu1 %v3318_v16  ;;  %v3376_v15 = vld [vmem:[#allocation7 + $0x7c8] ss:$16 sps:$4 sm:$0xff]   ;;  %v3381_v16 = vld [vmem:[#allocation7 + $0x7e4] ss:$16 sps:$4 sm:$0xff]  }
 0x203   :  { %v608_v51 = vadd.f32 %v589_v13, %v559_v9 }
 0x205   :  { %2294 = vmatpush1.bf16.msra.mxu0 %v3313_v18  ;;  %2458 = vmatpush1.bf16.msra.mxu1 %v3316_v17  ;;  %v3379_v18 = vld [vmem:[#allocation7 + $0x7e0] ss:$16 sps:$4 sm:$0xff]   ;;  %v3382_v17 = vld [vmem:[#allocation7 + $0x7e8] ss:$16 sps:$4 sm:$0xff]  }
 0x206   :  { %2295 = vmatprep.subr.bf16.mxu0 %v3321_v19  ;;  %2459 = vmatprep.subr.bf16.mxu1 %v3324_v22  ;;  %v616_v19 = vmax.f32 %v608_v51, 0.0 }
 0x208   :  { %v624_v22 = vpack.c.bf16 %v616_v19, %v616_v19 }
 0x209   :  { %2296 = vmatpush1.bf16.msra.mxu0 %v3319_v26  ;;  %2460 = vmatpush1.bf16.msra.mxu1 %v3322_v27 }
 0x20a   :  { %2297 = vmatprep.subr.bf16.mxu0 %v3327_v28  ;;  %2461 = vmatprep.subr.bf16.mxu1 %v3330_v29 }
 0x20d   :  { %2298 = vmatpush1.bf16.msra.mxu0 %v3325_v31  ;;  %2462 = vmatpush1.bf16.msra.mxu1 %v3328_v32 }
 0x20e   :  { %2299 = vmatprep.subr.bf16.mxu0 %v3333_v38  ;;  %2463 = vmatprep.subr.bf16.mxu1 %v3336_v34 }
 0x211   :  { %2300 = vmatpush1.bf16.msra.mxu0 %v3331_v39  ;;  %2464 = vmatpush1.bf16.msra.mxu1 %v3334_v43 }
 0x212   :  { %2301 = vmatprep.subr.bf16.mxu0 %v3339_v44  ;;  %2465 = vmatprep.subr.bf16.mxu1 %v3342_v45 }
 0x215   :  { %2302 = vmatpush1.bf16.msra.mxu0 %v3337_v47  ;;  %2466 = vmatpush1.bf16.msra.mxu1 %v3340_v48 }
 0x216   :  { %2303 = vmatprep.subr.bf16.mxu0 %v3345_v49  ;;  %2467 = vmatprep.subr.bf16.mxu1 %v3348_v50 }
 0x219   :  { %2304 = vmatpush1.bf16.msra.mxu0 %v3343_v52  ;;  %2468 = vmatpush1.bf16.msra.mxu1 %v3346_v42 }
 0x21a   :  { %2305 = vmatprep.subr.bf16.mxu0 %v3351_v20  ;;  %2469 = vmatprep.subr.bf16.mxu1 %v3354_v53 }
 0x21d   :  { %2306 = vmatpush1.bf16.msra.mxu0 %v3349_v54  ;;  %2470 = vmatpush1.bf16.msra.mxu1 %v3352_v57 }
 0x21e   :  { %2307 = vmatprep.subr.bf16.mxu0 %v3357_v58  ;;  %2471 = vmatprep.subr.bf16.mxu1 %v3360_v59 }
 0x221   :  { %2308 = vmatpush1.bf16.msra.mxu0 %v3355_v24  ;;  %2472 = vmatpush1.bf16.msra.mxu1 %v3358_v60 }
 0x222   :  { %2309 = vmatprep.subr.bf16.mxu0 %v3363_v1  ;;  %2473 = vmatprep.subr.bf16.mxu1 %v3366_v2 }
 0x225   :  { %2310 = vmatpush1.bf16.msra.mxu0 %v3361_v0  ;;  %2474 = vmatpush1.bf16.msra.mxu1 %v3364_v3 }
 0x226   :  { %2311 = vmatprep.subr.bf16.mxu0 %v3369_v6  ;;  %2475 = vmatprep.subr.bf16.mxu1 %v3372_v7 }
 0x229   :  { %2312 = vmatpush1.bf16.msra.mxu0 %v3367_v36  ;;  %2476 = vmatpush1.bf16.msra.mxu1 %v3370_v8 }
 0x22a   :  { %2313 = vmatprep.subr.bf16.mxu0 %v3375_v10  ;;  %2477 = vmatprep.subr.bf16.mxu1 %v3378_v11 }
 0x22d   :  { %2314 = vmatpush1.bf16.msra.mxu0 %v3373_v14  ;;  %2478 = vmatpush1.bf16.msra.mxu1 %v3376_v15 }
 0x22e   :  { %2315 = vmatprep.subr.bf16.mxu0 %v3381_v16  ;;  %2479 = vmatprep.subr.bf16.mxu1 %v3384_v25 }
 0x231   :  { %2316 = vmatpush1.bf16.msra.mxu0 %v3379_v18  ;;  %2480 = vmatpush1.bf16.msra.mxu1 %v3382_v17 }
 0x234   :  { %2318 = vmatmul.mubr.bf16.vlgmr.msra.gmra.mrb[8].mxu0 %v624_v22  ;;  %2482 = vmatmul.mubr.bf16.vlgmr.msra.gmra.mrb[8].mxu1 %v624_v22 }
 0x307   :  { %v3828_v41 = vpop.f32.mrb[8].mxu0  ;;  %v3830_v23 = vpop.f32.mrb[8].mxu1 }
 0x308   :  { %v2492_v26 = vsel %vm319_vm2, %v3828_v41, 0.0  ;;  %v2524_v27 = vmul.f32 %v3828_v41, %v3828_v41  ;;  %v2506_v28 = vsel %vm319_vm2, %v3830_v23, 0.0  ;;  %v2526_v29 = vmul.f32 %v3830_v23, %v3830_v23  ;;  %v3840_v30 = vpop.f32.mrb[9].mxu0  ;;  %v3842_v31 = vpop.f32.mrb[9].mxu1 }
 0x309   :  { %v2493_v32 = vrot.slane %v2492_v26, 4  ;;  %v2507_v38 = vrot.slane %v2506_v28, 4  ;;  %v2499_v34 = vsel %vm319_vm2, %v3840_v30, 0.0  ;;  %v2525_v35 = vmul.f32 %v3840_v30, %v3840_v30  ;;  %v2323_v39 = vpop.f32.mrb[10].mxu0  ;;  %v2487_v43 = vpop.f32.mrb[10].mxu1 }
 0x30a   :  { %v2528_v44 = vsel %vm319_vm2, %v2524_v27, 0.0  ;;  %v2542_v45 = vsel %vm319_vm2, %v2526_v29, 0.0  ;;  %v2500_v46 = vrot.slane %v2499_v34, 4  ;;  %v2513_v47 = vsel %vm319_vm2, %v3842_v31, 0.0  ;;  %v2324_v48 = vpop.f32.mrb[11].mxu0  ;;  %v2488_v49 = vpop.f32.mrb[11].mxu1 }
 0x30b   :  { %v2494_v50 = vadd.f32 %v2493_v32, %v2492_v26  ;;  %v2529_v52 = vrot.slane %v2528_v44, 4  ;;  %v2508_v42 = vadd.f32 %v2507_v38, %v2506_v28  ;;  %v2543_v20 = vrot.slane %v2542_v45, 4 }
 0x30c   :  { %v2501_v53 = vadd.f32 %v2500_v46, %v2499_v34  ;;  %v2535_v54 = vsel %vm319_vm2, %v2525_v35, 0.0  ;;  %v2514_v57 = vrot.slane %v2513_v47, 4  ;;  %v2527_v58 = vmul.f32 %v3842_v31, %v3842_v31 }
 0x30d   :  { %v2495_v59 = vrot.slane %v2494_v50, 2  ;;  %v2530_v24 = vadd.f32 %v2529_v52, %v2528_v44  ;;  %v2509_v60 = vrot.slane %v2508_v42, 2  ;;  %v2544_v61 = vadd.f32 %v2543_v20, %v2542_v45 }
 0x30e   :  { %v2502_v63 = vrot.slane %v2501_v53, 2  ;;  %v2536_v1 = vrot.slane %v2535_v54, 4  ;;  %v2515_v2 = vadd.f32 %v2514_v57, %v2513_v47  ;;  %v2549_v21 = vsel %vm319_vm2, %v2527_v58, 0.0 }
 0x30f   :  { %v2496_v0 = vadd.f32 %v2495_v59, %v2494_v50  ;;  %v2531_v3 = vrot.slane %v2530_v24, 2  ;;  %v2510_v4 = vadd.f32 %v2509_v60, %v2508_v42  ;;  %v2545_v5 = vrot.slane %v2544_v61, 2 }
 0x310   :  { %v2503_v55 = vadd.f32 %v2502_v63, %v2501_v53  ;;  %v2537_v6 = vadd.f32 %v2536_v1, %v2535_v54  ;;  %v2516_v7 = vrot.slane %v2515_v2, 2  ;;  %v2550_v36 = vrot.slane %v2549_v21, 4 }
 0x311   :  { %v2497_v8 = vrot.slane %v2496_v0, 1  ;;  %v2532_v9 = vadd.f32 %v2531_v3, %v2530_v24  ;;  %v2511_v10 = vrot.slane %v2510_v4, 1  ;;  %v2546_v11 = vadd.f32 %v2545_v5, %v2544_v61  ;;  %v2490_v3 = vld [vmem:[#allocation9] sm:$0xf] }
 0x312   :  { %v2504_v12 = vrot.slane %v2503_v55, 1  ;;  %v2538_v13 = vrot.slane %v2537_v6, 2  ;;  %v2517_v14 = vadd.f32 %v2516_v7, %v2515_v2  ;;  %v2551_v15 = vadd.f32 %v2550_v36, %v2549_v21 }
 0x313   :  { %v2498_v16 = vadd.f32 %v2497_v8, %v2496_v0  ;;  %v2533_v25 = vrot.slane %v2532_v9, 1  ;;  %v2512_v51 = vadd.f32 %v2511_v10, %v2510_v4  ;;  %v2547_v18 = vrot.slane %v2546_v11, 1  ;;  %v2491_v4 = vld [vmem:[#allocation10] sm:$0xf] }
 0x314   :  { %v2505_v17 = vadd.f32 %v2504_v12, %v2503_v55  ;;  %v2539_v19 = vadd.f32 %v2538_v13, %v2537_v6  ;;  %v2518_v22 = vrot.slane %v2517_v14, 1  ;;  %v2552_v26 = vrot.slane %v2551_v15, 2 }
 0x315   :  { %v2520_v27 = vmul.f32 0.5, %v2498_v16  ;;  %v2534_v28 = vadd.f32 %v2533_v25, %v2532_v9  ;;  %v2522_v29 = vmul.f32 0.5, %v2512_v51  ;;  %v2548_v32 = vadd.f32 %v2547_v18, %v2546_v11 }
 0x316   :  { %v2521_v38 = vmul.f32 0.5, %v2505_v17  ;;  %v2540_v34 = vrot.slane %v2539_v19, 1  ;;  %v2519_v35 = vadd.f32 %v2518_v22, %v2517_v14  ;;  %v2553_v39 = vadd.f32 %v2552_v26, %v2551_v15 }
 0x317   :  { %v2556_v43 = vmul.f32 0.5, %v2534_v28  ;;  %v2560_v44 = vmul.f32 %v2520_v27, %v2520_v27  ;;  %v2558_v45 = vmul.f32 0.5, %v2548_v32  ;;  %v2562_v46 = vmul.f32 %v2522_v29, %v2522_v29 }
 0x318   :  { %v2541_v47 = vadd.f32 %v2540_v34, %v2539_v19  ;;  %v2561_v48 = vmul.f32 %v2521_v38, %v2521_v38  ;;  %v2523_v50 = vmul.f32 0.5, %v2519_v35  ;;  %v2554_v52 = vrot.slane %v2553_v39, 1 }
 0x319   :  { %v2564_v49 = vsub.f32 %v2556_v43, %v2560_v44  ;;  %v2566_v42 = vsub.f32 %v2558_v45, %v2562_v46  ;;  %v2572_v5 = vsub.f32 %v3828_v41, %v2520_v27  ;;  %v2592_v55 = vrot.slane %v2490_v3, %v3727_v37 }
 0x31a   :  { %v2557_v20 = vmul.f32 0.5, %v2541_v47  ;;  %v2555_v54 = vadd.f32 %v2554_v52, %v2553_v39  ;;  %v2563_v57 = vmul.f32 %v2523_v50, %v2523_v50  ;;  %v2574_v7 = vsub.f32 %v3830_v23, %v2522_v29 }
 0x31b   :  { %v2568_v53 = vmax.f32 %v2564_v49, 0.0  ;;  %v2570_v58 = vmax.f32 %v2566_v42, 0.0  ;;  %v2600_v36 = vrot.slane %v2490_v3, %v3777_v56  ;;  %v2617_v10 = vrot.slane %v2491_v4, %v3727_v37 }
 0x31c   :  { %v2565_v59 = vsub.f32 %v2557_v20, %v2561_v48  ;;  %v2559_v60 = vmul.f32 0.5, %v2555_v54  ;;  %v2573_v12 = vsub.f32 %v3840_v30, %v2521_v38  ;;  %v2596_v13 = vrot.slane %v2490_v3, %v3732_v40 }
 0x31d   :  { %v2576_v24 = vadd.f32 1e-05, %v2568_v53  ;;  %v2578_v61 = vadd.f32 1e-05, %v2570_v58  ;;  %v2625_v41 = vrot.slane %v2491_v4, %v3777_v56  ;;  %v3560_v16 = vmov 1966171168  }
 0x31e   :  { %v2569_v63 = vmax.f32 %v2565_v59, 0.0  ;;  %v2567_v1 = vsub.f32 %v2559_v60, %v2563_v57  ;;  %v2653_v25 = vunpack.c.l.s4 %v3560_v16  ;;  %v2621_v23 = vrot.slane %v2491_v4, %v3732_v40 }
 0x31f   :  { %3401 = vrsqrt.f32 %v2576_v24  ;;  %v2575_v19 = vsub.f32 %v3842_v31, %v2523_v50  ;;  %v2604_v37 = vrot.slane %v2490_v3, %v3758_v62  ;;  %v2629_v29 = vrot.slane %v2491_v4, %v3758_v62 }
 0x320   :  { %3403 = vrsqrt.f32 %v2578_v61  ;;  %v2577_v2 = vadd.f32 1e-05, %v2569_v63  ;;  %v2571_v21 = vmax.f32 %v2567_v1, 0.0  ;;  %v2654_v27 = vunpack.c.0.s8 %v2653_v25 }
 0x322   :  { %3405 = vrsqrt.f32 %v2577_v2  ;;  %v2579_v0 = vadd.f32 1e-05, %v2571_v21  ;;  %v2657_v39 = vsub.s32 %v2654_v27, %v3722_v33 }
 0x324   :  { %3407 = vrsqrt.f32 %v2579_v0 }
 0x329   :  { %v3402_v6 = vpop.eup %3401 }
 0x32a   :  { %v3404_v8 = vpop.eup %3403  ;;  %v2584_v9 = vmul.f32 %v3402_v6, %v2572_v5 }
 0x32b   :  { %v2586_v11 = vmul.f32 %v3404_v8, %v2574_v7 }
 0x32c   :  { %v3406_v14 = vpop.eup %3405  ;;  %v2609_v15 = vmul.f32 %v2592_v55, %v2584_v9 }
 0x32d   :  { %v2611_v51 = vmul.f32 %v2600_v36, %v2586_v11  ;;  %v2585_v18 = vmul.f32 %v3406_v14, %v2573_v12 }
 0x32e   :  { %v2634_v17 = vadd.f32 %v2617_v10, %v2609_v15  ;;  %v3408_v22 = vpop.eup %3407 }
 0x32f   :  { %v2610_v26 = vmul.f32 %v2596_v13, %v2585_v18  ;;  %v2636_v30 = vadd.f32 %v2625_v41, %v2611_v51  ;;  %v2587_v28 = vmul.f32 %v3408_v22, %v2575_v19 }
 0x330   :  { %v2638_v32 = vmax.f32 %v2634_v17, 0.0 }
 0x331   :  { %v2635_v56 = vadd.f32 %v2621_v23, %v2610_v26  ;;  %v2612_v38 = vmul.f32 %v2604_v37, %v2587_v28  ;;  %v2640_v35 = vmax.f32 %v2636_v30, 0.0 }
 0x333   :  { %v2639_v34 = vmax.f32 %v2635_v56, 0.0  ;;  %v2637_v40 = vadd.f32 %v2629_v29, %v2612_v38 }
 0x335   :  { %v2956_v43 = vpack.c.bf16 %v2639_v34, %v2638_v32  ;;  %v2641_v44 = vmax.f32 %v2637_v40, 0.0 }
 0x337   :  { %v2658_v31 = vrot.slane %v2956_v43, %v2657_v39  ;;  %v2957_v45 = vpack.c.bf16 %v2641_v44, %v2640_v35 }
 0x339   :  { %v2665_v46 = vrot.slane %v2957_v45, %v2657_v39 }
 0x33b   :  { %v2666_v47 = vcombine.low %v2658_v31, %v2665_v46 }
 0x33d   :  { %2958 = vst.sshfl [vmem:[%s3879_s7] sm:$0x55 pattern:$0x73625140] %v2666_v47 }
 0x33e   :  { %2680 = vsyncpa [#allocation3], 1 }
 0x33f   :  { %2681 = vsyncpa [#allocation5], 1 }
 0x340   :  { %2682 = vsyncpa [#allocation8], 1 }
 0x341   :  { %2683 = vsyncpa [#allocation11], 1 }

</bundles_post_ra>
